<compile_context>
chip_gen: v6e
topology: v6e:2x2x1
jax: 0.10.0
libtpu: 0.0.40
codegen_flags: <defaults>
</compile_context>

<pallas_src>
import jax
import jax.numpy as jnp
from jax import lax
from jax.experimental import pallas as pl
from jax.experimental.pallas import tpu as pltpu

H1 = 128   # lstm1 hidden size
H2 = 64    # lstm2 hidden size
OUT = 6    # final logits


def _make_kernel(T, BP):
    """Builds the fused kernel for a fixed (T, padded-batch) size."""

    def kernel(x_ref,
               wih1_ref, whh1_ref, b1_ref,
               wih2_ref, whh2_ref, b2_ref,
               w3_ref, b3_ref, w4_ref, b4_ref,
               out_ref,
               g1_ref, h1seq_ref, g2_ref):
        # ---- pass A: hoisted input projection for lstm1 (all timesteps) ----
        g1_ref[...] = (
            jnp.dot(x_ref[...], wih1_ref[...], preferred_element_type=jnp.float32)
            + b1_ref[...])

        # ---- pass B: lstm1 serial recurrence (only h @ Whh1 per step) ----
        whh1 = whh1_ref[...]

        def step1(t, carry):
            h, c = carry
            base = t * BP
            gates = (g1_ref[pl.ds(base, BP), :]
                     + jnp.dot(h, whh1, preferred_element_type=jnp.float32))
            i = jax.nn.sigmoid(gates[:, 0 * H1:1 * H1])
            f = jax.nn.sigmoid(gates[:, 1 * H1:2 * H1])
            g = jnp.tanh(gates[:, 2 * H1:3 * H1])
            o = jax.nn.sigmoid(gates[:, 3 * H1:4 * H1])
            c = f * c + i * g
            h = o * jnp.tanh(c)
            h1seq_ref[pl.ds(base, BP), :] = h
            return (h, c)

        z1 = jnp.zeros((BP, H1), jnp.float32)
        lax.fori_loop(0, T, step1, (z1, z1), unroll=True)

        # ---- pass C: hoisted input projection for lstm2 (all timesteps) ----
        g2_ref[...] = (
            jnp.dot(h1seq_ref[...], wih2_ref[...], preferred_element_type=jnp.float32)
            + b2_ref[...])

        # ---- pass D: lstm2 serial recurrence (only h @ Whh2 per step) ----
        whh2 = whh2_ref[...]

        def step2(t, carry):
            h, c = carry
            base = t * BP
            gates = (g2_ref[pl.ds(base, BP), :]
                     + jnp.dot(h, whh2, preferred_element_type=jnp.float32))
            i = jax.nn.sigmoid(gates[:, 0 * H2:1 * H2])
            f = jax.nn.sigmoid(gates[:, 1 * H2:2 * H2])
            g = jnp.tanh(gates[:, 2 * H2:3 * H2])
            o = jax.nn.sigmoid(gates[:, 3 * H2:4 * H2])
            c = f * c + i * g
            h = o * jnp.tanh(c)
            return (h, c)

        z2 = jnp.zeros((BP, H2), jnp.float32)
        h2_final, _ = lax.fori_loop(0, T, step2, (z2, z2), unroll=True)

        # ---- pass E: MLP head on lstm2's final hidden state ----
        z = jnp.dot(h2_final, w3_ref[...], preferred_element_type=jnp.float32) + b3_ref[...]
        z = jnp.maximum(z, 0.0)
        # TODO(synk): nn.Dropout(0.3) is stochastic in train mode; implemented
        # here as identity (eval-mode semantics).
        out_ref[...] = (jnp.dot(z, w4_ref[...], preferred_element_type=jnp.float32)
                        + b4_ref[...]).astype(out_ref.dtype)

    return kernel


def _const_spec(arr):
    nd = arr.ndim
    return pl.BlockSpec(arr.shape, lambda i, nd=nd: (0,) * nd)


def stack_lstm_forward(x_btd, params):
    """x_btd: (B, T, D) float32, batch_first like the PyTorch module."""
    B, T, D = x_btd.shape
    BP = ((B + 7) // 8) * 8          # pad batch to sublane multiple (dense vregs)
    if BP != B:
        x_btd = jnp.pad(x_btd, ((0, BP - B), (0, 0), (0, 0)))
    # time-major, flattened so the hoisted projections are one big matmul each
    x_flat = jnp.transpose(x_btd, (1, 0, 2)).reshape(T * BP, D)

    (wih1, whh1, b1, wih2, whh2, b2, w3, b3, w4, b4) = params

    grid_spec = pltpu.PrefetchScalarGridSpec(
        num_scalar_prefetch=0,
        grid=(1,),
        in_specs=[
            pl.BlockSpec((T * BP, D), lambda i: (0, 0)),   # whole sequence in VMEM
            _const_spec(wih1), _const_spec(whh1), _const_spec(b1),
            _const_spec(wih2), _const_spec(whh2), _const_spec(b2),
            _const_spec(w3), _const_spec(b3),
            _const_spec(w4), _const_spec(b4),
        ],
        out_specs=pl.BlockSpec((BP, OUT), lambda i: (0, 0)),
        scratch_shapes=[
            pltpu.VMEM((T * BP, 4 * H1), jnp.float32),  # gates1 (hoisted x @ Wih1 + b1)
            pltpu.VMEM((T * BP, H1), jnp.float32),      # h1 sequence
            pltpu.VMEM((T * BP, 4 * H2), jnp.float32),  # gates2 (hoisted h1 @ Wih2 + b2)
        ],
    )

    out = pl.pallas_call(
        _make_kernel(T, BP),
        out_shape=jax.ShapeDtypeStruct((BP, OUT), jnp.float32),
        grid_spec=grid_spec,
        compiler_params=pltpu.CompilerParams(
            dimension_semantics=("arbitrary",)),
    )(x_flat, wih1, whh1, b1, wih2, whh2, b2, w3, b3, w4, b4)

    return out[:B]


# ---------------- pure-JAX reference (for correctness check) ----------------
def _lstm_ref(x_btd, w_ih, w_hh, b, hid):
    B = x_btd.shape[0]

    def step(carry, x_t):
        h, c = carry
        gates = x_t @ w_ih + h @ w_hh + b
        i = jax.nn.sigmoid(gates[:, :hid])
        f = jax.nn.sigmoid(gates[:, hid:2 * hid])
        g = jnp.tanh(gates[:, 2 * hid:3 * hid])
        o = jax.nn.sigmoid(gates[:, 3 * hid:])
        c = f * c + i * g
        h = o * jnp.tanh(c)
        return (h, c), h

    init = (jnp.zeros((B, hid), jnp.float32), jnp.zeros((B, hid), jnp.float32))
    (h_n, _), hs = jax.lax.scan(step, init, jnp.transpose(x_btd, (1, 0, 2)))
    return jnp.transpose(hs, (1, 0, 2)), h_n


def stack_lstm_ref(x_btd, params):
    (wih1, whh1, b1, wih2, whh2, b2, w3, b3, w4, b4) = params
    seq1, _ = _lstm_ref(x_btd, wih1, whh1, b1, H1)
    _, h_n2 = _lstm_ref(seq1, wih2, whh2, b2, H2)
    z = jnp.maximum(h_n2 @ w3 + b3, 0.0)
    return z @ w4 + b4


if __name__ == "__main__":
    B, T, D = 2, 8, 16  # batch=2, seq=8, input_shape=16

    key = jax.random.PRNGKey(0)
    keys = jax.random.split(key, 12)

    def u(k, shape, scale):
        return jax.random.uniform(k, shape, jnp.float32, -scale, scale)

    s1 = 1.0 / (H1 ** 0.5)
    s2 = 1.0 / (H2 ** 0.5)
    params = (
        u(keys[0], (D, 4 * H1), s1),    # wih1 (transposed)
        u(keys[1], (H1, 4 * H1), s1),   # whh1
        u(keys[2], (1, 4 * H1), s1),    # b1 (combined b_ih + b_hh)
        u(keys[3], (H1, 4 * H2), s2),   # wih2
        u(keys[4], (H2, 4 * H2), s2),   # whh2
        u(keys[5], (1, 4 * H2), s2),    # b2
        u(keys[6], (H2, H2), s2),       # Linear(64, 64) weight (transposed)
        u(keys[7], (1, H2), s2),        # Linear(64, 64) bias
        u(keys[8], (H2, OUT), s2),      # Linear(64, 6) weight (transposed)
        u(keys[9], (1, OUT), s2),       # Linear(64, 6) bias
    )
    x = jax.random.normal(keys[11], (B, T, D), jnp.float32)

    out = jax.block_until_ready(stack_lstm_forward(x, params))
    ref = jax.block_until_ready(stack_lstm_ref(x, params))

    assert out.shape == (B, OUT), out.shape
    assert jnp.allclose(out, ref, atol=1e-4, rtol=1e-4), (out, ref)
    print("KERNEL_OK")
</pallas_src>

<mosaic_0001>
module attributes {stable_mosaic.version = 11 : i64} {
  func.func @kernel(%arg0: i32, %arg1: memref<64x16xf32, #tpu.memory_space<vmem>>, %arg2: memref<16x512xf32, #tpu.memory_space<vmem>>, %arg3: memref<128x512xf32, #tpu.memory_space<vmem>>, %arg4: memref<1x512xf32, #tpu.memory_space<vmem>>, %arg5: memref<128x256xf32, #tpu.memory_space<vmem>>, %arg6: memref<64x256xf32, #tpu.memory_space<vmem>>, %arg7: memref<1x256xf32, #tpu.memory_space<vmem>>, %arg8: memref<64x64xf32, #tpu.memory_space<vmem>>, %arg9: memref<1x64xf32, #tpu.memory_space<vmem>>, %arg10: memref<64x6xf32, #tpu.memory_space<vmem>>, %arg11: memref<1x6xf32, #tpu.memory_space<vmem>>, %arg12: memref<8x6xf32, #tpu.memory_space<vmem>>, %arg13: memref<64x512xf32, #tpu.memory_space<vmem>>, %arg14: memref<64x128xf32, #tpu.memory_space<vmem>>, %arg15: memref<64x256xf32, #tpu.memory_space<vmem>>) attributes {dimension_semantics = [#tpu.dimension_semantics<arbitrary>], iteration_bounds = array<i64: 1>, scalar_prefetch = 0 : i64, scratch_operands = 3 : i64, tpu.core_type = #tpu.core_type<tc>, window_params = [{pipeline_mode = #tpu.pipeline_mode<synchronous>, transform_indices = @transform_0, window_bounds = array<i64: 64, 16>}, {pipeline_mode = #tpu.pipeline_mode<synchronous>, transform_indices = @transform_1, window_bounds = array<i64: 16, 512>}, {pipeline_mode = #tpu.pipeline_mode<synchronous>, transform_indices = @transform_2, window_bounds = array<i64: 128, 512>}, {pipeline_mode = #tpu.pipeline_mode<synchronous>, transform_indices = @transform_3, window_bounds = array<i64: 1, 512>}, {pipeline_mode = #tpu.pipeline_mode<synchronous>, transform_indices = @transform_4, window_bounds = array<i64: 128, 256>}, {pipeline_mode = #tpu.pipeline_mode<synchronous>, transform_indices = @transform_5, window_bounds = array<i64: 64, 256>}, {pipeline_mode = #tpu.pipeline_mode<synchronous>, transform_indices = @transform_6, window_bounds = array<i64: 1, 256>}, {pipeline_mode = #tpu.pipeline_mode<synchronous>, transform_indices = @transform_7, window_bounds = array<i64: 64, 64>}, {pipeline_mode = #tpu.pipeline_mode<synchronous>, transform_indices = @transform_8, window_bounds = array<i64: 1, 64>}, {pipeline_mode = #tpu.pipeline_mode<synchronous>, transform_indices = @transform_9, window_bounds = array<i64: 64, 6>}, {pipeline_mode = #tpu.pipeline_mode<synchronous>, transform_indices = @transform_10, window_bounds = array<i64: 1, 6>}, {pipeline_mode = #tpu.pipeline_mode<synchronous>, transform_indices = @transform_11, window_bounds = array<i64: 8, 6>}]} {
    %c0 = arith.constant 0 : index
    %c0_0 = arith.constant 0 : index
    %0 = vector.load %arg1[%c0, %c0_0] : memref<64x16xf32, #tpu.memory_space<vmem>>, vector<64x16xf32>
    %c0_1 = arith.constant 0 : index
    %c0_2 = arith.constant 0 : index
    %1 = vector.load %arg2[%c0_1, %c0_2] : memref<16x512xf32, #tpu.memory_space<vmem>>, vector<16x512xf32>
    %cst = arith.constant dense<0.000000e+00> : vector<64x512xf32>
    %2 = tpu.matmul %0, %1, %cst {dimension_numbers = #tpu.dot_dimension_numbers<[1], [0], [0], [1], [0, 0, 1, 1], [], []>} : vector<64x16xf32>, vector<16x512xf32>, vector<64x512xf32> -> vector<64x512xf32>
    %c0_3 = arith.constant 0 : index
    %c0_4 = arith.constant 0 : index
    %3 = vector.load %arg4[%c0_3, %c0_4] : memref<1x512xf32, #tpu.memory_space<vmem>>, vector<1x512xf32>
    %4 = vector.broadcast %3 : vector<1x512xf32> to vector<64x512xf32>
    %5 = arith.addf %2, %4 : vector<64x512xf32>
    %c0_5 = arith.constant 0 : index
    %c0_6 = arith.constant 0 : index
    %6 = vector.load %arg13[%c0_5, %c0_6] : memref<64x512xf32, #tpu.memory_space<vmem>>, vector<64x512xf32>
    tpu.vector_store %arg13[%c0_5, %c0_6], %5 {strides = array<i32>} : memref<64x512xf32, #tpu.memory_space<vmem>>, vector<64x512xf32>,
    %c0_7 = arith.constant 0 : index
    %c0_8 = arith.constant 0 : index
    %7 = vector.load %arg3[%c0_7, %c0_8] : memref<128x512xf32, #tpu.memory_space<vmem>>, vector<128x512xf32>
    %cst_9 = arith.constant 0.000000e+00 : f32
    %8 = vector.broadcast %cst_9 : f32 to vector<8x128xf32>
    %c0_i32 = arith.constant 0 : i32
    %c8_i32 = arith.constant 8 : i32
    %9 = arith.muli %c0_i32, %c8_i32 : i32
    %10 = arith.index_cast %9 : i32 to index
    %c0_10 = arith.constant 0 : index
    %11 = vector.load %arg13[%10, %c0_10] : memref<64x512xf32, #tpu.memory_space<vmem>>, vector<8x512xf32>
    %cst_11 = arith.constant dense<0.000000e+00> : vector<8x512xf32>
    %12 = tpu.matmul %8, %7, %cst_11 {dimension_numbers = #tpu.dot_dimension_numbers<[1], [0], [0], [1], [0, 0, 1, 1], [], []>} : vector<8x128xf32>, vector<128x512xf32>, vector<8x512xf32> -> vector<8x512xf32>
    %13 = arith.addf %11, %12 : vector<8x512xf32>
    %14 = vector.extract_strided_slice %13 {offsets = [0, 0], sizes = [8, 128], strides = [1, 1]} : vector<8x512xf32> to vector<8x128xf32>
    %15 = arith.negf %14 : vector<8x128xf32>
    %16 = math.exp %15 : vector<8x128xf32>
    %cst_12 = arith.constant 1.000000e+00 : f32
    %17 = vector.broadcast %cst_12 : f32 to vector<8x128xf32>
    %18 = arith.addf %17, %16 : vector<8x128xf32>
    %19 = arith.divf %17, %18 : vector<8x128xf32>
    %20 = vector.extract_strided_slice %13 {offsets = [0, 128], sizes = [8, 128], strides = [1, 1]} : vector<8x512xf32> to vector<8x128xf32>
    %21 = arith.negf %20 : vector<8x128xf32>
    %22 = math.exp %21 : vector<8x128xf32>
    %cst_13 = arith.constant 1.000000e+00 : f32
    %23 = vector.broadcast %cst_13 : f32 to vector<8x128xf32>
    %24 = arith.addf %23, %22 : vector<8x128xf32>
    %25 = arith.divf %23, %24 : vector<8x128xf32>
    %26 = vector.extract_strided_slice %13 {offsets = [0, 256], sizes = [8, 128], strides = [1, 1]} : vector<8x512xf32> to vector<8x128xf32>
    %27 = math.tanh %26 : vector<8x128xf32>
    %28 = vector.extract_strided_slice %13 {offsets = [0, 384], sizes = [8, 128], strides = [1, 1]} : vector<8x512xf32> to vector<8x128xf32>
    %29 = arith.negf %28 : vector<8x128xf32>
    %30 = math.exp %29 : vector<8x128xf32>
    %cst_14 = arith.constant 1.000000e+00 : f32
    %31 = vector.broadcast %cst_14 : f32 to vector<8x128xf32>
    %32 = arith.addf %31, %30 : vector<8x128xf32>
    %33 = arith.divf %31, %32 : vector<8x128xf32>
    %34 = arith.mulf %25, %8 : vector<8x128xf32>
    %35 = arith.mulf %19, %27 : vector<8x128xf32>
    %36 = arith.addf %34, %35 : vector<8x128xf32>
    %37 = math.tanh %36 : vector<8x128xf32>
    %38 = arith.mulf %33, %37 : vector<8x128xf32>
    %39 = arith.index_cast %9 : i32 to index
    %c0_15 = arith.constant 0 : index
    %40 = vector.load %arg14[%39, %c0_15] : memref<64x128xf32, #tpu.memory_space<vmem>>, vector<8x128xf32>
    tpu.vector_store %arg14[%39, %c0_15], %38 {strides = array<i32>} : memref<64x128xf32, #tpu.memory_space<vmem>>, vector<8x128xf32>,
    %c1_i32 = arith.constant 1 : i32
    %c8_i32_16 = arith.constant 8 : i32
    %41 = arith.muli %c1_i32, %c8_i32_16 : i32
    %42 = arith.index_cast %41 : i32 to index
    %c0_17 = arith.constant 0 : index
    %43 = vector.load %arg13[%42, %c0_17] : memref<64x512xf32, #tpu.memory_space<vmem>>, vector<8x512xf32>
    %cst_18 = arith.constant dense<0.000000e+00> : vector<8x512xf32>
    %44 = tpu.matmul %38, %7, %cst_18 {dimension_numbers = #tpu.dot_dimension_numbers<[1], [0], [0], [1], [0, 0, 1, 1], [], []>} : vector<8x128xf32>, vector<128x512xf32>, vector<8x512xf32> -> vector<8x512xf32>
    %45 = arith.addf %43, %44 : vector<8x512xf32>
    %46 = vector.extract_strided_slice %45 {offsets = [0, 0], sizes = [8, 128], strides = [1, 1]} : vector<8x512xf32> to vector<8x128xf32>
    %47 = arith.negf %46 : vector<8x128xf32>
    %48 = math.exp %47 : vector<8x128xf32>
    %cst_19 = arith.constant 1.000000e+00 : f32
    %49 = vector.broadcast %cst_19 : f32 to vector<8x128xf32>
    %50 = arith.addf %49, %48 : vector<8x128xf32>
    %51 = arith.divf %49, %50 : vector<8x128xf32>
    %52 = vector.extract_strided_slice %45 {offsets = [0, 128], sizes = [8, 128], strides = [1, 1]} : vector<8x512xf32> to vector<8x128xf32>
    %53 = arith.negf %52 : vector<8x128xf32>
    %54 = math.exp %53 : vector<8x128xf32>
    %cst_20 = arith.constant 1.000000e+00 : f32
    %55 = vector.broadcast %cst_20 : f32 to vector<8x128xf32>
    %56 = arith.addf %55, %54 : vector<8x128xf32>
    %57 = arith.divf %55, %56 : vector<8x128xf32>
    %58 = vector.extract_strided_slice %45 {offsets = [0, 256], sizes = [8, 128], strides = [1, 1]} : vector<8x512xf32> to vector<8x128xf32>
    %59 = math.tanh %58 : vector<8x128xf32>
    %60 = vector.extract_strided_slice %45 {offsets = [0, 384], sizes = [8, 128], strides = [1, 1]} : vector<8x512xf32> to vector<8x128xf32>
    %61 = arith.negf %60 : vector<8x128xf32>
    %62 = math.exp %61 : vector<8x128xf32>
    %cst_21 = arith.constant 1.000000e+00 : f32
    %63 = vector.broadcast %cst_21 : f32 to vector<8x128xf32>
    %64 = arith.addf %63, %62 : vector<8x128xf32>
    %65 = arith.divf %63, %64 : vector<8x128xf32>
    %66 = arith.mulf %57, %36 : vector<8x128xf32>
    %67 = arith.mulf %51, %59 : vector<8x128xf32>
    %68 = arith.addf %66, %67 : vector<8x128xf32>
    %69 = math.tanh %68 : vector<8x128xf32>
    %70 = arith.mulf %65, %69 : vector<8x128xf32>
    %71 = arith.index_cast %41 : i32 to index
    %c0_22 = arith.constant 0 : index
    %72 = vector.load %arg14[%71, %c0_22] : memref<64x128xf32, #tpu.memory_space<vmem>>, vector<8x128xf32>
    tpu.vector_store %arg14[%71, %c0_22], %70 {strides = array<i32>} : memref<64x128xf32, #tpu.memory_space<vmem>>, vector<8x128xf32>,
    %c2_i32 = arith.constant 2 : i32
    %c8_i32_23 = arith.constant 8 : i32
    %73 = arith.muli %c2_i32, %c8_i32_23 : i32
    %74 = arith.index_cast %73 : i32 to index
    %c0_24 = arith.constant 0 : index
    %75 = vector.load %arg13[%74, %c0_24] : memref<64x512xf32, #tpu.memory_space<vmem>>, vector<8x512xf32>
    %cst_25 = arith.constant dense<0.000000e+00> : vector<8x512xf32>
    %76 = tpu.matmul %70, %7, %cst_25 {dimension_numbers = #tpu.dot_dimension_numbers<[1], [0], [0], [1], [0, 0, 1, 1], [], []>} : vector<8x128xf32>, vector<128x512xf32>, vector<8x512xf32> -> vector<8x512xf32>
    %77 = arith.addf %75, %76 : vector<8x512xf32>
    %78 = vector.extract_strided_slice %77 {offsets = [0, 0], sizes = [8, 128], strides = [1, 1]} : vector<8x512xf32> to vector<8x128xf32>
    %79 = arith.negf %78 : vector<8x128xf32>
    %80 = math.exp %79 : vector<8x128xf32>
    %cst_26 = arith.constant 1.000000e+00 : f32
    %81 = vector.broadcast %cst_26 : f32 to vector<8x128xf32>
    %82 = arith.addf %81, %80 : vector<8x128xf32>
    %83 = arith.divf %81, %82 : vector<8x128xf32>
    %84 = vector.extract_strided_slice %77 {offsets = [0, 128], sizes = [8, 128], strides = [1, 1]} : vector<8x512xf32> to vector<8x128xf32>
    %85 = arith.negf %84 : vector<8x128xf32>
    %86 = math.exp %85 : vector<8x128xf32>
    %cst_27 = arith.constant 1.000000e+00 : f32
    %87 = vector.broadcast %cst_27 : f32 to vector<8x128xf32>
    %88 = arith.addf %87, %86 : vector<8x128xf32>
    %89 = arith.divf %87, %88 : vector<8x128xf32>
    %90 = vector.extract_strided_slice %77 {offsets = [0, 256], sizes = [8, 128], strides = [1, 1]} : vector<8x512xf32> to vector<8x128xf32>
    %91 = math.tanh %90 : vector<8x128xf32>
    %92 = vector.extract_strided_slice %77 {offsets = [0, 384], sizes = [8, 128], strides = [1, 1]} : vector<8x512xf32> to vector<8x128xf32>
    %93 = arith.negf %92 : vector<8x128xf32>
    %94 = math.exp %93 : vector<8x128xf32>
    %cst_28 = arith.constant 1.000000e+00 : f32
    %95 = vector.broadcast %cst_28 : f32 to vector<8x128xf32>
    %96 = arith.addf %95, %94 : vector<8x128xf32>
    %97 = arith.divf %95, %96 : vector<8x128xf32>
    %98 = arith.mulf %89, %68 : vector<8x128xf32>
    %99 = arith.mulf %83, %91 : vector<8x128xf32>
    %100 = arith.addf %98, %99 : vector<8x128xf32>
    %101 = math.tanh %100 : vector<8x128xf32>
    %102 = arith.mulf %97, %101 : vector<8x128xf32>
    %103 = arith.index_cast %73 : i32 to index
    %c0_29 = arith.constant 0 : index
    %104 = vector.load %arg14[%103, %c0_29] : memref<64x128xf32, #tpu.memory_space<vmem>>, vector<8x128xf32>
    tpu.vector_store %arg14[%103, %c0_29], %102 {strides = array<i32>} : memref<64x128xf32, #tpu.memory_space<vmem>>, vector<8x128xf32>,
    %c3_i32 = arith.constant 3 : i32
    %c8_i32_30 = arith.constant 8 : i32
    %105 = arith.muli %c3_i32, %c8_i32_30 : i32
    %106 = arith.index_cast %105 : i32 to index
    %c0_31 = arith.constant 0 : index
    %107 = vector.load %arg13[%106, %c0_31] : memref<64x512xf32, #tpu.memory_space<vmem>>, vector<8x512xf32>
    %cst_32 = arith.constant dense<0.000000e+00> : vector<8x512xf32>
    %108 = tpu.matmul %102, %7, %cst_32 {dimension_numbers = #tpu.dot_dimension_numbers<[1], [0], [0], [1], [0, 0, 1, 1], [], []>} : vector<8x128xf32>, vector<128x512xf32>, vector<8x512xf32> -> vector<8x512xf32>
    %109 = arith.addf %107, %108 : vector<8x512xf32>
    %110 = vector.extract_strided_slice %109 {offsets = [0, 0], sizes = [8, 128], strides = [1, 1]} : vector<8x512xf32> to vector<8x128xf32>
    %111 = arith.negf %110 : vector<8x128xf32>
    %112 = math.exp %111 : vector<8x128xf32>
    %cst_33 = arith.constant 1.000000e+00 : f32
    %113 = vector.broadcast %cst_33 : f32 to vector<8x128xf32>
    %114 = arith.addf %113, %112 : vector<8x128xf32>
    %115 = arith.divf %113, %114 : vector<8x128xf32>
    %116 = vector.extract_strided_slice %109 {offsets = [0, 128], sizes = [8, 128], strides = [1, 1]} : vector<8x512xf32> to vector<8x128xf32>
    %117 = arith.negf %116 : vector<8x128xf32>
    %118 = math.exp %117 : vector<8x128xf32>
    %cst_34 = arith.constant 1.000000e+00 : f32
    %119 = vector.broadcast %cst_34 : f32 to vector<8x128xf32>
    %120 = arith.addf %119, %118 : vector<8x128xf32>
    %121 = arith.divf %119, %120 : vector<8x128xf32>
    %122 = vector.extract_strided_slice %109 {offsets = [0, 256], sizes = [8, 128], strides = [1, 1]} : vector<8x512xf32> to vector<8x128xf32>
    %123 = math.tanh %122 : vector<8x128xf32>
    %124 = vector.extract_strided_slice %109 {offsets = [0, 384], sizes = [8, 128], strides = [1, 1]} : vector<8x512xf32> to vector<8x128xf32>
    %125 = arith.negf %124 : vector<8x128xf32>
    %126 = math.exp %125 : vector<8x128xf32>
    %cst_35 = arith.constant 1.000000e+00 : f32
    %127 = vector.broadcast %cst_35 : f32 to vector<8x128xf32>
    %128 = arith.addf %127, %126 : vector<8x128xf32>
    %129 = arith.divf %127, %128 : vector<8x128xf32>
    %130 = arith.mulf %121, %100 : vector<8x128xf32>
    %131 = arith.mulf %115, %123 : vector<8x128xf32>
    %132 = arith.addf %130, %131 : vector<8x128xf32>
    %133 = math.tanh %132 : vector<8x128xf32>
    %134 = arith.mulf %129, %133 : vector<8x128xf32>
    %135 = arith.index_cast %105 : i32 to index
    %c0_36 = arith.constant 0 : index
    %136 = vector.load %arg14[%135, %c0_36] : memref<64x128xf32, #tpu.memory_space<vmem>>, vector<8x128xf32>
    tpu.vector_store %arg14[%135, %c0_36], %134 {strides = array<i32>} : memref<64x128xf32, #tpu.memory_space<vmem>>, vector<8x128xf32>,
    %c4_i32 = arith.constant 4 : i32
    %c8_i32_37 = arith.constant 8 : i32
    %137 = arith.muli %c4_i32, %c8_i32_37 : i32
    %138 = arith.index_cast %137 : i32 to index
    %c0_38 = arith.constant 0 : index
    %139 = vector.load %arg13[%138, %c0_38] : memref<64x512xf32, #tpu.memory_space<vmem>>, vector<8x512xf32>
    %cst_39 = arith.constant dense<0.000000e+00> : vector<8x512xf32>
    %140 = tpu.matmul %134, %7, %cst_39 {dimension_numbers = #tpu.dot_dimension_numbers<[1], [0], [0], [1], [0, 0, 1, 1], [], []>} : vector<8x128xf32>, vector<128x512xf32>, vector<8x512xf32> -> vector<8x512xf32>
    %141 = arith.addf %139, %140 : vector<8x512xf32>
    %142 = vector.extract_strided_slice %141 {offsets = [0, 0], sizes = [8, 128], strides = [1, 1]} : vector<8x512xf32> to vector<8x128xf32>
    %143 = arith.negf %142 : vector<8x128xf32>
    %144 = math.exp %143 : vector<8x128xf32>
    %cst_40 = arith.constant 1.000000e+00 : f32
    %145 = vector.broadcast %cst_40 : f32 to vector<8x128xf32>
    %146 = arith.addf %145, %144 : vector<8x128xf32>
    %147 = arith.divf %145, %146 : vector<8x128xf32>
    %148 = vector.extract_strided_slice %141 {offsets = [0, 128], sizes = [8, 128], strides = [1, 1]} : vector<8x512xf32> to vector<8x128xf32>
    %149 = arith.negf %148 : vector<8x128xf32>
    %150 = math.exp %149 : vector<8x128xf32>
    %cst_41 = arith.constant 1.000000e+00 : f32
    %151 = vector.broadcast %cst_41 : f32 to vector<8x128xf32>
    %152 = arith.addf %151, %150 : vector<8x128xf32>
    %153 = arith.divf %151, %152 : vector<8x128xf32>
    %154 = vector.extract_strided_slice %141 {offsets = [0, 256], sizes = [8, 128], strides = [1, 1]} : vector<8x512xf32> to vector<8x128xf32>
    %155 = math.tanh %154 : vector<8x128xf32>
    %156 = vector.extract_strided_slice %141 {offsets = [0, 384], sizes = [8, 128], strides = [1, 1]} : vector<8x512xf32> to vector<8x128xf32>
    %157 = arith.negf %156 : vector<8x128xf32>
    %158 = math.exp %157 : vector<8x128xf32>
    %cst_42 = arith.constant 1.000000e+00 : f32
    %159 = vector.broadcast %cst_42 : f32 to vector<8x128xf32>
    %160 = arith.addf %159, %158 : vector<8x128xf32>
    %161 = arith.divf %159, %160 : vector<8x128xf32>
    %162 = arith.mulf %153, %132 : vector<8x128xf32>
    %163 = arith.mulf %147, %155 : vector<8x128xf32>
    %164 = arith.addf %162, %163 : vector<8x128xf32>
    %165 = math.tanh %164 : vector<8x128xf32>
    %166 = arith.mulf %161, %165 : vector<8x128xf32>
    %167 = arith.index_cast %137 : i32 to index
    %c0_43 = arith.constant 0 : index
    %168 = vector.load %arg14[%167, %c0_43] : memref<64x128xf32, #tpu.memory_space<vmem>>, vector<8x128xf32>
    tpu.vector_store %arg14[%167, %c0_43], %166 {strides = array<i32>} : memref<64x128xf32, #tpu.memory_space<vmem>>, vector<8x128xf32>,
    %c5_i32 = arith.constant 5 : i32
    %c8_i32_44 = arith.constant 8 : i32
    %169 = arith.muli %c5_i32, %c8_i32_44 : i32
    %170 = arith.index_cast %169 : i32 to index
    %c0_45 = arith.constant 0 : index
    %171 = vector.load %arg13[%170, %c0_45] : memref<64x512xf32, #tpu.memory_space<vmem>>, vector<8x512xf32>
    %cst_46 = arith.constant dense<0.000000e+00> : vector<8x512xf32>
    %172 = tpu.matmul %166, %7, %cst_46 {dimension_numbers = #tpu.dot_dimension_numbers<[1], [0], [0], [1], [0, 0, 1, 1], [], []>} : vector<8x128xf32>, vector<128x512xf32>, vector<8x512xf32> -> vector<8x512xf32>
    %173 = arith.addf %171, %172 : vector<8x512xf32>
    %174 = vector.extract_strided_slice %173 {offsets = [0, 0], sizes = [8, 128], strides = [1, 1]} : vector<8x512xf32> to vector<8x128xf32>
    %175 = arith.negf %174 : vector<8x128xf32>
    %176 = math.exp %175 : vector<8x128xf32>
    %cst_47 = arith.constant 1.000000e+00 : f32
    %177 = vector.broadcast %cst_47 : f32 to vector<8x128xf32>
    %178 = arith.addf %177, %176 : vector<8x128xf32>
    %179 = arith.divf %177, %178 : vector<8x128xf32>
    %180 = vector.extract_strided_slice %173 {offsets = [0, 128], sizes = [8, 128], strides = [1, 1]} : vector<8x512xf32> to vector<8x128xf32>
    %181 = arith.negf %180 : vector<8x128xf32>
    %182 = math.exp %181 : vector<8x128xf32>
    %cst_48 = arith.constant 1.000000e+00 : f32
    %183 = vector.broadcast %cst_48 : f32 to vector<8x128xf32>
    %184 = arith.addf %183, %182 : vector<8x128xf32>
    %185 = arith.divf %183, %184 : vector<8x128xf32>
    %186 = vector.extract_strided_slice %173 {offsets = [0, 256], sizes = [8, 128], strides = [1, 1]} : vector<8x512xf32> to vector<8x128xf32>
    %187 = math.tanh %186 : vector<8x128xf32>
    %188 = vector.extract_strided_slice %173 {offsets = [0, 384], sizes = [8, 128], strides = [1, 1]} : vector<8x512xf32> to vector<8x128xf32>
    %189 = arith.negf %188 : vector<8x128xf32>
    %190 = math.exp %189 : vector<8x128xf32>
    %cst_49 = arith.constant 1.000000e+00 : f32
    %191 = vector.broadcast %cst_49 : f32 to vector<8x128xf32>
    %192 = arith.addf %191, %190 : vector<8x128xf32>
    %193 = arith.divf %191, %192 : vector<8x128xf32>
    %194 = arith.mulf %185, %164 : vector<8x128xf32>
    %195 = arith.mulf %179, %187 : vector<8x128xf32>
    %196 = arith.addf %194, %195 : vector<8x128xf32>
    %197 = math.tanh %196 : vector<8x128xf32>
    %198 = arith.mulf %193, %197 : vector<8x128xf32>
    %199 = arith.index_cast %169 : i32 to index
    %c0_50 = arith.constant 0 : index
    %200 = vector.load %arg14[%199, %c0_50] : memref<64x128xf32, #tpu.memory_space<vmem>>, vector<8x128xf32>
    tpu.vector_store %arg14[%199, %c0_50], %198 {strides = array<i32>} : memref<64x128xf32, #tpu.memory_space<vmem>>, vector<8x128xf32>,
    %c6_i32 = arith.constant 6 : i32
    %c8_i32_51 = arith.constant 8 : i32
    %201 = arith.muli %c6_i32, %c8_i32_51 : i32
    %202 = arith.index_cast %201 : i32 to index
    %c0_52 = arith.constant 0 : index
    %203 = vector.load %arg13[%202, %c0_52] : memref<64x512xf32, #tpu.memory_space<vmem>>, vector<8x512xf32>
    %cst_53 = arith.constant dense<0.000000e+00> : vector<8x512xf32>
    %204 = tpu.matmul %198, %7, %cst_53 {dimension_numbers = #tpu.dot_dimension_numbers<[1], [0], [0], [1], [0, 0, 1, 1], [], []>} : vector<8x128xf32>, vector<128x512xf32>, vector<8x512xf32> -> vector<8x512xf32>
    %205 = arith.addf %203, %204 : vector<8x512xf32>
    %206 = vector.extract_strided_slice %205 {offsets = [0, 0], sizes = [8, 128], strides = [1, 1]} : vector<8x512xf32> to vector<8x128xf32>
    %207 = arith.negf %206 : vector<8x128xf32>
    %208 = math.exp %207 : vector<8x128xf32>
    %cst_54 = arith.constant 1.000000e+00 : f32
    %209 = vector.broadcast %cst_54 : f32 to vector<8x128xf32>
    %210 = arith.addf %209, %208 : vector<8x128xf32>
    %211 = arith.divf %209, %210 : vector<8x128xf32>
    %212 = vector.extract_strided_slice %205 {offsets = [0, 128], sizes = [8, 128], strides = [1, 1]} : vector<8x512xf32> to vector<8x128xf32>
    %213 = arith.negf %212 : vector<8x128xf32>
    %214 = math.exp %213 : vector<8x128xf32>
    %cst_55 = arith.constant 1.000000e+00 : f32
    %215 = vector.broadcast %cst_55 : f32 to vector<8x128xf32>
    %216 = arith.addf %215, %214 : vector<8x128xf32>
    %217 = arith.divf %215, %216 : vector<8x128xf32>
    %218 = vector.extract_strided_slice %205 {offsets = [0, 256], sizes = [8, 128], strides = [1, 1]} : vector<8x512xf32> to vector<8x128xf32>
    %219 = math.tanh %218 : vector<8x128xf32>
    %220 = vector.extract_strided_slice %205 {offsets = [0, 384], sizes = [8, 128], strides = [1, 1]} : vector<8x512xf32> to vector<8x128xf32>
    %221 = arith.negf %220 : vector<8x128xf32>
    %222 = math.exp %221 : vector<8x128xf32>
    %cst_56 = arith.constant 1.000000e+00 : f32
    %223 = vector.broadcast %cst_56 : f32 to vector<8x128xf32>
    %224 = arith.addf %223, %222 : vector<8x128xf32>
    %225 = arith.divf %223, %224 : vector<8x128xf32>
    %226 = arith.mulf %217, %196 : vector<8x128xf32>
    %227 = arith.mulf %211, %219 : vector<8x128xf32>
    %228 = arith.addf %226, %227 : vector<8x128xf32>
    %229 = math.tanh %228 : vector<8x128xf32>
    %230 = arith.mulf %225, %229 : vector<8x128xf32>
    %231 = arith.index_cast %201 : i32 to index
    %c0_57 = arith.constant 0 : index
    %232 = vector.load %arg14[%231, %c0_57] : memref<64x128xf32, #tpu.memory_space<vmem>>, vector<8x128xf32>
    tpu.vector_store %arg14[%231, %c0_57], %230 {strides = array<i32>} : memref<64x128xf32, #tpu.memory_space<vmem>>, vector<8x128xf32>,
    %c7_i32 = arith.constant 7 : i32
    %c8_i32_58 = arith.constant 8 : i32
    %233 = arith.muli %c7_i32, %c8_i32_58 : i32
    %234 = arith.index_cast %233 : i32 to index
    %c0_59 = arith.constant 0 : index
    %235 = vector.load %arg13[%234, %c0_59] : memref<64x512xf32, #tpu.memory_space<vmem>>, vector<8x512xf32>
    %cst_60 = arith.constant dense<0.000000e+00> : vector<8x512xf32>
    %236 = tpu.matmul %230, %7, %cst_60 {dimension_numbers = #tpu.dot_dimension_numbers<[1], [0], [0], [1], [0, 0, 1, 1], [], []>} : vector<8x128xf32>, vector<128x512xf32>, vector<8x512xf32> -> vector<8x512xf32>
    %237 = arith.addf %235, %236 : vector<8x512xf32>
    %238 = vector.extract_strided_slice %237 {offsets = [0, 0], sizes = [8, 128], strides = [1, 1]} : vector<8x512xf32> to vector<8x128xf32>
    %239 = arith.negf %238 : vector<8x128xf32>
    %240 = math.exp %239 : vector<8x128xf32>
    %cst_61 = arith.constant 1.000000e+00 : f32
    %241 = vector.broadcast %cst_61 : f32 to vector<8x128xf32>
    %242 = arith.addf %241, %240 : vector<8x128xf32>
    %243 = arith.divf %241, %242 : vector<8x128xf32>
    %244 = vector.extract_strided_slice %237 {offsets = [0, 128], sizes = [8, 128], strides = [1, 1]} : vector<8x512xf32> to vector<8x128xf32>
    %245 = arith.negf %244 : vector<8x128xf32>
    %246 = math.exp %245 : vector<8x128xf32>
    %cst_62 = arith.constant 1.000000e+00 : f32
    %247 = vector.broadcast %cst_62 : f32 to vector<8x128xf32>
    %248 = arith.addf %247, %246 : vector<8x128xf32>
    %249 = arith.divf %247, %248 : vector<8x128xf32>
    %250 = vector.extract_strided_slice %237 {offsets = [0, 256], sizes = [8, 128], strides = [1, 1]} : vector<8x512xf32> to vector<8x128xf32>
    %251 = math.tanh %250 : vector<8x128xf32>
    %252 = vector.extract_strided_slice %237 {offsets = [0, 384], sizes = [8, 128], strides = [1, 1]} : vector<8x512xf32> to vector<8x128xf32>
    %253 = arith.negf %252 : vector<8x128xf32>
    %254 = math.exp %253 : vector<8x128xf32>
    %cst_63 = arith.constant 1.000000e+00 : f32
    %255 = vector.broadcast %cst_63 : f32 to vector<8x128xf32>
    %256 = arith.addf %255, %254 : vector<8x128xf32>
    %257 = arith.divf %255, %256 : vector<8x128xf32>
    %258 = arith.mulf %249, %228 : vector<8x128xf32>
    %259 = arith.mulf %243, %251 : vector<8x128xf32>
    %260 = arith.addf %258, %259 : vector<8x128xf32>
    %261 = math.tanh %260 : vector<8x128xf32>
    %262 = arith.mulf %257, %261 : vector<8x128xf32>
    %263 = arith.index_cast %233 : i32 to index
    %c0_64 = arith.constant 0 : index
    %264 = vector.load %arg14[%263, %c0_64] : memref<64x128xf32, #tpu.memory_space<vmem>>, vector<8x128xf32>
    tpu.vector_store %arg14[%263, %c0_64], %262 {strides = array<i32>} : memref<64x128xf32, #tpu.memory_space<vmem>>, vector<8x128xf32>,
    %c8_i32_65 = arith.constant 8 : i32
    %c0_66 = arith.constant 0 : index
    %c0_67 = arith.constant 0 : index
    %265 = vector.load %arg14[%c0_66, %c0_67] : memref<64x128xf32, #tpu.memory_space<vmem>>, vector<64x128xf32>
    %c0_68 = arith.constant 0 : index
    %c0_69 = arith.constant 0 : index
    %266 = vector.load %arg5[%c0_68, %c0_69] : memref<128x256xf32, #tpu.memory_space<vmem>>, vector<128x256xf32>
    %cst_70 = arith.constant dense<0.000000e+00> : vector<64x256xf32>
    %267 = tpu.matmul %265, %266, %cst_70 {dimension_numbers = #tpu.dot_dimension_numbers<[1], [0], [0], [1], [0, 0, 1, 1], [], []>} : vector<64x128xf32>, vector<128x256xf32>, vector<64x256xf32> -> vector<64x256xf32>
    %c0_71 = arith.constant 0 : index
    %c0_72 = arith.constant 0 : index
    %268 = vector.load %arg7[%c0_71, %c0_72] : memref<1x256xf32, #tpu.memory_space<vmem>>, vector<1x256xf32>
    %269 = vector.broadcast %268 : vector<1x256xf32> to vector<64x256xf32>
    %270 = arith.addf %267, %269 : vector<64x256xf32>
    %c0_73 = arith.constant 0 : index
    %c0_74 = arith.constant 0 : index
    %271 = vector.load %arg15[%c0_73, %c0_74] : memref<64x256xf32, #tpu.memory_space<vmem>>, vector<64x256xf32>
    tpu.vector_store %arg15[%c0_73, %c0_74], %270 {strides = array<i32>} : memref<64x256xf32, #tpu.memory_space<vmem>>, vector<64x256xf32>,
    %c0_75 = arith.constant 0 : index
    %c0_76 = arith.constant 0 : index
    %272 = vector.load %arg6[%c0_75, %c0_76] : memref<64x256xf32, #tpu.memory_space<vmem>>, vector<64x256xf32>
    %cst_77 = arith.constant 0.000000e+00 : f32
    %273 = vector.broadcast %cst_77 : f32 to vector<8x64xf32>
    %c0_i32_78 = arith.constant 0 : i32
    %c8_i32_79 = arith.constant 8 : i32
    %274 = arith.muli %c0_i32_78, %c8_i32_79 : i32
    %275 = arith.index_cast %274 : i32 to index
    %c0_80 = arith.constant 0 : index
    %276 = vector.load %arg15[%275, %c0_80] : memref<64x256xf32, #tpu.memory_space<vmem>>, vector<8x256xf32>
    %cst_81 = arith.constant dense<0.000000e+00> : vector<8x256xf32>
    %277 = tpu.matmul %273, %272, %cst_81 {dimension_numbers = #tpu.dot_dimension_numbers<[1], [0], [0], [1], [0, 0, 1, 1], [], []>} : vector<8x64xf32>, vector<64x256xf32>, vector<8x256xf32> -> vector<8x256xf32>
    %278 = arith.addf %276, %277 : vector<8x256xf32>
    %279 = vector.extract_strided_slice %278 {offsets = [0, 0], sizes = [8, 64], strides = [1, 1]} : vector<8x256xf32> to vector<8x64xf32>
    %280 = arith.negf %279 : vector<8x64xf32>
    %281 = math.exp %280 : vector<8x64xf32>
    %cst_82 = arith.constant 1.000000e+00 : f32
    %282 = vector.broadcast %cst_82 : f32 to vector<8x64xf32>
    %283 = arith.addf %282, %281 : vector<8x64xf32>
    %284 = arith.divf %282, %283 : vector<8x64xf32>
    %285 = vector.extract_strided_slice %278 {offsets = [0, 64], sizes = [8, 64], strides = [1, 1]} : vector<8x256xf32> to vector<8x64xf32>
    %286 = arith.negf %285 : vector<8x64xf32>
    %287 = math.exp %286 : vector<8x64xf32>
    %cst_83 = arith.constant 1.000000e+00 : f32
    %288 = vector.broadcast %cst_83 : f32 to vector<8x64xf32>
    %289 = arith.addf %288, %287 : vector<8x64xf32>
    %290 = arith.divf %288, %289 : vector<8x64xf32>
    %291 = vector.extract_strided_slice %278 {offsets = [0, 128], sizes = [8, 64], strides = [1, 1]} : vector<8x256xf32> to vector<8x64xf32>
    %292 = math.tanh %291 : vector<8x64xf32>
    %293 = vector.extract_strided_slice %278 {offsets = [0, 192], sizes = [8, 64], strides = [1, 1]} : vector<8x256xf32> to vector<8x64xf32>
    %294 = arith.negf %293 : vector<8x64xf32>
    %295 = math.exp %294 : vector<8x64xf32>
    %cst_84 = arith.constant 1.000000e+00 : f32
    %296 = vector.broadcast %cst_84 : f32 to vector<8x64xf32>
    %297 = arith.addf %296, %295 : vector<8x64xf32>
    %298 = arith.divf %296, %297 : vector<8x64xf32>
    %299 = arith.mulf %290, %273 : vector<8x64xf32>
    %300 = arith.mulf %284, %292 : vector<8x64xf32>
    %301 = arith.addf %299, %300 : vector<8x64xf32>
    %302 = math.tanh %301 : vector<8x64xf32>
    %303 = arith.mulf %298, %302 : vector<8x64xf32>
    %c1_i32_85 = arith.constant 1 : i32
    %c8_i32_86 = arith.constant 8 : i32
    %304 = arith.muli %c1_i32_85, %c8_i32_86 : i32
    %305 = arith.index_cast %304 : i32 to index
    %c0_87 = arith.constant 0 : index
    %306 = vector.load %arg15[%305, %c0_87] : memref<64x256xf32, #tpu.memory_space<vmem>>, vector<8x256xf32>
    %cst_88 = arith.constant dense<0.000000e+00> : vector<8x256xf32>
    %307 = tpu.matmul %303, %272, %cst_88 {dimension_numbers = #tpu.dot_dimension_numbers<[1], [0], [0], [1], [0, 0, 1, 1], [], []>} : vector<8x64xf32>, vector<64x256xf32>, vector<8x256xf32> -> vector<8x256xf32>
    %308 = arith.addf %306, %307 : vector<8x256xf32>
    %309 = vector.extract_strided_slice %308 {offsets = [0, 0], sizes = [8, 64], strides = [1, 1]} : vector<8x256xf32> to vector<8x64xf32>
    %310 = arith.negf %309 : vector<8x64xf32>
    %311 = math.exp %310 : vector<8x64xf32>
    %cst_89 = arith.constant 1.000000e+00 : f32
    %312 = vector.broadcast %cst_89 : f32 to vector<8x64xf32>
    %313 = arith.addf %312, %311 : vector<8x64xf32>
    %314 = arith.divf %312, %313 : vector<8x64xf32>
    %315 = vector.extract_strided_slice %308 {offsets = [0, 64], sizes = [8, 64], strides = [1, 1]} : vector<8x256xf32> to vector<8x64xf32>
    %316 = arith.negf %315 : vector<8x64xf32>
    %317 = math.exp %316 : vector<8x64xf32>
    %cst_90 = arith.constant 1.000000e+00 : f32
    %318 = vector.broadcast %cst_90 : f32 to vector<8x64xf32>
    %319 = arith.addf %318, %317 : vector<8x64xf32>
    %320 = arith.divf %318, %319 : vector<8x64xf32>
    %321 = vector.extract_strided_slice %308 {offsets = [0, 128], sizes = [8, 64], strides = [1, 1]} : vector<8x256xf32> to vector<8x64xf32>
    %322 = math.tanh %321 : vector<8x64xf32>
    %323 = vector.extract_strided_slice %308 {offsets = [0, 192], sizes = [8, 64], strides = [1, 1]} : vector<8x256xf32> to vector<8x64xf32>
    %324 = arith.negf %323 : vector<8x64xf32>
    %325 = math.exp %324 : vector<8x64xf32>
    %cst_91 = arith.constant 1.000000e+00 : f32
    %326 = vector.broadcast %cst_91 : f32 to vector<8x64xf32>
    %327 = arith.addf %326, %325 : vector<8x64xf32>
    %328 = arith.divf %326, %327 : vector<8x64xf32>
    %329 = arith.mulf %320, %301 : vector<8x64xf32>
    %330 = arith.mulf %314, %322 : vector<8x64xf32>
    %331 = arith.addf %329, %330 : vector<8x64xf32>
    %332 = math.tanh %331 : vector<8x64xf32>
    %333 = arith.mulf %328, %332 : vector<8x64xf32>
    %c2_i32_92 = arith.constant 2 : i32
    %c8_i32_93 = arith.constant 8 : i32
    %334 = arith.muli %c2_i32_92, %c8_i32_93 : i32
    %335 = arith.index_cast %334 : i32 to index
    %c0_94 = arith.constant 0 : index
    %336 = vector.load %arg15[%335, %c0_94] : memref<64x256xf32, #tpu.memory_space<vmem>>, vector<8x256xf32>
    %cst_95 = arith.constant dense<0.000000e+00> : vector<8x256xf32>
    %337 = tpu.matmul %333, %272, %cst_95 {dimension_numbers = #tpu.dot_dimension_numbers<[1], [0], [0], [1], [0, 0, 1, 1], [], []>} : vector<8x64xf32>, vector<64x256xf32>, vector<8x256xf32> -> vector<8x256xf32>
    %338 = arith.addf %336, %337 : vector<8x256xf32>
    %339 = vector.extract_strided_slice %338 {offsets = [0, 0], sizes = [8, 64], strides = [1, 1]} : vector<8x256xf32> to vector<8x64xf32>
    %340 = arith.negf %339 : vector<8x64xf32>
    %341 = math.exp %340 : vector<8x64xf32>
    %cst_96 = arith.constant 1.000000e+00 : f32
    %342 = vector.broadcast %cst_96 : f32 to vector<8x64xf32>
    %343 = arith.addf %342, %341 : vector<8x64xf32>
    %344 = arith.divf %342, %343 : vector<8x64xf32>
    %345 = vector.extract_strided_slice %338 {offsets = [0, 64], sizes = [8, 64], strides = [1, 1]} : vector<8x256xf32> to vector<8x64xf32>
    %346 = arith.negf %345 : vector<8x64xf32>
    %347 = math.exp %346 : vector<8x64xf32>
    %cst_97 = arith.constant 1.000000e+00 : f32
    %348 = vector.broadcast %cst_97 : f32 to vector<8x64xf32>
    %349 = arith.addf %348, %347 : vector<8x64xf32>
    %350 = arith.divf %348, %349 : vector<8x64xf32>
    %351 = vector.extract_strided_slice %338 {offsets = [0, 128], sizes = [8, 64], strides = [1, 1]} : vector<8x256xf32> to vector<8x64xf32>
    %352 = math.tanh %351 : vector<8x64xf32>
    %353 = vector.extract_strided_slice %338 {offsets = [0, 192], sizes = [8, 64], strides = [1, 1]} : vector<8x256xf32> to vector<8x64xf32>
    %354 = arith.negf %353 : vector<8x64xf32>
    %355 = math.exp %354 : vector<8x64xf32>
    %cst_98 = arith.constant 1.000000e+00 : f32
    %356 = vector.broadcast %cst_98 : f32 to vector<8x64xf32>
    %357 = arith.addf %356, %355 : vector<8x64xf32>
    %358 = arith.divf %356, %357 : vector<8x64xf32>
    %359 = arith.mulf %350, %331 : vector<8x64xf32>
    %360 = arith.mulf %344, %352 : vector<8x64xf32>
    %361 = arith.addf %359, %360 : vector<8x64xf32>
    %362 = math.tanh %361 : vector<8x64xf32>
    %363 = arith.mulf %358, %362 : vector<8x64xf32>
    %c3_i32_99 = arith.constant 3 : i32
    %c8_i32_100 = arith.constant 8 : i32
    %364 = arith.muli %c3_i32_99, %c8_i32_100 : i32
    %365 = arith.index_cast %364 : i32 to index
    %c0_101 = arith.constant 0 : index
    %366 = vector.load %arg15[%365, %c0_101] : memref<64x256xf32, #tpu.memory_space<vmem>>, vector<8x256xf32>
    %cst_102 = arith.constant dense<0.000000e+00> : vector<8x256xf32>
    %367 = tpu.matmul %363, %272, %cst_102 {dimension_numbers = #tpu.dot_dimension_numbers<[1], [0], [0], [1], [0, 0, 1, 1], [], []>} : vector<8x64xf32>, vector<64x256xf32>, vector<8x256xf32> -> vector<8x256xf32>
    %368 = arith.addf %366, %367 : vector<8x256xf32>
    %369 = vector.extract_strided_slice %368 {offsets = [0, 0], sizes = [8, 64], strides = [1, 1]} : vector<8x256xf32> to vector<8x64xf32>
    %370 = arith.negf %369 : vector<8x64xf32>
    %371 = math.exp %370 : vector<8x64xf32>
    %cst_103 = arith.constant 1.000000e+00 : f32
    %372 = vector.broadcast %cst_103 : f32 to vector<8x64xf32>
    %373 = arith.addf %372, %371 : vector<8x64xf32>
    %374 = arith.divf %372, %373 : vector<8x64xf32>
    %375 = vector.extract_strided_slice %368 {offsets = [0, 64], sizes = [8, 64], strides = [1, 1]} : vector<8x256xf32> to vector<8x64xf32>
    %376 = arith.negf %375 : vector<8x64xf32>
    %377 = math.exp %376 : vector<8x64xf32>
    %cst_104 = arith.constant 1.000000e+00 : f32
    %378 = vector.broadcast %cst_104 : f32 to vector<8x64xf32>
    %379 = arith.addf %378, %377 : vector<8x64xf32>
    %380 = arith.divf %378, %379 : vector<8x64xf32>
    %381 = vector.extract_strided_slice %368 {offsets = [0, 128], sizes = [8, 64], strides = [1, 1]} : vector<8x256xf32> to vector<8x64xf32>
    %382 = math.tanh %381 : vector<8x64xf32>
    %383 = vector.extract_strided_slice %368 {offsets = [0, 192], sizes = [8, 64], strides = [1, 1]} : vector<8x256xf32> to vector<8x64xf32>
    %384 = arith.negf %383 : vector<8x64xf32>
    %385 = math.exp %384 : vector<8x64xf32>
    %cst_105 = arith.constant 1.000000e+00 : f32
    %386 = vector.broadcast %cst_105 : f32 to vector<8x64xf32>
    %387 = arith.addf %386, %385 : vector<8x64xf32>
    %388 = arith.divf %386, %387 : vector<8x64xf32>
    %389 = arith.mulf %380, %361 : vector<8x64xf32>
    %390 = arith.mulf %374, %382 : vector<8x64xf32>
    %391 = arith.addf %389, %390 : vector<8x64xf32>
    %392 = math.tanh %391 : vector<8x64xf32>
    %393 = arith.mulf %388, %392 : vector<8x64xf32>
    %c4_i32_106 = arith.constant 4 : i32
    %c8_i32_107 = arith.constant 8 : i32
    %394 = arith.muli %c4_i32_106, %c8_i32_107 : i32
    %395 = arith.index_cast %394 : i32 to index
    %c0_108 = arith.constant 0 : index
    %396 = vector.load %arg15[%395, %c0_108] : memref<64x256xf32, #tpu.memory_space<vmem>>, vector<8x256xf32>
    %cst_109 = arith.constant dense<0.000000e+00> : vector<8x256xf32>
    %397 = tpu.matmul %393, %272, %cst_109 {dimension_numbers = #tpu.dot_dimension_numbers<[1], [0], [0], [1], [0, 0, 1, 1], [], []>} : vector<8x64xf32>, vector<64x256xf32>, vector<8x256xf32> -> vector<8x256xf32>
    %398 = arith.addf %396, %397 : vector<8x256xf32>
    %399 = vector.extract_strided_slice %398 {offsets = [0, 0], sizes = [8, 64], strides = [1, 1]} : vector<8x256xf32> to vector<8x64xf32>
    %400 = arith.negf %399 : vector<8x64xf32>
    %401 = math.exp %400 : vector<8x64xf32>
    %cst_110 = arith.constant 1.000000e+00 : f32
    %402 = vector.broadcast %cst_110 : f32 to vector<8x64xf32>
    %403 = arith.addf %402, %401 : vector<8x64xf32>
    %404 = arith.divf %402, %403 : vector<8x64xf32>
    %405 = vector.extract_strided_slice %398 {offsets = [0, 64], sizes = [8, 64], strides = [1, 1]} : vector<8x256xf32> to vector<8x64xf32>
    %406 = arith.negf %405 : vector<8x64xf32>
    %407 = math.exp %406 : vector<8x64xf32>
    %cst_111 = arith.constant 1.000000e+00 : f32
    %408 = vector.broadcast %cst_111 : f32 to vector<8x64xf32>
    %409 = arith.addf %408, %407 : vector<8x64xf32>
    %410 = arith.divf %408, %409 : vector<8x64xf32>
    %411 = vector.extract_strided_slice %398 {offsets = [0, 128], sizes = [8, 64], strides = [1, 1]} : vector<8x256xf32> to vector<8x64xf32>
    %412 = math.tanh %411 : vector<8x64xf32>
    %413 = vector.extract_strided_slice %398 {offsets = [0, 192], sizes = [8, 64], strides = [1, 1]} : vector<8x256xf32> to vector<8x64xf32>
    %414 = arith.negf %413 : vector<8x64xf32>
    %415 = math.exp %414 : vector<8x64xf32>
    %cst_112 = arith.constant 1.000000e+00 : f32
    %416 = vector.broadcast %cst_112 : f32 to vector<8x64xf32>
    %417 = arith.addf %416, %415 : vector<8x64xf32>
    %418 = arith.divf %416, %417 : vector<8x64xf32>
    %419 = arith.mulf %410, %391 : vector<8x64xf32>
    %420 = arith.mulf %404, %412 : vector<8x64xf32>
    %421 = arith.addf %419, %420 : vector<8x64xf32>
    %422 = math.tanh %421 : vector<8x64xf32>
    %423 = arith.mulf %418, %422 : vector<8x64xf32>
    %c5_i32_113 = arith.constant 5 : i32
    %c8_i32_114 = arith.constant 8 : i32
    %424 = arith.muli %c5_i32_113, %c8_i32_114 : i32
    %425 = arith.index_cast %424 : i32 to index
    %c0_115 = arith.constant 0 : index
    %426 = vector.load %arg15[%425, %c0_115] : memref<64x256xf32, #tpu.memory_space<vmem>>, vector<8x256xf32>
    %cst_116 = arith.constant dense<0.000000e+00> : vector<8x256xf32>
    %427 = tpu.matmul %423, %272, %cst_116 {dimension_numbers = #tpu.dot_dimension_numbers<[1], [0], [0], [1], [0, 0, 1, 1], [], []>} : vector<8x64xf32>, vector<64x256xf32>, vector<8x256xf32> -> vector<8x256xf32>
    %428 = arith.addf %426, %427 : vector<8x256xf32>
    %429 = vector.extract_strided_slice %428 {offsets = [0, 0], sizes = [8, 64], strides = [1, 1]} : vector<8x256xf32> to vector<8x64xf32>
    %430 = arith.negf %429 : vector<8x64xf32>
    %431 = math.exp %430 : vector<8x64xf32>
    %cst_117 = arith.constant 1.000000e+00 : f32
    %432 = vector.broadcast %cst_117 : f32 to vector<8x64xf32>
    %433 = arith.addf %432, %431 : vector<8x64xf32>
    %434 = arith.divf %432, %433 : vector<8x64xf32>
    %435 = vector.extract_strided_slice %428 {offsets = [0, 64], sizes = [8, 64], strides = [1, 1]} : vector<8x256xf32> to vector<8x64xf32>
    %436 = arith.negf %435 : vector<8x64xf32>
    %437 = math.exp %436 : vector<8x64xf32>
    %cst_118 = arith.constant 1.000000e+00 : f32
    %438 = vector.broadcast %cst_118 : f32 to vector<8x64xf32>
    %439 = arith.addf %438, %437 : vector<8x64xf32>
    %440 = arith.divf %438, %439 : vector<8x64xf32>
    %441 = vector.extract_strided_slice %428 {offsets = [0, 128], sizes = [8, 64], strides = [1, 1]} : vector<8x256xf32> to vector<8x64xf32>
    %442 = math.tanh %441 : vector<8x64xf32>
    %443 = vector.extract_strided_slice %428 {offsets = [0, 192], sizes = [8, 64], strides = [1, 1]} : vector<8x256xf32> to vector<8x64xf32>
    %444 = arith.negf %443 : vector<8x64xf32>
    %445 = math.exp %444 : vector<8x64xf32>
    %cst_119 = arith.constant 1.000000e+00 : f32
    %446 = vector.broadcast %cst_119 : f32 to vector<8x64xf32>
    %447 = arith.addf %446, %445 : vector<8x64xf32>
    %448 = arith.divf %446, %447 : vector<8x64xf32>
    %449 = arith.mulf %440, %421 : vector<8x64xf32>
    %450 = arith.mulf %434, %442 : vector<8x64xf32>
    %451 = arith.addf %449, %450 : vector<8x64xf32>
    %452 = math.tanh %451 : vector<8x64xf32>
    %453 = arith.mulf %448, %452 : vector<8x64xf32>
    %c6_i32_120 = arith.constant 6 : i32
    %c8_i32_121 = arith.constant 8 : i32
    %454 = arith.muli %c6_i32_120, %c8_i32_121 : i32
    %455 = arith.index_cast %454 : i32 to index
    %c0_122 = arith.constant 0 : index
    %456 = vector.load %arg15[%455, %c0_122] : memref<64x256xf32, #tpu.memory_space<vmem>>, vector<8x256xf32>
    %cst_123 = arith.constant dense<0.000000e+00> : vector<8x256xf32>
    %457 = tpu.matmul %453, %272, %cst_123 {dimension_numbers = #tpu.dot_dimension_numbers<[1], [0], [0], [1], [0, 0, 1, 1], [], []>} : vector<8x64xf32>, vector<64x256xf32>, vector<8x256xf32> -> vector<8x256xf32>
    %458 = arith.addf %456, %457 : vector<8x256xf32>
    %459 = vector.extract_strided_slice %458 {offsets = [0, 0], sizes = [8, 64], strides = [1, 1]} : vector<8x256xf32> to vector<8x64xf32>
    %460 = arith.negf %459 : vector<8x64xf32>
    %461 = math.exp %460 : vector<8x64xf32>
    %cst_124 = arith.constant 1.000000e+00 : f32
    %462 = vector.broadcast %cst_124 : f32 to vector<8x64xf32>
    %463 = arith.addf %462, %461 : vector<8x64xf32>
    %464 = arith.divf %462, %463 : vector<8x64xf32>
    %465 = vector.extract_strided_slice %458 {offsets = [0, 64], sizes = [8, 64], strides = [1, 1]} : vector<8x256xf32> to vector<8x64xf32>
    %466 = arith.negf %465 : vector<8x64xf32>
    %467 = math.exp %466 : vector<8x64xf32>
    %cst_125 = arith.constant 1.000000e+00 : f32
    %468 = vector.broadcast %cst_125 : f32 to vector<8x64xf32>
    %469 = arith.addf %468, %467 : vector<8x64xf32>
    %470 = arith.divf %468, %469 : vector<8x64xf32>
    %471 = vector.extract_strided_slice %458 {offsets = [0, 128], sizes = [8, 64], strides = [1, 1]} : vector<8x256xf32> to vector<8x64xf32>
    %472 = math.tanh %471 : vector<8x64xf32>
    %473 = vector.extract_strided_slice %458 {offsets = [0, 192], sizes = [8, 64], strides = [1, 1]} : vector<8x256xf32> to vector<8x64xf32>
    %474 = arith.negf %473 : vector<8x64xf32>
    %475 = math.exp %474 : vector<8x64xf32>
    %cst_126 = arith.constant 1.000000e+00 : f32
    %476 = vector.broadcast %cst_126 : f32 to vector<8x64xf32>
    %477 = arith.addf %476, %475 : vector<8x64xf32>
    %478 = arith.divf %476, %477 : vector<8x64xf32>
    %479 = arith.mulf %470, %451 : vector<8x64xf32>
    %480 = arith.mulf %464, %472 : vector<8x64xf32>
    %481 = arith.addf %479, %480 : vector<8x64xf32>
    %482 = math.tanh %481 : vector<8x64xf32>
    %483 = arith.mulf %478, %482 : vector<8x64xf32>
    %c7_i32_127 = arith.constant 7 : i32
    %c8_i32_128 = arith.constant 8 : i32
    %484 = arith.muli %c7_i32_127, %c8_i32_128 : i32
    %485 = arith.index_cast %484 : i32 to index
    %c0_129 = arith.constant 0 : index
    %486 = vector.load %arg15[%485, %c0_129] : memref<64x256xf32, #tpu.memory_space<vmem>>, vector<8x256xf32>
    %cst_130 = arith.constant dense<0.000000e+00> : vector<8x256xf32>
    %487 = tpu.matmul %483, %272, %cst_130 {dimension_numbers = #tpu.dot_dimension_numbers<[1], [0], [0], [1], [0, 0, 1, 1], [], []>} : vector<8x64xf32>, vector<64x256xf32>, vector<8x256xf32> -> vector<8x256xf32>
    %488 = arith.addf %486, %487 : vector<8x256xf32>
    %489 = vector.extract_strided_slice %488 {offsets = [0, 0], sizes = [8, 64], strides = [1, 1]} : vector<8x256xf32> to vector<8x64xf32>
    %490 = arith.negf %489 : vector<8x64xf32>
    %491 = math.exp %490 : vector<8x64xf32>
    %cst_131 = arith.constant 1.000000e+00 : f32
    %492 = vector.broadcast %cst_131 : f32 to vector<8x64xf32>
    %493 = arith.addf %492, %491 : vector<8x64xf32>
    %494 = arith.divf %492, %493 : vector<8x64xf32>
    %495 = vector.extract_strided_slice %488 {offsets = [0, 64], sizes = [8, 64], strides = [1, 1]} : vector<8x256xf32> to vector<8x64xf32>
    %496 = arith.negf %495 : vector<8x64xf32>
    %497 = math.exp %496 : vector<8x64xf32>
    %cst_132 = arith.constant 1.000000e+00 : f32
    %498 = vector.broadcast %cst_132 : f32 to vector<8x64xf32>
    %499 = arith.addf %498, %497 : vector<8x64xf32>
    %500 = arith.divf %498, %499 : vector<8x64xf32>
    %501 = vector.extract_strided_slice %488 {offsets = [0, 128], sizes = [8, 64], strides = [1, 1]} : vector<8x256xf32> to vector<8x64xf32>
    %502 = math.tanh %501 : vector<8x64xf32>
    %503 = vector.extract_strided_slice %488 {offsets = [0, 192], sizes = [8, 64], strides = [1, 1]} : vector<8x256xf32> to vector<8x64xf32>
    %504 = arith.negf %503 : vector<8x64xf32>
    %505 = math.exp %504 : vector<8x64xf32>
    %cst_133 = arith.constant 1.000000e+00 : f32
    %506 = vector.broadcast %cst_133 : f32 to vector<8x64xf32>
    %507 = arith.addf %506, %505 : vector<8x64xf32>
    %508 = arith.divf %506, %507 : vector<8x64xf32>
    %509 = arith.mulf %500, %481 : vector<8x64xf32>
    %510 = arith.mulf %494, %502 : vector<8x64xf32>
    %511 = arith.addf %509, %510 : vector<8x64xf32>
    %512 = math.tanh %511 : vector<8x64xf32>
    %513 = arith.mulf %508, %512 : vector<8x64xf32>
    %c8_i32_134 = arith.constant 8 : i32
    %c0_135 = arith.constant 0 : index
    %c0_136 = arith.constant 0 : index
    %514 = vector.load %arg8[%c0_135, %c0_136] : memref<64x64xf32, #tpu.memory_space<vmem>>, vector<64x64xf32>
    %cst_137 = arith.constant dense<0.000000e+00> : vector<8x64xf32>
    %515 = tpu.matmul %513, %514, %cst_137 {dimension_numbers = #tpu.dot_dimension_numbers<[1], [0], [0], [1], [0, 0, 1, 1], [], []>} : vector<8x64xf32>, vector<64x64xf32>, vector<8x64xf32> -> vector<8x64xf32>
    %c0_138 = arith.constant 0 : index
    %c0_139 = arith.constant 0 : index
    %516 = vector.load %arg9[%c0_138, %c0_139] : memref<1x64xf32, #tpu.memory_space<vmem>>, vector<1x64xf32>
    %517 = vector.broadcast %516 : vector<1x64xf32> to vector<8x64xf32>
    %518 = arith.addf %515, %517 : vector<8x64xf32>
    %cst_140 = arith.constant 0.000000e+00 : f32
    %519 = vector.broadcast %cst_140 : f32 to vector<8x64xf32>
    %520 = arith.maximumf %518, %519 : vector<8x64xf32>
    %c0_141 = arith.constant 0 : index
    %c0_142 = arith.constant 0 : index
    %521 = vector.load %arg10[%c0_141, %c0_142] : memref<64x6xf32, #tpu.memory_space<vmem>>, vector<64x6xf32>
    %cst_143 = arith.constant dense<0.000000e+00> : vector<8x6xf32>
    %522 = tpu.matmul %520, %521, %cst_143 {dimension_numbers = #tpu.dot_dimension_numbers<[1], [0], [0], [1], [0, 0, 1, 1], [], []>} : vector<8x64xf32>, vector<64x6xf32>, vector<8x6xf32> -> vector<8x6xf32>
    %c0_144 = arith.constant 0 : index
    %c0_145 = arith.constant 0 : index
    %523 = vector.load %arg11[%c0_144, %c0_145] : memref<1x6xf32, #tpu.memory_space<vmem>>, vector<1x6xf32>
    %524 = vector.broadcast %523 : vector<1x6xf32> to vector<8x6xf32>
    %525 = arith.addf %522, %524 : vector<8x6xf32>
    %c0_146 = arith.constant 0 : index
    %c0_147 = arith.constant 0 : index
    %526 = vector.load %arg12[%c0_146, %c0_147] : memref<8x6xf32, #tpu.memory_space<vmem>>, vector<8x6xf32>
    tpu.vector_store %arg12[%c0_146, %c0_147], %525 {strides = array<i32>} : memref<8x6xf32, #tpu.memory_space<vmem>>, vector<8x6xf32>,
    return
  }
  func.func @transform_0(%arg0: i32) -> (i32, i32) {
    %c0_i32 = arith.constant 0 : i32
    %c0_i32_0 = arith.constant 0 : i32
    %c0_i32_1 = arith.constant 0 : i32
    return %c0_i32, %c0_i32_0 : i32, i32
  }
  func.func @transform_1(%arg0: i32) -> (i32, i32) {
    %c0_i32 = arith.constant 0 : i32
    %c0_i32_0 = arith.constant 0 : i32
    %c0_i32_1 = arith.constant 0 : i32
    return %c0_i32, %c0_i32_0 : i32, i32
  }
  func.func @transform_2(%arg0: i32) -> (i32, i32) {
    %c0_i32 = arith.constant 0 : i32
    %c0_i32_0 = arith.constant 0 : i32
    %c0_i32_1 = arith.constant 0 : i32
    return %c0_i32, %c0_i32_0 : i32, i32
  }
  func.func @transform_3(%arg0: i32) -> (i32, i32) {
    %c0_i32 = arith.constant 0 : i32
    %c0_i32_0 = arith.constant 0 : i32
    %c0_i32_1 = arith.constant 0 : i32
    return %c0_i32, %c0_i32_0 : i32, i32
  }
  func.func @transform_4(%arg0: i32) -> (i32, i32) {
    %c0_i32 = arith.constant 0 : i32
    %c0_i32_0 = arith.constant 0 : i32
    %c0_i32_1 = arith.constant 0 : i32
    return %c0_i32, %c0_i32_0 : i32, i32
  }
  func.func @transform_5(%arg0: i32) -> (i32, i32) {
    %c0_i32 = arith.constant 0 : i32
    %c0_i32_0 = arith.constant 0 : i32
    %c0_i32_1 = arith.constant 0 : i32
    return %c0_i32, %c0_i32_0 : i32, i32
  }
  func.func @transform_6(%arg0: i32) -> (i32, i32) {
    %c0_i32 = arith.constant 0 : i32
    %c0_i32_0 = arith.constant 0 : i32
    %c0_i32_1 = arith.constant 0 : i32
    return %c0_i32, %c0_i32_0 : i32, i32
  }
  func.func @transform_7(%arg0: i32) -> (i32, i32) {
    %c0_i32 = arith.constant 0 : i32
    %c0_i32_0 = arith.constant 0 : i32
    %c0_i32_1 = arith.constant 0 : i32
    return %c0_i32, %c0_i32_0 : i32, i32
  }
  func.func @transform_8(%arg0: i32) -> (i32, i32) {
    %c0_i32 = arith.constant 0 : i32
    %c0_i32_0 = arith.constant 0 : i32
    %c0_i32_1 = arith.constant 0 : i32
    return %c0_i32, %c0_i32_0 : i32, i32
  }
  func.func @transform_9(%arg0: i32) -> (i32, i32) {
    %c0_i32 = arith.constant 0 : i32
    %c0_i32_0 = arith.constant 0 : i32
    %c0_i32_1 = arith.constant 0 : i32
    return %c0_i32, %c0_i32_0 : i32, i32
  }
  func.func @transform_10(%arg0: i32) -> (i32, i32) {
    %c0_i32 = arith.constant 0 : i32
    %c0_i32_0 = arith.constant 0 : i32
    %c0_i32_1 = arith.constant 0 : i32
    return %c0_i32, %c0_i32_0 : i32, i32
  }
  func.func @transform_11(%arg0: i32) -> (i32, i32) {
    %c0_i32 = arith.constant 0 : i32
    %c0_i32_0 = arith.constant 0 : i32
    %c0_i32_1 = arith.constant 0 : i32
    return %c0_i32, %c0_i32_0 : i32, i32
  }
}

</mosaic_0001>

<bundles_post_ra>
// kernel: tpu_custom_call.1
= control target key start
LH: loop header
LB: loop body
LE: loop exit
PB: predicated region body
PF: predicated region fallthrough
CT: control target
= control target key end

     0   :  { %16 = vsyncpa [#allocation6], 0  ;;  %s5088_s0 = inlined_call_operand.vmem [shape: f32[64,16], index: 0, kind: input, shape index: {}]   ;;  %s5089_s1 = inlined_call_operand.hbm [shape: f32[16,512], index: 1, kind: input, shape index: {}]   ;;  %s5090_s2 = inlined_call_operand.hbm [shape: f32[128,512], index: 2, kind: input, shape index: {}]   ;;  %s5091_s3 = inlined_call_operand.vmem [shape: f32[1,512], index: 3, kind: input, shape index: {}]   ;;  %s5092_s4 = inlined_call_operand.hbm [shape: f32[128,256], index: 4, kind: input, shape index: {}]   ;;  %s5093_s5 = inlined_call_operand.vmem [shape: f32[64,256], index: 5, kind: input, shape index: {}]   ;;  %s5094_s6 = inlined_call_operand.vmem [shape: f32[1,256], index: 6, kind: input, shape index: {}]   ;;  %s5095_s7 = inlined_call_operand.hbm [shape: f32[64,64], index: 7, kind: input, shape index: {}]   ;;  %s5096_s8 = inlined_call_operand.vmem [shape: f32[1,64], index: 8, kind: input, shape index: {}]   ;;  %s5097_s9 = inlined_call_operand.vmem [shape: f32[64,6], index: 9, kind: input, shape index: {}]   ;;  %s5098_s10 = inlined_call_operand.vmem [shape: f32[1,6], index: 10, kind: input, shape index: {}]   ;;  %s5099_s11 = inlined_call_operand.hbm [shape: f32[8,6], index: 11, kind: output, shape index: {}]  }
   0x1   :  { %17 = vsyncpa [#allocation9], 0 }
   0x2   :  { %18 = vsyncpa [#allocation12], 0 }
   0x3   :  { %19 = vsyncpa [#allocation7], 0  ;;  %s3622_s17 = smov [#allocation8]   ;;  %s3623_s19 = smov [#allocation5]  }
   0x4   :  { %s39_s18 = sshll.u32 %s3622_s17, 4  ;;  %s27_s20 = sshll.u32 %s3623_s19, 4  ;;  %s40_s18 = int_to_ptr.vmem [resolvable:$true] %s39_s18  ;;  %s28_s20 = int_to_ptr.vmem [resolvable:$true] %s27_s20 }
   0x5   :  { %s3522_s21 = scalar_lea.vmem %s40_s18, 8192  ;;  %p3527_p1 = scmp.lt.s32.totalorder %s40_s18, %s40_s18 }
   0x6   :  { %p3523_p0 = scmp.ne.s32.totalorder %s40_s18, %s3522_s21  ;;  %p3528_p2 = scmp.lt.s32.totalorder %s3522_s21, %s3522_s21 }
   0x8   :  { %p3529_p3 = por %p3528_p2, %p3527_p1 }
   0xa   :  { %p3530_p4 = pnand %p3529_p3, %p3523_p0 }
   0xc   :  { %3533 = shalt.err (!%p3530_p4)
}
   0xd   :  { %s3624_s22 = smov 512   ;;  %s3625_s23 = smov 32  }
   0xe   :  { %45 = dma.hbm_to_vmem [thread:$0]  %s5090_s2, 8192, %s40_s18, [#allocation9], %s3624_s22, %s3624_s22, %s3625_s23  }
   0xf   :  { %s3542_s26 = scalar_lea.vmem %s28_s20, 1024  ;;  %p3547_p6 = scmp.lt.s32.totalorder %s28_s20, %s28_s20 }
  0x10   :  { %p3543_p5 = scmp.ne.s32.totalorder %s28_s20, %s3542_s26  ;;  %p3548_p7 = scmp.lt.s32.totalorder %s3542_s26, %s3542_s26 }
  0x12   :  { %p3549_p8 = por %p3548_p7, %p3547_p6 }
  0x14   :  { %p3550_p9 = pnand %p3549_p8, %p3543_p5 }
  0x16   :  { %3553 = shalt.err (!%p3550_p9)
}
  0x17   :  { %33 = dma.hbm_to_vmem [thread:$0]  %s5089_s1, 1024, %s28_s20, [#allocation6], %s3624_s22, %s3624_s22, %s3625_s23  }
  0x18   :  { %s3626_s29 = smov [#allocation10]  }
  0x19   :  { %s53_s30 = sshll.u32 %s3626_s29, 4  ;;  %s54_s30 = int_to_ptr.vmem [resolvable:$true] %s53_s30 }
  0x1a   :  { %s3562_s12 = scalar_lea.vmem %s54_s30, 4096  ;;  %p3567_p11 = scmp.lt.s32.totalorder %s54_s30, %s54_s30 }
  0x1b   :  { %p3563_p10 = scmp.ne.s32.totalorder %s54_s30, %s3562_s12  ;;  %p3568_p12 = scmp.lt.s32.totalorder %s3562_s12, %s3562_s12 }
  0x1d   :  { %p3569_p13 = por %p3568_p12, %p3567_p11 }
  0x1f   :  { %p3570_p0 = pnand %p3569_p13, %p3563_p10 }
  0x21   :  { %3573 = shalt.err (!%p3570_p0)
}
  0x22   :  { %s3627_s2 = smov 256   ;;  %s3628_s13 = smov 16  }
  0x23   :  { %59 = dma.hbm_to_vmem [thread:$0]  %s5092_s4, 4096, %s54_s30, [#allocation9], %s3627_s2, %s3627_s2, %s3628_s13  }
  0x24   :  { %s3629_s16 = smov [#allocation11]  }
  0x25   :  { %s69_s17 = sshll.u32 %s3629_s16, 4  ;;  %s70_s17 = int_to_ptr.vmem [resolvable:$true] %s69_s17 }
  0x26   :  { %s3582_s1 = scalar_lea.vmem %s70_s17, 1024  ;;  %p3587_p2 = scmp.lt.s32.totalorder %s70_s17, %s70_s17 }
  0x27   :  { %p3583_p1 = scmp.ne.s32.totalorder %s70_s17, %s3582_s1  ;;  %p3588_p3 = scmp.lt.s32.totalorder %s3582_s1, %s3582_s1 }
  0x29   :  { %p3589_p4 = por %p3588_p3, %p3587_p2 }
  0x2b   :  { %p3590_p5 = pnand %p3589_p4, %p3583_p1 }
  0x2d   :  { %3593 = shalt.err (!%p3590_p5)
}
  0x2e   :  { %s3630_s18 = smov 128   ;;  %s3631_s19 = smov 8  }
  0x2f   :  { %75 = dma.hbm_to_vmem [thread:$0]  %s5095_s7, 1024, %s70_s17, [#allocation12], %s3630_s18, %s3630_s18, %s3631_s19  }
  0x30   :  { %3614 = dma.done.wait [#allocation6], 1024  }
  0x31   :  { %3615 = vsyncadd [#allocation6], 4294966272 }
  0x32   :  { %3616 = dma.done.wait [#allocation9], 12288  }
  0x33   :  { %3617 = vsyncadd [#allocation9], 4294955008 }
  0x34   :  { %3618 = dma.done.wait [#allocation12], 1024  }
  0x35   :  { %3619 = vsyncadd [#allocation12], 4294966272  ;;  %v5100_v0 = vmov 0.0   ;;  %v107_v1 = vld [vmem:[#allocation5 + $0x28] sm:$0xff]  ;;  %v109_v2 = vld [vmem:[#allocation5 + $0x38] sm:$0xff]  ;;  %vm132_vm0 = vcmask 130048  }
  0x36   :  { %221 = vmatprep.mubr.f32.mxu0 %v5100_v0  ;;  %334 = vmatprep.mubr.f32.mxu1 %v5100_v0  ;;  %v106_v3 = vld [vmem:[#allocation5 + $0x20] sm:$0xff]  ;;  %v108_v4 = vld [vmem:[#allocation5 + $0x30] sm:$0xff]  ;;  %v103_v5 = vld [vmem:[#allocation5 + $0x8] sm:$0xff]  ;;  %vm2078_vm1 = vcmask 523264   ;;  %vm3634_vm2 = vmmov 0   ;;  %s3635_s18 = smov [#allocation13]  }
  0x37   :  { %185 = vmatprep.subr.mxu0 %v107_v1  ;;  %298 = vmatprep.subr.mxu1 %v109_v2  ;;  %v105_v6 = vld [vmem:[#allocation5 + $0x18] sm:$0xff]  ;;  %v102_v7 = vld [vmem:[#allocation5] sm:$0xff]  ;;  %v104_v8 = vld [vmem:[#allocation5 + $0x10] sm:$0xff]  ;;  %s3078_s19 = sshll.u32 %s3635_s18, 4  ;;  %vm3070_vm3 = vcmask 48128   ;;  %s3079_s19 = int_to_ptr.vmem [resolvable:$true] %s3078_s19 }
  0x38   :  { %186 = vmatpush1.msra.mxu0 %v106_v3  ;;  %299 = vmatpush1.msra.mxu1 %v108_v4  ;;  %v94_v9 = vld [vmem:[%s5088_s0] sm:$0xff]  ;;  %v3713_v10 = vld [vmem:[#allocation8 + $0x1e8] sm:$0xff]  ;;  %v3715_v11 = vld [vmem:[#allocation8 + $0x1f8] sm:$0xff]  ;;  %p3599_p7 = scmp.lt.s32.totalorder %s3079_s19, %s3079_s19 }
  0x39   :  { %187 = vmatprep.subr.mxu0 %v103_v5  ;;  %300 = vmatprep.subr.mxu1 %v105_v6  ;;  %5199 = vst [vmem:[#allocation18_spill] sm:$0xff] %v3713_v10  ;;  %5200 = vst [vmem:[#allocation19_spill] sm:$0xff] %v3715_v11  ;;  %v3717_v12 = vld [vmem:[#allocation8 + $0x1e0] sm:$0xff]  ;;  %v3719_v13 = vld [vmem:[#allocation8 + $0x1f0] sm:$0xff] }
  0x3a   :  { %188 = vmatpush1.msra.mxu0 %v102_v7  ;;  %301 = vmatpush1.msra.mxu1 %v104_v8  ;;  %v3723_v14 = vld [vmem:[#allocation8 + $0x1c8] sm:$0xff]  ;;  %v3725_v15 = vld [vmem:[#allocation8 + $0x1d8] sm:$0xff]  ;;  %v3731_v16 = vld [vmem:[#allocation8 + $0x1c0] sm:$0xff] }
  0x3b   :  { %3089 = vmatmul.mubr.msk.f32.vlgmr.msra.gmra.mxu0 %vm132_vm0, %v94_v9  ;;  %3097 = vmatmul.mubr.msk.f32.vlgmr.msra.gmra.mxu1 %vm132_vm0, %v94_v9  ;;  %v3733_v17 = vld [vmem:[#allocation8 + $0x1d0] sm:$0xff]  ;;  %v95_v18 = vld [vmem:[%s5088_s0 + $0x8] sm:$0xff]  ;;  %v3744_v20 = vld [vmem:[#allocation8 + $0x1b8] sm:$0xff] }
  0x3c   :  { %483 = vmatprep.subr.mxu0 %v3713_v10  ;;  %554 = vmatprep.subr.mxu1 %v3715_v11  ;;  %v3742_v19 = vld [vmem:[#allocation8 + $0x1a8] sm:$0xff]  ;;  %v3748_v21 = vld [vmem:[#allocation8 + $0x1a0] sm:$0xff]  ;;  %v3750_v22 = vld [vmem:[#allocation8 + $0x1b0] sm:$0xff] }
  0x3d   :  { %484 = vmatpush1.msra.mxu0 %v3717_v12  ;;  %555 = vmatpush1.msra.mxu1 %v3719_v13  ;;  %v3754_v23 = vld [vmem:[#allocation8 + $0x188] sm:$0xff]  ;;  %v3756_v24 = vld [vmem:[#allocation8 + $0x198] sm:$0xff]  ;;  %v3762_v25 = vld [vmem:[#allocation8 + $0x180] sm:$0xff] }
  0x3e   :  { %485 = vmatprep.subr.mxu0 %v3723_v14  ;;  %556 = vmatprep.subr.mxu1 %v3725_v15  ;;  %v3764_v26 = vld [vmem:[#allocation8 + $0x190] sm:$0xff]  ;;  %v3773_v28 = vld [vmem:[#allocation8 + $0x168] sm:$0xff]  ;;  %v3775_v29 = vld [vmem:[#allocation8 + $0x178] sm:$0xff] }
  0x3f   :  { %227 = vmatprep.mubr.f32.mxu0 %v5100_v0  ;;  %340 = vmatprep.mubr.f32.mxu1 %v5100_v0  ;;  %v96_v27 = vld [vmem:[%s5088_s0 + $0x10] sm:$0xff]  ;;  %v3779_v30 = vld [vmem:[#allocation8 + $0x160] sm:$0xff]  ;;  %v3785_v32 = vld [vmem:[#allocation8 + $0x148] sm:$0xff] }
  0x40   :  { %486 = vmatpush1.msra.mxu0 %v3731_v16  ;;  %557 = vmatpush1.msra.mxu1 %v3733_v17  ;;  %v3781_v31 = vld [vmem:[#allocation8 + $0x170] sm:$0xff]  ;;  %v3787_v33 = vld [vmem:[#allocation8 + $0x158] sm:$0xff]  ;;  %v3793_v34 = vld [vmem:[#allocation8 + $0x140] sm:$0xff] }
  0x41   :  { %3090 = vmatmul.mubr.msk.f32.gmra.mxu0 %vm132_vm0, %v95_v18  ;;  %3098 = vmatmul.mubr.msk.f32.gmra.mxu1 %vm132_vm0, %v95_v18  ;;  %v3795_v35 = vld [vmem:[#allocation8 + $0x150] sm:$0xff]  ;;  %v97_v36 = vld [vmem:[%s5088_s0 + $0x18] sm:$0xff]  ;;  %v3804_v37 = vld [vmem:[#allocation8 + $0x128] sm:$0xff] }
  0x42   :  { %487 = vmatprep.subr.mxu0 %v3742_v19  ;;  %558 = vmatprep.subr.mxu1 %v3744_v20  ;;  %v3806_v38 = vld [vmem:[#allocation8 + $0x138] sm:$0xff]  ;;  %v3810_v39 = vld [vmem:[#allocation8 + $0x120] sm:$0xff]  ;;  %v3812_v40 = vld [vmem:[#allocation8 + $0x130] sm:$0xff] }
  0x43   :  { %488 = vmatpush1.msra.mxu0 %v3748_v21  ;;  %559 = vmatpush1.msra.mxu1 %v3750_v22  ;;  %v3816_v41 = vld [vmem:[#allocation8 + $0x108] sm:$0xff]  ;;  %v3818_v42 = vld [vmem:[#allocation8 + $0x118] sm:$0xff]  ;;  %v3824_v43 = vld [vmem:[#allocation8 + $0x100] sm:$0xff] }
  0x44   :  { %489 = vmatprep.subr.mxu0 %v3754_v23  ;;  %560 = vmatprep.subr.mxu1 %v3756_v24  ;;  %v3826_v44 = vld [vmem:[#allocation8 + $0x110] sm:$0xff]  ;;  %v98_v45 = vld [vmem:[%s5088_s0 + $0x20] sm:$0xff]  ;;  %v3835_v46 = vld [vmem:[#allocation8 + $0xe8] sm:$0xff] }
  0x45   :  { %233 = vmatprep.mubr.f32.mxu0 %v5100_v0  ;;  %346 = vmatprep.mubr.f32.mxu1 %v5100_v0  ;;  %v3837_v47 = vld [vmem:[#allocation8 + $0xf8] sm:$0xff]  ;;  %v3841_v48 = vld [vmem:[#allocation8 + $0xe0] sm:$0xff]  ;;  %v3843_v49 = vld [vmem:[#allocation8 + $0xf0] sm:$0xff] }
  0x46   :  { %490 = vmatpush1.msra.mxu0 %v3762_v25  ;;  %561 = vmatpush1.msra.mxu1 %v3764_v26  ;;  %v3847_v50 = vld [vmem:[#allocation8 + $0xc8] sm:$0xff]  ;;  %v3849_v51 = vld [vmem:[#allocation8 + $0xd8] sm:$0xff]  ;;  %v3855_v52 = vld [vmem:[#allocation8 + $0xc0] sm:$0xff] }
  0x47   :  { %3091 = vmatmul.mubr.msk.f32.gmra.mxu0 %vm132_vm0, %v96_v27  ;;  %3099 = vmatmul.mubr.msk.f32.gmra.mxu1 %vm132_vm0, %v96_v27  ;;  %v3857_v53 = vld [vmem:[#allocation8 + $0xd0] sm:$0xff]  ;;  %v99_v54 = vld [vmem:[%s5088_s0 + $0x28] sm:$0xff]  ;;  %v3868_v56 = vld [vmem:[#allocation8 + $0xb8] sm:$0xff] }
  0x48   :  { %491 = vmatprep.subr.mxu0 %v3773_v28  ;;  %562 = vmatprep.subr.mxu1 %v3775_v29  ;;  %v3866_v55 = vld [vmem:[#allocation8 + $0xa8] sm:$0xff]  ;;  %v3872_v57 = vld [vmem:[#allocation8 + $0xa0] sm:$0xff]  ;;  %v3874_v58 = vld [vmem:[#allocation8 + $0xb0] sm:$0xff] }
  0x49   :  { %492 = vmatpush1.msra.mxu0 %v3779_v30  ;;  %563 = vmatpush1.msra.mxu1 %v3781_v31  ;;  %5201 = vst [vmem:[#allocation20_spill] sm:$0xff] %v3874_v58  ;;  %v3878_v59 = vld [vmem:[#allocation8 + $0x88] sm:$0xff]  ;;  %v3880_v60 = vld [vmem:[#allocation8 + $0x98] sm:$0xff]  ;;  %v3886_v61 = vld [vmem:[#allocation8 + $0x80] sm:$0xff] }
  0x4a   :  { %493 = vmatprep.subr.mxu0 %v3785_v32  ;;  %564 = vmatprep.subr.mxu1 %v3787_v33  ;;  %5202 = vst [vmem:[#allocation21_spill] sm:$0xff] %v3878_v59  ;;  %5203 = vst [vmem:[#allocation22_spill] sm:$0xff] %v3880_v60  ;;  %v3888_v62 = vld [vmem:[#allocation8 + $0x90] sm:$0xff]  ;;  %v3897_v1 = vld [vmem:[#allocation8 + $0x68] sm:$0xff] }
  0x4b   :  { %239 = vmatprep.mubr.f32.mxu0 %v5100_v0  ;;  %352 = vmatprep.mubr.f32.mxu1 %v5100_v0  ;;  %5204 = vst [vmem:[#allocation23_spill] sm:$0xff] %v3886_v61  ;;  %5205 = vst [vmem:[#allocation24_spill] sm:$0xff] %v3888_v62  ;;  %v100_v63 = vld [vmem:[%s5088_s0 + $0x30] sm:$0xff]  ;;  %v3899_v2 = vld [vmem:[#allocation8 + $0x78] sm:$0xff] }
  0x4c   :  { %494 = vmatpush1.msra.mxu0 %v3793_v34  ;;  %565 = vmatpush1.msra.mxu1 %v3795_v35  ;;  %5206 = vst [vmem:[#allocation25_spill] sm:$0xff] %v3897_v1  ;;  %5207 = vst [vmem:[#allocation26_spill] sm:$0xff] %v3899_v2  ;;  %v3903_v3 = vld [vmem:[#allocation8 + $0x60] sm:$0xff]  ;;  %v3905_v4 = vld [vmem:[#allocation8 + $0x70] sm:$0xff] }
  0x4d   :  { %3092 = vmatmul.mubr.msk.f32.gmra.mxu0 %vm132_vm0, %v97_v36  ;;  %3100 = vmatmul.mubr.msk.f32.gmra.mxu1 %vm132_vm0, %v97_v36  ;;  %5208 = vst [vmem:[#allocation27_spill] sm:$0xff] %v3903_v3  ;;  %5209 = vst [vmem:[#allocation28_spill] sm:$0xff] %v3905_v4  ;;  %v3909_v5 = vld [vmem:[#allocation8 + $0x48] sm:$0xff]  ;;  %v3911_v6 = vld [vmem:[#allocation8 + $0x58] sm:$0xff] }
  0x4e   :  { %495 = vmatprep.subr.mxu0 %v3804_v37  ;;  %566 = vmatprep.subr.mxu1 %v3806_v38  ;;  %5210 = vst [vmem:[#allocation29_spill] sm:$0xff] %v3909_v5  ;;  %5211 = vst [vmem:[#allocation30_spill] sm:$0xff] %v3911_v6  ;;  %v3917_v7 = vld [vmem:[#allocation8 + $0x40] sm:$0xff]  ;;  %v3919_v8 = vld [vmem:[#allocation8 + $0x50] sm:$0xff] }
  0x4f   :  { %496 = vmatpush1.msra.mxu0 %v3810_v39  ;;  %567 = vmatpush1.msra.mxu1 %v3812_v40  ;;  %5212 = vst [vmem:[#allocation31_spill] sm:$0xff] %v3917_v7  ;;  %5213 = vst [vmem:[#allocation32_spill] sm:$0xff] %v3919_v8  ;;  %v101_v9 = vld [vmem:[%s5088_s0 + $0x38] sm:$0xff]  ;;  %v3928_v18 = vld [vmem:[#allocation8 + $0x28] sm:$0xff] }
  0x50   :  { %497 = vmatprep.subr.mxu0 %v3816_v41  ;;  %568 = vmatprep.subr.mxu1 %v3818_v42  ;;  %5214 = vst [vmem:[#allocation33_spill] sm:$0xff] %v3928_v18  ;;  %v3930_v27 = vld [vmem:[#allocation8 + $0x38] sm:$0xff]  ;;  %v3934_v36 = vld [vmem:[#allocation8 + $0x20] sm:$0xff] }
  0x51   :  { %245 = vmatprep.mubr.f32.mxu0 %v5100_v0  ;;  %358 = vmatprep.mubr.f32.mxu1 %v5100_v0  ;;  %5215 = vst [vmem:[#allocation34_spill] sm:$0xff] %v3930_v27  ;;  %5216 = vst [vmem:[#allocation35_spill] sm:$0xff] %v3934_v36 }
  0x52   :  { %498 = vmatpush1.msra.mxu0 %v3824_v43  ;;  %569 = vmatpush1.msra.mxu1 %v3826_v44 }
  0x53   :  { %3093 = vmatmul.mubr.msk.f32.gmra.mxu0 %vm132_vm0, %v98_v45  ;;  %3101 = vmatmul.mubr.msk.f32.gmra.mxu1 %vm132_vm0, %v98_v45  ;;  %v3936_v45 = vld [vmem:[#allocation8 + $0x30] sm:$0xff] }
  0x54   :  { %499 = vmatprep.subr.mxu0 %v3835_v46  ;;  %570 = vmatprep.subr.mxu1 %v3837_v47  ;;  %5217 = vst [vmem:[#allocation36_spill] sm:$0xff] %v3936_v45 }
  0x55   :  { %500 = vmatpush1.msra.mxu0 %v3841_v48  ;;  %571 = vmatpush1.msra.mxu1 %v3843_v49 }
  0x56   :  { %501 = vmatprep.subr.mxu0 %v3847_v50  ;;  %572 = vmatprep.subr.mxu1 %v3849_v51 }
  0x57   :  { %251 = vmatprep.mubr.f32.mxu0 %v5100_v0  ;;  %364 = vmatprep.mubr.f32.mxu1 %v5100_v0 }
  0x58   :  { %502 = vmatpush1.msra.mxu0 %v3855_v52  ;;  %573 = vmatpush1.msra.mxu1 %v3857_v53 }
  0x59   :  { %3094 = vmatmul.mubr.msk.f32.gmra.mxu0 %vm132_vm0, %v99_v54  ;;  %3102 = vmatmul.mubr.msk.f32.gmra.mxu1 %vm132_vm0, %v99_v54  ;;  %v3940_v54 = vld [vmem:[#allocation8 + $0x8] sm:$0xff] }
  0x5a   :  { %503 = vmatprep.subr.mxu0 %v3866_v55  ;;  %574 = vmatprep.subr.mxu1 %v3868_v56  ;;  %5218 = vst [vmem:[#allocation37_spill] sm:$0xff] %v3940_v54 }
  0x5b   :  { %504 = vmatpush1.msra.mxu0 %v3872_v57  ;;  %575 = vmatpush1.msra.mxu1 %v3874_v58 }
  0x5c   :  { %505 = vmatprep.subr.mxu0 %v3878_v59  ;;  %576 = vmatprep.subr.mxu1 %v3880_v60 }
  0x5d   :  { %257 = vmatprep.mubr.f32.mxu0 %v5100_v0  ;;  %370 = vmatprep.mubr.f32.mxu1 %v5100_v0 }
  0x5e   :  { %506 = vmatpush1.msra.mxu0 %v3886_v61  ;;  %577 = vmatpush1.msra.mxu1 %v3888_v62 }
  0x5f   :  { %3095 = vmatmul.mubr.msk.f32.gmra.mxu0 %vm132_vm0, %v100_v63  ;;  %3103 = vmatmul.mubr.msk.f32.gmra.mxu1 %vm132_vm0, %v100_v63  ;;  %v3942_v63 = vld [vmem:[#allocation8 + $0x18] sm:$0xff] }
  0x60   :  { %507 = vmatprep.subr.mxu0 %v3897_v1  ;;  %578 = vmatprep.subr.mxu1 %v3899_v2  ;;  %5219 = vst [vmem:[#allocation38_spill] sm:$0xff] %v3942_v63 }
  0x61   :  { %508 = vmatpush1.msra.mxu0 %v3903_v3  ;;  %579 = vmatpush1.msra.mxu1 %v3905_v4 }
  0x62   :  { %509 = vmatprep.subr.mxu0 %v3909_v5  ;;  %580 = vmatprep.subr.mxu1 %v3911_v6 }
  0x63   :  { %263 = vmatprep.mubr.f32.mxu0 %v5100_v0  ;;  %376 = vmatprep.mubr.f32.mxu1 %v5100_v0  ;;  %v3946_v0 = vld [vmem:[#allocation8] sm:$0xff] }
  0x64   :  { %510 = vmatpush1.msra.mxu0 %v3917_v7  ;;  %581 = vmatpush1.msra.mxu1 %v3919_v8  ;;  %5220 = vst [vmem:[#allocation39_spill] sm:$0xff] %v3946_v0  ;;  %v3950_v8 = vld [vmem:[#allocation8 + $0x10] sm:$0xff] }
  0x65   :  { %3096 = vmatmul.mubr.msk.f32.gmra.mxu0 %vm132_vm0, %v101_v9  ;;  %3104 = vmatmul.mubr.msk.f32.gmra.mxu1 %vm132_vm0, %v101_v9  ;;  %5221 = vst [vmem:[#allocation40_spill] sm:$0xff] %v3950_v8  ;;  %v5222_v9 = vmov 0.0  }
  0x66   :  { %511 = vmatprep.subr.mxu0 %v3928_v18  ;;  %582 = vmatprep.subr.mxu1 %v3930_v27 }
  0x67   :  { %512 = vmatpush1.msra.mxu0 %v3934_v36  ;;  %583 = vmatpush1.msra.mxu1 %v3936_v45 }
  0x68   :  { %513 = vmatprep.subr.mxu0 %v3940_v54  ;;  %584 = vmatprep.subr.mxu1 %v3942_v63 }
  0x69   :  { %514 = vmatpush1.msra.mxu0 %v3946_v0  ;;  %547 = vmatprep.mubr.f32.mxu0 %v5222_v9 }
  0x6a   :  { %585 = vmatpush1.msra.mxu1 %v3950_v8  ;;  %618 = vmatprep.mubr.f32.mxu1 %v5222_v9 }
  0x6b   :  { %548 = vmatmul.mubr.f32.vlgmr.msra.gmra.mxu0 %v5222_v9  ;;  %619 = vmatmul.mubr.f32.vlgmr.msra.gmra.mxu1 %v5222_v9 }
  0x6c   :  { %658 = vmatprep.subr.mxu0 %v3713_v10  ;;  %729 = vmatprep.subr.mxu1 %v3715_v11 }
  0x6d   :  { %659 = vmatpush1.msra.mxu0 %v3717_v12  ;;  %730 = vmatpush1.msra.mxu1 %v3719_v13 }
  0x6e   :  { %660 = vmatprep.subr.mxu0 %v3723_v14  ;;  %731 = vmatprep.subr.mxu1 %v3725_v15 }
  0x6f   :  { %661 = vmatpush1.msra.mxu0 %v3731_v16  ;;  %732 = vmatpush1.msra.mxu1 %v3733_v17 }
  0x70   :  { %662 = vmatprep.subr.mxu0 %v3742_v19  ;;  %733 = vmatprep.subr.mxu1 %v3744_v20 }
  0x71   :  { %663 = vmatpush1.msra.mxu0 %v3748_v21  ;;  %734 = vmatpush1.msra.mxu1 %v3750_v22 }
  0x72   :  { %664 = vmatprep.subr.mxu0 %v3754_v23  ;;  %735 = vmatprep.subr.mxu1 %v3756_v24 }
  0x73   :  { %665 = vmatpush1.msra.mxu0 %v3762_v25  ;;  %736 = vmatpush1.msra.mxu1 %v3764_v26 }
  0x74   :  { %666 = vmatprep.subr.mxu0 %v3773_v28  ;;  %737 = vmatprep.subr.mxu1 %v3775_v29 }
  0x75   :  { %667 = vmatpush1.msra.mxu0 %v3779_v30  ;;  %738 = vmatpush1.msra.mxu1 %v3781_v31 }
  0x76   :  { %668 = vmatprep.subr.mxu0 %v3785_v32  ;;  %739 = vmatprep.subr.mxu1 %v3787_v33 }
  0x77   :  { %669 = vmatpush1.msra.mxu0 %v3793_v34  ;;  %740 = vmatpush1.msra.mxu1 %v3795_v35 }
  0x78   :  { %670 = vmatprep.subr.mxu0 %v3804_v37  ;;  %741 = vmatprep.subr.mxu1 %v3806_v38 }
  0x79   :  { %671 = vmatpush1.msra.mxu0 %v3810_v39  ;;  %742 = vmatpush1.msra.mxu1 %v3812_v40 }
  0x7a   :  { %672 = vmatprep.subr.mxu0 %v3816_v41  ;;  %743 = vmatprep.subr.mxu1 %v3818_v42 }
  0x7b   :  { %673 = vmatpush1.msra.mxu0 %v3824_v43  ;;  %744 = vmatpush1.msra.mxu1 %v3826_v44 }
  0x7c   :  { %674 = vmatprep.subr.mxu0 %v3835_v46  ;;  %745 = vmatprep.subr.mxu1 %v3837_v47 }
  0x7d   :  { %675 = vmatpush1.msra.mxu0 %v3841_v48  ;;  %746 = vmatpush1.msra.mxu1 %v3843_v49 }
  0x7e   :  { %676 = vmatprep.subr.mxu0 %v3847_v50  ;;  %747 = vmatprep.subr.mxu1 %v3849_v51 }
  0x7f   :  { %677 = vmatpush1.msra.mxu0 %v3855_v52  ;;  %748 = vmatpush1.msra.mxu1 %v3857_v53 }
  0x80   :  { %678 = vmatprep.subr.mxu0 %v3866_v55  ;;  %749 = vmatprep.subr.mxu1 %v3868_v56 }
  0x81   :  { %679 = vmatpush1.msra.mxu0 %v3872_v57  ;;  %750 = vmatpush1.msra.mxu1 %v3874_v58 }
  0x82   :  { %680 = vmatprep.subr.mxu0 %v3878_v59  ;;  %751 = vmatprep.subr.mxu1 %v3880_v60  ;;  %v5223_v59 = vld [vmem:[#allocation32_spill] sm:$0xff] }
  0x83   :  { %681 = vmatpush1.msra.mxu0 %v3886_v61  ;;  %752 = vmatpush1.msra.mxu1 %v3888_v62 }
  0x84   :  { %682 = vmatprep.subr.mxu0 %v3897_v1  ;;  %753 = vmatprep.subr.mxu1 %v3899_v2 }
  0x85   :  { %683 = vmatpush1.msra.mxu0 %v3903_v3  ;;  %754 = vmatpush1.msra.mxu1 %v3905_v4 }
  0x86   :  { %684 = vmatprep.subr.mxu0 %v3909_v5  ;;  %755 = vmatprep.subr.mxu1 %v3911_v6 }
  0x87   :  { %685 = vmatpush1.msra.mxu0 %v3917_v7  ;;  %756 = vmatpush1.msra.mxu1 %v5223_v59 }
  0x88   :  { %686 = vmatprep.subr.mxu0 %v3928_v18  ;;  %757 = vmatprep.subr.mxu1 %v3930_v27  ;;  %v112_v27 = vlaneseq }
  0x89   :  { %687 = vmatpush1.msra.mxu0 %v3934_v36  ;;  %758 = vmatpush1.msra.mxu1 %v3936_v45 }
  0x8a   :  { %688 = vmatprep.subr.mxu0 %v3940_v54  ;;  %759 = vmatprep.subr.mxu1 %v3942_v63  ;;  %v4028_v36 = vshrl.u32 %v112_v27, 7 }
  0x8b   :  { %689 = vmatpush1.msra.mxu0 %v3946_v0  ;;  %722 = vmatprep.mubr.f32.mxu0 %v5222_v9 }
  0x8c   :  { %760 = vmatpush1.msra.mxu1 %v3950_v8  ;;  %793 = vmatprep.mubr.f32.mxu1 %v5222_v9  ;;  %5224 = vst [vmem:[#allocation41_spill] sm:$0xff] %v4028_v36  ;;  %v5143_v63 = vsub.s32 0, %v4028_v36  ;;  %v122_v0 = vsub.s32 2, %v4028_v36  ;;  %v110_v8 = vld [vmem:[%s5091_s3] sm:$0xf]  ;;  %v126_v27 = vsub.s32 3, %v4028_v36 }
  0x8d   :  { %833 = vmatprep.subr.mxu0 %v3713_v10  ;;  %904 = vmatprep.subr.mxu1 %v3715_v11  ;;  %v5148_v11 = vsub.s32 1, %v4028_v36 }
  0x8e   :  { %v115_v18 = vrot.slane %v110_v8, %v5143_v63  ;;  %v4047_v59 = vrot.slane %v110_v8, %v122_v0  ;;  %v4051_v4 = vrot.slane %v110_v8, %v126_v27 }
  0x8f   :  { %v119_v5 = vrot.slane %v110_v8, %v5148_v11 }
  0xfb   :  { %v4030_v45 = vpop.f32.mrf.mxu0  ;;  %v4032_v54 = vpop.f32.mrf.mxu1 }
  0xfd   :  { %v4039_v9 = vpop.f32.mrf.mxu0  ;;  %v4041_v10 = vpop.f32.mrf.mxu1 }
 0x101   :  { %v229_v7 = vpop.f32.mrf.mxu0  ;;  %v342_v6 = vpop.f32.mrf.mxu1 }
 0x102   :  { %v4053_v3 = vadd.f32 %v229_v7, %v115_v18  ;;  %v4056_v2 = vadd.f32 %v342_v6, %v4047_v59 }
 0x103   :  { %v231_v1 = vpop.f32.mrf.mxu0  ;;  %v344_v62 = vpop.f32.mrf.mxu1 }
 0x104   :  { %5225 = vst [vmem:[#allocation42_spill] sm:$0xff] %v4056_v2  ;;  %v4058_v61 = vadd.f32 %v231_v1, %v119_v5  ;;  %v4061_v63 = vadd.f32 %v344_v62, %v4051_v4 }
 0x106   :  { %5226 = vst [vmem:[#allocation43_spill] sm:$0xff] %v4058_v61  ;;  %5227 = vst [vmem:[#allocation44_spill] sm:$0xff] %v4061_v63 }
 0x107   :  { %v235_v0 = vpop.f32.mrf.mxu0  ;;  %v348_v60 = vpop.f32.mrf.mxu1 }
 0x108   :  { %v4063_v58 = vadd.f32 %v235_v0, %v115_v18  ;;  %v4066_v11 = vadd.f32 %v348_v60, %v4047_v59 }
 0x109   :  { %v237_v8 = vpop.f32.mrf.mxu0  ;;  %v350_v7 = vpop.f32.mrf.mxu1 }
 0x10a   :  { %5228 = vst [vmem:[#allocation45_spill] sm:$0xff] %v4063_v58  ;;  %5229 = vst [vmem:[#allocation46_spill] sm:$0xff] %v4066_v11  ;;  %v4068_v27 = vadd.f32 %v237_v8, %v119_v5  ;;  %v4071_v6 = vadd.f32 %v350_v7, %v4051_v4 }
 0x10c   :  { %5230 = vst [vmem:[#allocation47_spill] sm:$0xff] %v4068_v27  ;;  %5231 = vst [vmem:[#allocation48_spill] sm:$0xff] %v4071_v6 }
 0x10d   :  { %v241_v36 = vpop.f32.mrf.mxu0  ;;  %v354_v1 = vpop.f32.mrf.mxu1 }
 0x10e   :  { %v4073_v2 = vadd.f32 %v241_v36, %v115_v18  ;;  %v4076_v62 = vadd.f32 %v354_v1, %v4047_v59 }
 0x10f   :  { %v243_v63 = vpop.f32.mrf.mxu0  ;;  %v356_v0 = vpop.f32.mrf.mxu1 }
 0x110   :  { %5232 = vst [vmem:[#allocation49_spill] sm:$0xff] %v4073_v2  ;;  %5233 = vst [vmem:[#allocation50_spill] sm:$0xff] %v4076_v62  ;;  %v4078_v58 = vadd.f32 %v243_v63, %v119_v5  ;;  %v4081_v60 = vadd.f32 %v356_v0, %v4051_v4 }
 0x112   :  { %5234 = vst [vmem:[#allocation51_spill] sm:$0xff] %v4078_v58  ;;  %5235 = vst [vmem:[#allocation52_spill] sm:$0xff] %v4081_v60 }
 0x113   :  { %v247_v11 = vpop.f32.mrf.mxu0  ;;  %v360_v8 = vpop.f32.mrf.mxu1 }
 0x114   :  { %v4083_v27 = vadd.f32 %v247_v11, %v115_v18  ;;  %v4086_v7 = vadd.f32 %v360_v8, %v4047_v59 }
 0x115   :  { %v249_v6 = vpop.f32.mrf.mxu0  ;;  %v362_v36 = vpop.f32.mrf.mxu1 }
 0x116   :  { %5236 = vst [vmem:[#allocation53_spill] sm:$0xff] %v4083_v27  ;;  %5237 = vst [vmem:[#allocation54_spill] sm:$0xff] %v4086_v7  ;;  %v4088_v2 = vadd.f32 %v249_v6, %v119_v5  ;;  %v4091_v1 = vadd.f32 %v362_v36, %v4051_v4 }
 0x118   :  { %5238 = vst [vmem:[#allocation55_spill] sm:$0xff] %v4088_v2  ;;  %5239 = vst [vmem:[#allocation56_spill] sm:$0xff] %v4091_v1 }
 0x119   :  { %v253_v62 = vpop.f32.mrf.mxu0  ;;  %v366_v63 = vpop.f32.mrf.mxu1 }
 0x11a   :  { %v4093_v58 = vadd.f32 %v253_v62, %v115_v18  ;;  %v4096_v0 = vadd.f32 %v366_v63, %v4047_v59 }
 0x11b   :  { %v255_v60 = vpop.f32.mrf.mxu0  ;;  %v368_v11 = vpop.f32.mrf.mxu1 }
 0x11c   :  { %5240 = vst [vmem:[#allocation57_spill] sm:$0xff] %v4093_v58  ;;  %5241 = vst [vmem:[#allocation58_spill] sm:$0xff] %v4096_v0  ;;  %v4098_v27 = vadd.f32 %v255_v60, %v119_v5  ;;  %v4101_v8 = vadd.f32 %v368_v11, %v4051_v4 }
 0x11e   :  { %5242 = vst [vmem:[#allocation59_spill] sm:$0xff] %v4098_v27  ;;  %5243 = vst [vmem:[#allocation60_spill] sm:$0xff] %v4101_v8 }
 0x11f   :  { %v259_v7 = vpop.f32.mrf.mxu0  ;;  %v372_v6 = vpop.f32.mrf.mxu1 }
 0x120   :  { %v4103_v2 = vadd.f32 %v259_v7, %v115_v18  ;;  %v4106_v36 = vadd.f32 %v372_v6, %v4047_v59 }
 0x121   :  { %v261_v1 = vpop.f32.mrf.mxu0  ;;  %v374_v62 = vpop.f32.mrf.mxu1 }
 0x122   :  { %5244 = vst [vmem:[#allocation61_spill] sm:$0xff] %v4103_v2  ;;  %5245 = vst [vmem:[#allocation62_spill] sm:$0xff] %v4106_v36  ;;  %v4108_v58 = vadd.f32 %v261_v1, %v119_v5  ;;  %v4111_v63 = vadd.f32 %v374_v62, %v4051_v4  ;;  %v224_v1 = vadd.f32 %v4030_v45, %v115_v18 }
 0x123   :  { %v226_v62 = vadd.f32 %v4039_v9, %v119_v5 }
 0x124   :  { %5246 = vst [vmem:[#allocation63_spill] sm:$0xff] %v4108_v58  ;;  %5247 = vst [vmem:[#allocation64_spill] sm:$0xff] %v4111_v63 }
 0x125   :  { %v265_v0 = vpop.f32.mrf.mxu0  ;;  %v378_v60 = vpop.f32.mrf.mxu1 }
 0x126   :  { %v4113_v27 = vadd.f32 %v265_v0, %v115_v18  ;;  %v4116_v11 = vadd.f32 %v378_v60, %v4047_v59 }
 0x127   :  { %v267_v8 = vpop.f32.mrf.mxu0  ;;  %v380_v7 = vpop.f32.mrf.mxu1 }
 0x128   :  { %5248 = vst [vmem:[#allocation65_spill] sm:$0xff] %v4113_v27  ;;  %5249 = vst [vmem:[#allocation66_spill] sm:$0xff] %v4116_v11  ;;  %v4118_v2 = vadd.f32 %v267_v8, %v119_v5  ;;  %v4121_v6 = vadd.f32 %v380_v7, %v4051_v4  ;;  %v339_v8 = vadd.f32 %v4041_v10, %v4051_v4 }
 0x129   :  { %v337_v7 = vadd.f32 %v4032_v54, %v4047_v59 }
 0x12a   :  { %5250 = vst [vmem:[#allocation67_spill] sm:$0xff] %v4118_v2  ;;  %5251 = vst [vmem:[#allocation68_spill] sm:$0xff] %v4121_v6 }
 0x12b   :  { %v549_v36 = vpop.f32.mrf.mxu0  ;;  %v620_v27 = vpop.f32.mrf.mxu1 }
 0x12c   :  { %v625_v63 = vadd.f32 %v549_v36, %v224_v1  ;;  %v627_v6 = vadd.f32 %v620_v27, %v337_v7  ;;  %v5253_v27 = vld [vmem:[#allocation20_spill] sm:$0xff]  ;;  %v5258_v7 = vld [vmem:[#allocation25_spill] sm:$0xff] }
 0x12d   :  { %v551_v58 = vpop.f32.mrf.mxu0  ;;  %v622_v11 = vpop.f32.mrf.mxu1 }
 0x12e   :  { %v3105_v61 = vmul.f32 -1.442695, %v625_v63  ;;  %v626_v0 = vadd.f32 %v551_v58, %v226_v62  ;;  %v628_v2 = vadd.f32 %v622_v11, %v339_v8  ;;  %v5257_v8 = vld [vmem:[#allocation24_spill] sm:$0xff] }
 0x130   :  { %3226 = vpow2.f32 %v3105_v61  ;;  %v3106_v60 = vmul.f32 -1.442695, %v626_v0  ;;  %v3107_v18 = vmul.f32 -1.442695, %v628_v2  ;;  %v5255_v0 = vld [vmem:[#allocation22_spill] sm:$0xff] }
 0x132   :  { %3228 = vpow2.f32 %v3106_v60  ;;  %v5256_v60 = vld [vmem:[#allocation23_spill] sm:$0xff] }
 0x133   :  { %3230 = vpow2.f32 %v3107_v18  ;;  %v5259_v18 = vld [vmem:[#allocation26_spill] sm:$0xff] }
 0x13d   :  { %v3227_v45 = vpop.eup %3226 }
 0x13e   :  { %v632_v5 = vadd.f32 1.0, %v3227_v45  ;;  %v5260_v45 = vld [vmem:[#allocation27_spill] sm:$0xff] }
 0x13f   :  { %v3229_v9 = vpop.eup %3228 }
 0x140   :  { %3232 = vrcp.f32 %v632_v5  ;;  %v638_v58 = vadd.f32 1.0, %v3229_v9  ;;  %v3231_v61 = vpop.eup %3230  ;;  %v5261_v5 = vld [vmem:[#allocation28_spill] sm:$0xff]  ;;  %v5262_v9 = vld [vmem:[#allocation29_spill] sm:$0xff] }
 0x141   :  { %3234 = vtanh.f32 %v627_v6  ;;  %v645_v62 = vadd.f32 1.0, %v3231_v61  ;;  %v5254_v6 = vld [vmem:[#allocation21_spill] sm:$0xff]  ;;  %v5264_v61 = vld [vmem:[#allocation31_spill] sm:$0xff] }
 0x142   :  { %3236 = vrcp.f32 %v638_v58  ;;  %v5263_v58 = vld [vmem:[#allocation30_spill] sm:$0xff] }
 0x143   :  { %3238 = vrcp.f32 %v645_v62  ;;  %v5268_v62 = vld [vmem:[#allocation35_spill] sm:$0xff] }
 0x14d   :  { %v3233_v36 = vpop.eup %3232 }
 0x14e   :  { %v3235_v63 = vpop.eup %3234 }
 0x14f   :  { %v3237_v1 = vpop.eup %3236  ;;  %v649_v4 = vmul.f32 %v3235_v63, %v3233_v36  ;;  %v5265_v36 = vld [vmem:[#allocation32_spill] sm:$0xff]  ;;  %v5266_v63 = vld [vmem:[#allocation33_spill] sm:$0xff] }
 0x150   :  { %v648_v10 = vmul.f32 0.0, %v3237_v1  ;;  %v3239_v59 = vpop.eup %3238  ;;  %v5267_v1 = vld [vmem:[#allocation34_spill] sm:$0xff] }
 0x152   :  { %v4129_v11 = vadd.f32 %v649_v4, %v648_v10  ;;  %v5269_v10 = vld [vmem:[#allocation36_spill] sm:$0xff]  ;;  %v5270_v4 = vld [vmem:[#allocation37_spill] sm:$0xff] }
 0x154   :  { %3240 = vtanh.f32 %v4129_v11 }
 0x161   :  { %v3241_v2 = vpop.eup %3240 }
 0x162   :  { %v4132_v54 = vmul.f32 %v3241_v2, %v3239_v59  ;;  %v5271_v59 = vld [vmem:[#allocation38_spill] sm:$0xff]  ;;  %v5272_v2 = vld [vmem:[#allocation39_spill] sm:$0xff] }
 0x164   :  { %5252 = vst [vmem:[#allocation69_spill] sm:$0xff] %v4132_v54  ;;  %723 = vmatmul.mubr.f32.vlgmr.msra.gmra.mxu0 %v4132_v54  ;;  %794 = vmatmul.mubr.f32.vlgmr.msra.gmra.mxu1 %v4132_v54  ;;  %v5273_v54 = vmov 0.0  }
 0x165   :  { %834 = vmatpush1.msra.mxu0 %v3717_v12  ;;  %905 = vmatpush1.msra.mxu1 %v3719_v13 }
 0x166   :  { %835 = vmatprep.subr.mxu0 %v3723_v14  ;;  %906 = vmatprep.subr.mxu1 %v3725_v15 }
 0x167   :  { %836 = vmatpush1.msra.mxu0 %v3731_v16  ;;  %907 = vmatpush1.msra.mxu1 %v3733_v17 }
 0x168   :  { %837 = vmatprep.subr.mxu0 %v3742_v19  ;;  %908 = vmatprep.subr.mxu1 %v3744_v20 }
 0x169   :  { %838 = vmatpush1.msra.mxu0 %v3748_v21  ;;  %909 = vmatpush1.msra.mxu1 %v3750_v22 }
 0x16a   :  { %839 = vmatprep.subr.mxu0 %v3754_v23  ;;  %910 = vmatprep.subr.mxu1 %v3756_v24 }
 0x16b   :  { %840 = vmatpush1.msra.mxu0 %v3762_v25  ;;  %911 = vmatpush1.msra.mxu1 %v3764_v26 }
 0x16c   :  { %841 = vmatprep.subr.mxu0 %v3773_v28  ;;  %912 = vmatprep.subr.mxu1 %v3775_v29 }
 0x16d   :  { %842 = vmatpush1.msra.mxu0 %v3779_v30  ;;  %913 = vmatpush1.msra.mxu1 %v3781_v31 }
 0x16e   :  { %843 = vmatprep.subr.mxu0 %v3785_v32  ;;  %914 = vmatprep.subr.mxu1 %v3787_v33 }
 0x16f   :  { %844 = vmatpush1.msra.mxu0 %v3793_v34  ;;  %915 = vmatpush1.msra.mxu1 %v3795_v35 }
 0x170   :  { %845 = vmatprep.subr.mxu0 %v3804_v37  ;;  %916 = vmatprep.subr.mxu1 %v3806_v38 }
 0x171   :  { %846 = vmatpush1.msra.mxu0 %v3810_v39  ;;  %917 = vmatpush1.msra.mxu1 %v3812_v40 }
 0x172   :  { %847 = vmatprep.subr.mxu0 %v3816_v41  ;;  %918 = vmatprep.subr.mxu1 %v3818_v42 }
 0x173   :  { %848 = vmatpush1.msra.mxu0 %v3824_v43  ;;  %919 = vmatpush1.msra.mxu1 %v3826_v44 }
 0x174   :  { %849 = vmatprep.subr.mxu0 %v3835_v46  ;;  %920 = vmatprep.subr.mxu1 %v3837_v47 }
 0x175   :  { %850 = vmatpush1.msra.mxu0 %v3841_v48  ;;  %921 = vmatpush1.msra.mxu1 %v3843_v49 }
 0x176   :  { %851 = vmatprep.subr.mxu0 %v3847_v50  ;;  %922 = vmatprep.subr.mxu1 %v3849_v51 }
 0x177   :  { %852 = vmatpush1.msra.mxu0 %v3855_v52  ;;  %923 = vmatpush1.msra.mxu1 %v3857_v53 }
 0x178   :  { %853 = vmatprep.subr.mxu0 %v3866_v55  ;;  %924 = vmatprep.subr.mxu1 %v3868_v56 }
 0x179   :  { %854 = vmatpush1.msra.mxu0 %v3872_v57  ;;  %925 = vmatpush1.msra.mxu1 %v5253_v27 }
 0x17a   :  { %855 = vmatprep.subr.mxu0 %v5254_v6  ;;  %926 = vmatprep.subr.mxu1 %v5255_v0 }
 0x17b   :  { %856 = vmatpush1.msra.mxu0 %v5256_v60  ;;  %927 = vmatpush1.msra.mxu1 %v5257_v8 }
 0x17c   :  { %857 = vmatprep.subr.mxu0 %v5258_v7  ;;  %928 = vmatprep.subr.mxu1 %v5259_v18  ;;  %v5279_v18 = vld [vmem:[#allocation42_spill] sm:$0xff] }
 0x17d   :  { %858 = vmatpush1.msra.mxu0 %v5260_v45  ;;  %929 = vmatpush1.msra.mxu1 %v5261_v5  ;;  %v5278_v45 = vld [vmem:[#allocation44_spill] sm:$0xff] }
 0x17e   :  { %859 = vmatprep.subr.mxu0 %v5262_v9  ;;  %930 = vmatprep.subr.mxu1 %v5263_v58  ;;  %v5274_v58 = vld [vmem:[#allocation40_spill] sm:$0xff] }
 0x17f   :  { %860 = vmatpush1.msra.mxu0 %v5264_v61  ;;  %931 = vmatpush1.msra.mxu1 %v5265_v36  ;;  %v5275_v36 = vld [vmem:[#allocation18_spill] sm:$0xff] }
 0x180   :  { %861 = vmatprep.subr.mxu0 %v5266_v63  ;;  %932 = vmatprep.subr.mxu1 %v5267_v1  ;;  %v5276_v63 = vld [vmem:[#allocation19_spill] sm:$0xff] }
 0x181   :  { %862 = vmatpush1.msra.mxu0 %v5268_v62  ;;  %933 = vmatpush1.msra.mxu1 %v5269_v10 }
 0x182   :  { %863 = vmatprep.subr.mxu0 %v5270_v4  ;;  %934 = vmatprep.subr.mxu1 %v5271_v59  ;;  %v5277_v4 = vld [vmem:[#allocation43_spill] sm:$0xff] }
 0x183   :  { %864 = vmatpush1.msra.mxu0 %v5272_v2  ;;  %897 = vmatprep.mubr.f32.mxu0 %v5273_v54 }
 0x184   :  { %935 = vmatpush1.msra.mxu1 %v5274_v58  ;;  %968 = vmatprep.mubr.f32.mxu1 %v5273_v54 }
 0x185   :  { %1008 = vmatprep.subr.mxu0 %v5275_v36  ;;  %1079 = vmatprep.subr.mxu1 %v5276_v63 }
 0x224   :  { %v724_v1 = vpop.f32.mrf.mxu0  ;;  %v795_v59 = vpop.f32.mrf.mxu1 }
 0x225   :  { %v800_v62 = vadd.f32 %v724_v1, %v4053_v3  ;;  %v802_v54 = vadd.f32 %v795_v59, %v5279_v18 }
 0x226   :  { %v726_v10 = vpop.f32.mrf.mxu0  ;;  %v797_v5 = vpop.f32.mrf.mxu1 }
 0x227   :  { %v3108_v61 = vmul.f32 -1.442695, %v800_v62  ;;  %v801_v9 = vadd.f32 %v726_v10, %v5277_v4  ;;  %v803_v58 = vadd.f32 %v797_v5, %v5278_v45 }
 0x229   :  { %3242 = vpow2.f32 %v3108_v61  ;;  %v3109_v2 = vmul.f32 -1.442695, %v801_v9  ;;  %v3110_v7 = vmul.f32 -1.442695, %v803_v58 }
 0x22b   :  { %3244 = vpow2.f32 %v3109_v2 }
 0x22c   :  { %3246 = vtanh.f32 %v802_v54 }
 0x22d   :  { %3248 = vpow2.f32 %v3110_v7 }
 0x236   :  { %v3243_v36 = vpop.eup %3242 }
 0x237   :  { %v807_v8 = vadd.f32 1.0, %v3243_v36 }
 0x238   :  { %v3245_v63 = vpop.eup %3244 }
 0x239   :  { %3250 = vrcp.f32 %v807_v8  ;;  %v813_v3 = vadd.f32 1.0, %v3245_v63  ;;  %v3247_v1 = vpop.eup %3246  ;;  %v5302_v8 = vld [vmem:[#allocation47_spill] sm:$0xff]  ;;  %v5303_v63 = vld [vmem:[#allocation48_spill] sm:$0xff] }
 0x23a   :  { %v3249_v62 = vpop.eup %3248 }
 0x23b   :  { %3252 = vrcp.f32 %v813_v3  ;;  %v820_v4 = vadd.f32 1.0, %v3249_v62 }
 0x23d   :  { %3254 = vrcp.f32 %v820_v4 }
 0x246   :  { %v3251_v61 = vpop.eup %3250 }
 0x247   :  { %v824_v10 = vmul.f32 %v3251_v61, %v3247_v1  ;;  %v5304_v1 = vld [vmem:[#allocation46_spill] sm:$0xff] }
 0x248   :  { %v3253_v9 = vpop.eup %3252 }
 0x249   :  { %v823_v2 = vmul.f32 %v3253_v9, %v4129_v11 }
 0x24a   :  { %v3255_v18 = vpop.eup %3254 }
 0x24b   :  { %v4207_v45 = vadd.f32 %v824_v10, %v823_v2 }
 0x24d   :  { %3256 = vtanh.f32 %v4207_v45 }
 0x25a   :  { %v3257_v54 = vpop.eup %3256 }
 0x25b   :  { %v4210_v5 = vmul.f32 %v3257_v54, %v3255_v18 }
 0x25d   :  { %5280 = vst [vmem:[#allocation20_spill] sm:$0xff] %v4210_v5  ;;  %898 = vmatmul.mubr.f32.vlgmr.msra.gmra.mxu0 %v4210_v5  ;;  %969 = vmatmul.mubr.f32.vlgmr.msra.gmra.mxu1 %v4210_v5  ;;  %v4359_v5 = vld [vmem:[#allocation8 + $0x150] sm:$0xff] }
 0x25e   :  { %1009 = vmatpush1.msra.mxu0 %v3717_v12  ;;  %1080 = vmatpush1.msra.mxu1 %v3719_v13  ;;  %v5281_v12 = vld [vmem:[#allocation24_spill] sm:$0xff]  ;;  %v5282_v13 = vld [vmem:[#allocation25_spill] sm:$0xff] }
 0x25f   :  { %1010 = vmatprep.subr.mxu0 %v3723_v14  ;;  %1081 = vmatprep.subr.mxu1 %v3725_v15  ;;  %v5283_v14 = vld [vmem:[#allocation26_spill] sm:$0xff]  ;;  %v5284_v15 = vld [vmem:[#allocation27_spill] sm:$0xff] }
 0x260   :  { %1011 = vmatpush1.msra.mxu0 %v3731_v16  ;;  %1082 = vmatpush1.msra.mxu1 %v3733_v17  ;;  %v5285_v16 = vld [vmem:[#allocation28_spill] sm:$0xff]  ;;  %v5286_v17 = vld [vmem:[#allocation29_spill] sm:$0xff] }
 0x261   :  { %1012 = vmatprep.subr.mxu0 %v3742_v19  ;;  %1083 = vmatprep.subr.mxu1 %v3744_v20  ;;  %v5287_v19 = vld [vmem:[#allocation30_spill] sm:$0xff]  ;;  %v5288_v20 = vld [vmem:[#allocation31_spill] sm:$0xff] }
 0x262   :  { %1013 = vmatpush1.msra.mxu0 %v3748_v21  ;;  %1084 = vmatpush1.msra.mxu1 %v3750_v22  ;;  %v5289_v21 = vld [vmem:[#allocation32_spill] sm:$0xff]  ;;  %v5290_v22 = vld [vmem:[#allocation33_spill] sm:$0xff] }
 0x263   :  { %1014 = vmatprep.subr.mxu0 %v3754_v23  ;;  %1085 = vmatprep.subr.mxu1 %v3756_v24  ;;  %v5291_v23 = vld [vmem:[#allocation34_spill] sm:$0xff]  ;;  %v5292_v24 = vld [vmem:[#allocation35_spill] sm:$0xff] }
 0x264   :  { %1015 = vmatpush1.msra.mxu0 %v3762_v25  ;;  %1086 = vmatpush1.msra.mxu1 %v3764_v26  ;;  %v5293_v25 = vld [vmem:[#allocation36_spill] sm:$0xff]  ;;  %v5294_v26 = vld [vmem:[#allocation37_spill] sm:$0xff] }
 0x265   :  { %1016 = vmatprep.subr.mxu0 %v3773_v28  ;;  %1087 = vmatprep.subr.mxu1 %v3775_v29  ;;  %v5295_v28 = vld [vmem:[#allocation38_spill] sm:$0xff]  ;;  %v5296_v29 = vld [vmem:[#allocation39_spill] sm:$0xff] }
 0x266   :  { %1017 = vmatpush1.msra.mxu0 %v3779_v30  ;;  %1088 = vmatpush1.msra.mxu1 %v3781_v31  ;;  %v5297_v30 = vmov 0.0   ;;  %v5298_v31 = vld [vmem:[#allocation40_spill] sm:$0xff] }
 0x267   :  { %1018 = vmatprep.subr.mxu0 %v3785_v32  ;;  %1089 = vmatprep.subr.mxu1 %v3787_v33  ;;  %v4278_v32 = vld [vmem:[#allocation8 + $0x1e8] sm:$0xff]  ;;  %v4281_v33 = vld [vmem:[#allocation8 + $0x1f8] sm:$0xff] }
 0x268   :  { %1019 = vmatpush1.msra.mxu0 %v3793_v34  ;;  %1090 = vmatpush1.msra.mxu1 %v3795_v35  ;;  %5299 = vst [vmem:[#allocation21_spill] sm:$0xff] %v4278_v32  ;;  %5300 = vst [vmem:[#allocation22_spill] sm:$0xff] %v4281_v33  ;;  %v5301_v35 = vld [vmem:[#allocation45_spill] sm:$0xff] }
 0x269   :  { %1020 = vmatprep.subr.mxu0 %v3804_v37  ;;  %1091 = vmatprep.subr.mxu1 %v3806_v38 }
 0x26a   :  { %1021 = vmatpush1.msra.mxu0 %v3810_v39  ;;  %1092 = vmatpush1.msra.mxu1 %v3812_v40 }
 0x26b   :  { %1022 = vmatprep.subr.mxu0 %v3816_v41  ;;  %1093 = vmatprep.subr.mxu1 %v3818_v42 }
 0x26c   :  { %1023 = vmatpush1.msra.mxu0 %v3824_v43  ;;  %1094 = vmatpush1.msra.mxu1 %v3826_v44 }
 0x26d   :  { %1024 = vmatprep.subr.mxu0 %v3835_v46  ;;  %1095 = vmatprep.subr.mxu1 %v3837_v47 }
 0x26e   :  { %1025 = vmatpush1.msra.mxu0 %v3841_v48  ;;  %1096 = vmatpush1.msra.mxu1 %v3843_v49 }
 0x26f   :  { %1026 = vmatprep.subr.mxu0 %v3847_v50  ;;  %1097 = vmatprep.subr.mxu1 %v3849_v51 }
 0x270   :  { %1027 = vmatpush1.msra.mxu0 %v3855_v52  ;;  %1098 = vmatpush1.msra.mxu1 %v3857_v53 }
 0x271   :  { %1028 = vmatprep.subr.mxu0 %v3866_v55  ;;  %1099 = vmatprep.subr.mxu1 %v3868_v56 }
 0x272   :  { %1029 = vmatpush1.msra.mxu0 %v3872_v57  ;;  %1100 = vmatpush1.msra.mxu1 %v5253_v27 }
 0x273   :  { %1030 = vmatprep.subr.mxu0 %v5254_v6  ;;  %1101 = vmatprep.subr.mxu1 %v5255_v0 }
 0x274   :  { %1031 = vmatpush1.msra.mxu0 %v5256_v60  ;;  %1102 = vmatpush1.msra.mxu1 %v5281_v12 }
 0x275   :  { %1032 = vmatprep.subr.mxu0 %v5282_v13  ;;  %1103 = vmatprep.subr.mxu1 %v5283_v14 }
 0x276   :  { %1033 = vmatpush1.msra.mxu0 %v5284_v15  ;;  %1104 = vmatpush1.msra.mxu1 %v5285_v16 }
 0x277   :  { %1034 = vmatprep.subr.mxu0 %v5286_v17  ;;  %1105 = vmatprep.subr.mxu1 %v5287_v19 }
 0x278   :  { %1035 = vmatpush1.msra.mxu0 %v5288_v20  ;;  %1106 = vmatpush1.msra.mxu1 %v5289_v21 }
 0x279   :  { %1036 = vmatprep.subr.mxu0 %v5290_v22  ;;  %1107 = vmatprep.subr.mxu1 %v5291_v23 }
 0x27a   :  { %1037 = vmatpush1.msra.mxu0 %v5292_v24  ;;  %1108 = vmatpush1.msra.mxu1 %v5293_v25 }
 0x27b   :  { %1038 = vmatprep.subr.mxu0 %v5294_v26  ;;  %1109 = vmatprep.subr.mxu1 %v5295_v28 }
 0x27c   :  { %1039 = vmatpush1.msra.mxu0 %v5296_v29  ;;  %1072 = vmatprep.mubr.f32.mxu0 %v5297_v30 }
 0x27d   :  { %1110 = vmatpush1.msra.mxu1 %v5298_v31  ;;  %1143 = vmatprep.mubr.f32.mxu1 %v5297_v30 }
 0x27e   :  { %1183 = vmatprep.subr.mxu0 %v4278_v32  ;;  %1254 = vmatprep.subr.mxu1 %v4281_v33 }
 0x31d   :  { %v899_v34 = vpop.f32.mrf.mxu0  ;;  %v970_v58 = vpop.f32.mrf.mxu1 }
 0x31e   :  { %v975_v37 = vadd.f32 %v899_v34, %v5301_v35  ;;  %v977_v62 = vadd.f32 %v970_v58, %v5304_v1  ;;  %v4308_v1 = vld [vmem:[#allocation8 + $0x1c0] sm:$0xff] }
 0x31f   :  { %v901_v38 = vpop.f32.mrf.mxu0  ;;  %v972_v36 = vpop.f32.mrf.mxu1 }
 0x320   :  { %v3111_v11 = vmul.f32 -1.442695, %v975_v37  ;;  %v976_v7 = vadd.f32 %v901_v38, %v5302_v8  ;;  %v978_v3 = vadd.f32 %v972_v36, %v5303_v63  ;;  %v4296_v36 = vld [vmem:[#allocation8 + $0x1e0] sm:$0xff]  ;;  %v4299_v63 = vld [vmem:[#allocation8 + $0x1f0] sm:$0xff] }
 0x322   :  { %3258 = vpow2.f32 %v3111_v11  ;;  %v3112_v59 = vmul.f32 -1.442695, %v976_v7  ;;  %v3113_v61 = vmul.f32 -1.442695, %v978_v3  ;;  %v4305_v3 = vld [vmem:[#allocation8 + $0x1d8] sm:$0xff] }
 0x324   :  { %3260 = vpow2.f32 %v3112_v59 }
 0x325   :  { %3262 = vtanh.f32 %v977_v62  ;;  %v4311_v62 = vld [vmem:[#allocation8 + $0x1d0] sm:$0xff] }
 0x326   :  { %3264 = vpow2.f32 %v3113_v61  ;;  %v4314_v61 = vld [vmem:[#allocation8 + $0x1a8] sm:$0xff] }
 0x32f   :  { %v3259_v10 = vpop.eup %3258 }
 0x330   :  { %v982_v9 = vadd.f32 1.0, %v3259_v10  ;;  %v4317_v10 = vld [vmem:[#allocation8 + $0x1b8] sm:$0xff] }
 0x331   :  { %v3261_v4 = vpop.eup %3260 }
 0x332   :  { %3266 = vrcp.f32 %v982_v9  ;;  %v988_v2 = vadd.f32 1.0, %v3261_v4  ;;  %v3263_v18 = vpop.eup %3262  ;;  %v4320_v9 = vld [vmem:[#allocation8 + $0x1a0] sm:$0xff]  ;;  %v4323_v4 = vld [vmem:[#allocation8 + $0x1b0] sm:$0xff] }
 0x333   :  { %v3265_v54 = vpop.eup %3264 }
 0x334   :  { %3268 = vrcp.f32 %v988_v2  ;;  %v995_v38 = vadd.f32 1.0, %v3265_v54  ;;  %v4326_v2 = vld [vmem:[#allocation8 + $0x188] sm:$0xff]  ;;  %v4332_v54 = vld [vmem:[#allocation8 + $0x180] sm:$0xff] }
 0x336   :  { %3270 = vrcp.f32 %v995_v38  ;;  %v4344_v38 = vld [vmem:[#allocation8 + $0x160] sm:$0xff] }
 0x337   :  { %5306 = vst [vmem:[#allocation18_spill] sm:$0xff] %v4344_v38 }
 0x33f   :  { %v3267_v34 = vpop.eup %3266 }
 0x340   :  { %v999_v35 = vmul.f32 %v3267_v34, %v3263_v18  ;;  %v4329_v18 = vld [vmem:[#allocation8 + $0x198] sm:$0xff]  ;;  %v4335_v34 = vld [vmem:[#allocation8 + $0x190] sm:$0xff] }
 0x341   :  { %v3269_v37 = vpop.eup %3268 }
 0x342   :  { %v998_v11 = vmul.f32 %v3269_v37, %v4207_v45  ;;  %v4302_v45 = vld [vmem:[#allocation8 + $0x1c8] sm:$0xff]  ;;  %v4341_v37 = vld [vmem:[#allocation8 + $0x178] sm:$0xff] }
 0x343   :  { %v3271_v7 = vpop.eup %3270 }
 0x344   :  { %v4289_v8 = vadd.f32 %v999_v35, %v998_v11  ;;  %v4338_v35 = vld [vmem:[#allocation8 + $0x168] sm:$0xff]  ;;  %v4347_v11 = vld [vmem:[#allocation8 + $0x170] sm:$0xff] }
 0x345   :  { %5307 = vst [vmem:[#allocation19_spill] sm:$0xff] %v4347_v11 }
 0x346   :  { %3272 = vtanh.f32 %v4289_v8 }
 0x353   :  { %v3273_v58 = vpop.eup %3272 }
 0x354   :  { %v4292_v59 = vmul.f32 %v3273_v58, %v3271_v7  ;;  %v4350_v7 = vld [vmem:[#allocation8 + $0x148] sm:$0xff]  ;;  %v4353_v58 = vld [vmem:[#allocation8 + $0x158] sm:$0xff] }
 0x356   :  { %5305 = vst [vmem:[#allocation23_spill] sm:$0xff] %v4292_v59  ;;  %1073 = vmatmul.mubr.f32.vlgmr.msra.gmra.mxu0 %v4292_v59  ;;  %1144 = vmatmul.mubr.f32.vlgmr.msra.gmra.mxu1 %v4292_v59  ;;  %v4356_v59 = vld [vmem:[#allocation8 + $0x140] sm:$0xff] }
 0x357   :  { %1184 = vmatpush1.msra.mxu0 %v4296_v36  ;;  %1255 = vmatpush1.msra.mxu1 %v4299_v63 }
 0x358   :  { %1185 = vmatprep.subr.mxu0 %v4302_v45  ;;  %1256 = vmatprep.subr.mxu1 %v4305_v3 }
 0x359   :  { %1186 = vmatpush1.msra.mxu0 %v4308_v1  ;;  %1257 = vmatpush1.msra.mxu1 %v4311_v62 }
 0x35a   :  { %1187 = vmatprep.subr.mxu0 %v4314_v61  ;;  %1258 = vmatprep.subr.mxu1 %v4317_v10 }
 0x35b   :  { %1188 = vmatpush1.msra.mxu0 %v4320_v9  ;;  %1259 = vmatpush1.msra.mxu1 %v4323_v4 }
 0x35c   :  { %1189 = vmatprep.subr.mxu0 %v4326_v2  ;;  %1260 = vmatprep.subr.mxu1 %v4329_v18 }
 0x35d   :  { %1190 = vmatpush1.msra.mxu0 %v4332_v54  ;;  %1261 = vmatpush1.msra.mxu1 %v4335_v34 }
 0x35e   :  { %1191 = vmatprep.subr.mxu0 %v4338_v35  ;;  %1262 = vmatprep.subr.mxu1 %v4341_v37 }
 0x35f   :  { %1192 = vmatpush1.msra.mxu0 %v4344_v38  ;;  %1263 = vmatpush1.msra.mxu1 %v4347_v11  ;;  %v4362_v38 = vld [vmem:[#allocation8 + $0x128] sm:$0xff]  ;;  %v4365_v11 = vld [vmem:[#allocation8 + $0x138] sm:$0xff] }
 0x360   :  { %1193 = vmatprep.subr.mxu0 %v4350_v7  ;;  %1264 = vmatprep.subr.mxu1 %v4353_v58 }
 0x361   :  { %1194 = vmatpush1.msra.mxu0 %v4356_v59  ;;  %1265 = vmatpush1.msra.mxu1 %v4359_v5 }
 0x362   :  { %1195 = vmatprep.subr.mxu0 %v4362_v38  ;;  %1266 = vmatprep.subr.mxu1 %v4365_v11 }
 0x363   :  { %1196 = vmatpush1.msra.mxu0 %v3810_v39  ;;  %1267 = vmatpush1.msra.mxu1 %v3812_v40  ;;  %v5308_v40 = vld [vmem:[#allocation49_spill] sm:$0xff] }
 0x364   :  { %1197 = vmatprep.subr.mxu0 %v3816_v41  ;;  %1268 = vmatprep.subr.mxu1 %v3818_v42 }
 0x365   :  { %1198 = vmatpush1.msra.mxu0 %v3824_v43  ;;  %1269 = vmatpush1.msra.mxu1 %v3826_v44  ;;  %v5309_v44 = vld [vmem:[#allocation51_spill] sm:$0xff] }
 0x366   :  { %1199 = vmatprep.subr.mxu0 %v3835_v46  ;;  %1270 = vmatprep.subr.mxu1 %v3837_v47 }
 0x367   :  { %1200 = vmatpush1.msra.mxu0 %v3841_v48  ;;  %1271 = vmatpush1.msra.mxu1 %v3843_v49 }
 0x368   :  { %1201 = vmatprep.subr.mxu0 %v3847_v50  ;;  %1272 = vmatprep.subr.mxu1 %v3849_v51  ;;  %v5310_v50 = vld [vmem:[#allocation52_spill] sm:$0xff] }
 0x369   :  { %1202 = vmatpush1.msra.mxu0 %v3855_v52  ;;  %1273 = vmatpush1.msra.mxu1 %v3857_v53  ;;  %v5311_v52 = vld [vmem:[#allocation50_spill] sm:$0xff] }
 0x36a   :  { %1203 = vmatprep.subr.mxu0 %v3866_v55  ;;  %1274 = vmatprep.subr.mxu1 %v3868_v56 }
 0x36b   :  { %1204 = vmatpush1.msra.mxu0 %v3872_v57  ;;  %1275 = vmatpush1.msra.mxu1 %v5253_v27 }
 0x36c   :  { %1205 = vmatprep.subr.mxu0 %v5254_v6  ;;  %1276 = vmatprep.subr.mxu1 %v5255_v0 }
 0x36d   :  { %1206 = vmatpush1.msra.mxu0 %v5256_v60  ;;  %1277 = vmatpush1.msra.mxu1 %v5281_v12 }
 0x36e   :  { %1207 = vmatprep.subr.mxu0 %v5282_v13  ;;  %1278 = vmatprep.subr.mxu1 %v5283_v14 }
 0x36f   :  { %1208 = vmatpush1.msra.mxu0 %v5284_v15  ;;  %1279 = vmatpush1.msra.mxu1 %v5285_v16 }
 0x370   :  { %1209 = vmatprep.subr.mxu0 %v5286_v17  ;;  %1280 = vmatprep.subr.mxu1 %v5287_v19 }
 0x371   :  { %1210 = vmatpush1.msra.mxu0 %v5288_v20  ;;  %1281 = vmatpush1.msra.mxu1 %v5289_v21 }
 0x372   :  { %1211 = vmatprep.subr.mxu0 %v5290_v22  ;;  %1282 = vmatprep.subr.mxu1 %v5291_v23  ;;  %v5313_v22 = vld [vmem:[#allocation18_spill] sm:$0xff]  ;;  %v5314_v23 = vld [vmem:[#allocation19_spill] sm:$0xff] }
 0x373   :  { %1212 = vmatpush1.msra.mxu0 %v5292_v24  ;;  %1283 = vmatpush1.msra.mxu1 %v5293_v25  ;;  %v4446_v24 = vld [vmem:[#allocation8 + $0x120] sm:$0xff]  ;;  %v4449_v25 = vld [vmem:[#allocation8 + $0x130] sm:$0xff] }
 0x374   :  { %1213 = vmatprep.subr.mxu0 %v5294_v26  ;;  %1284 = vmatprep.subr.mxu1 %v5295_v28  ;;  %v4452_v26 = vld [vmem:[#allocation8 + $0x108] sm:$0xff]  ;;  %v4455_v28 = vld [vmem:[#allocation8 + $0x118] sm:$0xff] }
 0x375   :  { %1214 = vmatpush1.msra.mxu0 %v5296_v29  ;;  %1247 = vmatprep.mubr.f32.mxu0 %v5297_v30  ;;  %v4458_v29 = vld [vmem:[#allocation8 + $0x100] sm:$0xff] }
 0x376   :  { %1285 = vmatpush1.msra.mxu1 %v5298_v31  ;;  %1318 = vmatprep.mubr.f32.mxu1 %v5297_v30  ;;  %v4461_v31 = vld [vmem:[#allocation8 + $0x110] sm:$0xff] }
 0x377   :  { %1358 = vmatprep.subr.mxu0 %v4278_v32  ;;  %1429 = vmatprep.subr.mxu1 %v4281_v33 }
 0x416   :  { %v1074_v39 = vpop.f32.mrf.mxu0  ;;  %v1145_v47 = vpop.f32.mrf.mxu1 }
 0x417   :  { %v1150_v41 = vadd.f32 %v1074_v39, %v5308_v40  ;;  %v1152_v53 = vadd.f32 %v1145_v47, %v5311_v52  ;;  %v4467_v39 = vld [vmem:[#allocation8 + $0xf8] sm:$0xff]  ;;  %v4470_v40 = vld [vmem:[#allocation8 + $0xe0] sm:$0xff]  ;;  %v4488_v47 = vld [vmem:[#allocation8 + $0xa8] sm:$0xff] }
 0x418   :  { %v1076_v42 = vpop.f32.mrf.mxu0  ;;  %v1147_v49 = vpop.f32.mrf.mxu1  ;;  %v4503_v52 = vld [vmem:[#allocation8 + $0x98] sm:$0xff] }
 0x419   :  { %v3114_v43 = vmul.f32 -1.442695, %v1150_v41  ;;  %v1151_v46 = vadd.f32 %v1076_v42, %v5309_v44  ;;  %v1153_v51 = vadd.f32 %v1147_v49, %v5310_v50  ;;  %v4473_v41 = vld [vmem:[#allocation8 + $0xf0] sm:$0xff]  ;;  %v4476_v42 = vld [vmem:[#allocation8 + $0xc8] sm:$0xff]  ;;  %v4482_v44 = vld [vmem:[#allocation8 + $0xc0] sm:$0xff] }
 0x41a   :  { %v4494_v49 = vld [vmem:[#allocation8 + $0xa0] sm:$0xff]  ;;  %v4497_v50 = vld [vmem:[#allocation8 + $0xb0] sm:$0xff] }
 0x41b   :  { %3274 = vpow2.f32 %v3114_v43  ;;  %v3115_v48 = vmul.f32 -1.442695, %v1151_v46  ;;  %v3116_v55 = vmul.f32 -1.442695, %v1153_v51  ;;  %v4479_v43 = vld [vmem:[#allocation8 + $0xd8] sm:$0xff]  ;;  %v4485_v46 = vld [vmem:[#allocation8 + $0xd0] sm:$0xff] }
 0x41c   :  { %v4500_v51 = vld [vmem:[#allocation8 + $0x88] sm:$0xff] }
 0x41d   :  { %3276 = vpow2.f32 %v3115_v48  ;;  %v4491_v48 = vld [vmem:[#allocation8 + $0xb8] sm:$0xff] }
 0x41e   :  { %3278 = vtanh.f32 %v1152_v53  ;;  %v4506_v53 = vld [vmem:[#allocation8 + $0x80] sm:$0xff] }
 0x41f   :  { %3280 = vpow2.f32 %v3116_v55  ;;  %v4509_v55 = vld [vmem:[#allocation8 + $0x90] sm:$0xff] }
 0x420   :  { %5315 = vst [vmem:[#allocation44_spill] sm:$0xff] %v4509_v55 }
 0x428   :  { %v3275_v56 = vpop.eup %3274 }
 0x429   :  { %v1157_v57 = vadd.f32 1.0, %v3275_v56  ;;  %v4512_v56 = vld [vmem:[#allocation8 + $0x68] sm:$0xff] }
 0x42a   :  { %v3277_v27 = vpop.eup %3276  ;;  %5316 = vst [vmem:[#allocation42_spill] sm:$0xff] %v4512_v56 }
 0x42b   :  { %3282 = vrcp.f32 %v1157_v57  ;;  %v1163_v6 = vadd.f32 1.0, %v3277_v27  ;;  %v3279_v0 = vpop.eup %3278  ;;  %v4515_v57 = vld [vmem:[#allocation8 + $0x78] sm:$0xff]  ;;  %v4518_v27 = vld [vmem:[#allocation8 + $0x60] sm:$0xff] }
 0x42c   :  { %v3281_v60 = vpop.eup %3280  ;;  %5317 = vst [vmem:[#allocation24_spill] sm:$0xff] %v4515_v57  ;;  %5318 = vst [vmem:[#allocation25_spill] sm:$0xff] %v4518_v27 }
 0x42d   :  { %3284 = vrcp.f32 %v1163_v6  ;;  %v1170_v15 = vadd.f32 1.0, %v3281_v60  ;;  %v4521_v6 = vld [vmem:[#allocation8 + $0x70] sm:$0xff]  ;;  %v4527_v60 = vld [vmem:[#allocation8 + $0x58] sm:$0xff] }
 0x42e   :  { %5319 = vst [vmem:[#allocation26_spill] sm:$0xff] %v4521_v6  ;;  %5321 = vst [vmem:[#allocation28_spill] sm:$0xff] %v4527_v60 }
 0x42f   :  { %3286 = vrcp.f32 %v1170_v15  ;;  %v4539_v15 = vld [vmem:[#allocation8 + $0x38] sm:$0xff] }
 0x430   :  { %5325 = vst [vmem:[#allocation32_spill] sm:$0xff] %v4539_v15 }
 0x438   :  { %v3283_v12 = vpop.eup %3282 }
 0x439   :  { %v1174_v13 = vmul.f32 %v3283_v12, %v3279_v0  ;;  %v4524_v0 = vld [vmem:[#allocation8 + $0x48] sm:$0xff]  ;;  %v4530_v12 = vld [vmem:[#allocation8 + $0x40] sm:$0xff] }
 0x43a   :  { %v3285_v14 = vpop.eup %3284  ;;  %5320 = vst [vmem:[#allocation27_spill] sm:$0xff] %v4524_v0  ;;  %5322 = vst [vmem:[#allocation29_spill] sm:$0xff] %v4530_v12 }
 0x43b   :  { %v1173_v16 = vmul.f32 %v3285_v14, %v4289_v8  ;;  %v4464_v8 = vld [vmem:[#allocation8 + $0xe8] sm:$0xff] }
 0x43c   :  { %v3287_v19 = vpop.eup %3286  ;;  %v4536_v14 = vld [vmem:[#allocation8 + $0x28] sm:$0xff] }
 0x43d   :  { %v4415_v17 = vadd.f32 %v1174_v13, %v1173_v16  ;;  %v4533_v13 = vld [vmem:[#allocation8 + $0x50] sm:$0xff]  ;;  %5324 = vst [vmem:[#allocation31_spill] sm:$0xff] %v4536_v14  ;;  %v4542_v16 = vld [vmem:[#allocation8 + $0x20] sm:$0xff] }
 0x43e   :  { %5323 = vst [vmem:[#allocation30_spill] sm:$0xff] %v4533_v13  ;;  %5326 = vst [vmem:[#allocation33_spill] sm:$0xff] %v4542_v16 }
 0x43f   :  { %3288 = vtanh.f32 %v4415_v17 }
 0x44c   :  { %v3289_v20 = vpop.eup %3288 }
 0x44d   :  { %v4418_v21 = vmul.f32 %v3289_v20, %v3287_v19  ;;  %v4545_v19 = vld [vmem:[#allocation8 + $0x30] sm:$0xff]  ;;  %v4548_v20 = vld [vmem:[#allocation8 + $0x8] sm:$0xff] }
 0x44e   :  { %5327 = vst [vmem:[#allocation34_spill] sm:$0xff] %v4545_v19  ;;  %5328 = vst [vmem:[#allocation35_spill] sm:$0xff] %v4548_v20 }
 0x44f   :  { %5312 = vst [vmem:[#allocation43_spill] sm:$0xff] %v4418_v21  ;;  %1248 = vmatmul.mubr.f32.vlgmr.msra.gmra.mxu0 %v4418_v21  ;;  %1319 = vmatmul.mubr.f32.vlgmr.msra.gmra.mxu1 %v4418_v21  ;;  %v4551_v21 = vld [vmem:[#allocation8 + $0x18] sm:$0xff] }
 0x450   :  { %1359 = vmatpush1.msra.mxu0 %v4296_v36  ;;  %1430 = vmatpush1.msra.mxu1 %v4299_v63  ;;  %5329 = vst [vmem:[#allocation36_spill] sm:$0xff] %v4551_v21 }
 0x451   :  { %1360 = vmatprep.subr.mxu0 %v4302_v45  ;;  %1431 = vmatprep.subr.mxu1 %v4305_v3 }
 0x452   :  { %1361 = vmatpush1.msra.mxu0 %v4308_v1  ;;  %1432 = vmatpush1.msra.mxu1 %v4311_v62 }
 0x453   :  { %1362 = vmatprep.subr.mxu0 %v4314_v61  ;;  %1433 = vmatprep.subr.mxu1 %v4317_v10 }
 0x454   :  { %1363 = vmatpush1.msra.mxu0 %v4320_v9  ;;  %1434 = vmatpush1.msra.mxu1 %v4323_v4 }
 0x455   :  { %1364 = vmatprep.subr.mxu0 %v4326_v2  ;;  %1435 = vmatprep.subr.mxu1 %v4329_v18 }
 0x456   :  { %1365 = vmatpush1.msra.mxu0 %v4332_v54  ;;  %1436 = vmatpush1.msra.mxu1 %v4335_v34 }
 0x457   :  { %1366 = vmatprep.subr.mxu0 %v4338_v35  ;;  %1437 = vmatprep.subr.mxu1 %v4341_v37 }
 0x458   :  { %1367 = vmatpush1.msra.mxu0 %v5313_v22  ;;  %1438 = vmatpush1.msra.mxu1 %v5314_v23 }
 0x459   :  { %1368 = vmatprep.subr.mxu0 %v4350_v7  ;;  %1439 = vmatprep.subr.mxu1 %v4353_v58 }
 0x45a   :  { %1369 = vmatpush1.msra.mxu0 %v4356_v59  ;;  %1440 = vmatpush1.msra.mxu1 %v4359_v5 }
 0x45b   :  { %1370 = vmatprep.subr.mxu0 %v4362_v38  ;;  %1441 = vmatprep.subr.mxu1 %v4365_v11 }
 0x45c   :  { %1371 = vmatpush1.msra.mxu0 %v4446_v24  ;;  %1442 = vmatpush1.msra.mxu1 %v4449_v25 }
 0x45d   :  { %1372 = vmatprep.subr.mxu0 %v4452_v26  ;;  %1443 = vmatprep.subr.mxu1 %v4455_v28 }
 0x45e   :  { %1373 = vmatpush1.msra.mxu0 %v4458_v29  ;;  %1444 = vmatpush1.msra.mxu1 %v4461_v31 }
 0x45f   :  { %1374 = vmatprep.subr.mxu0 %v4464_v8  ;;  %1445 = vmatprep.subr.mxu1 %v4467_v39 }
 0x460   :  { %1375 = vmatpush1.msra.mxu0 %v4470_v40  ;;  %1446 = vmatpush1.msra.mxu1 %v4473_v41 }
 0x461   :  { %1376 = vmatprep.subr.mxu0 %v4476_v42  ;;  %1447 = vmatprep.subr.mxu1 %v4479_v43 }
 0x462   :  { %1377 = vmatpush1.msra.mxu0 %v4482_v44  ;;  %1448 = vmatpush1.msra.mxu1 %v4485_v46 }
 0x463   :  { %1378 = vmatprep.subr.mxu0 %v4488_v47  ;;  %1449 = vmatprep.subr.mxu1 %v4491_v48 }
 0x464   :  { %1379 = vmatpush1.msra.mxu0 %v4494_v49  ;;  %1450 = vmatpush1.msra.mxu1 %v4497_v50 }
 0x465   :  { %1380 = vmatprep.subr.mxu0 %v4500_v51  ;;  %1451 = vmatprep.subr.mxu1 %v4503_v52 }
 0x466   :  { %1381 = vmatpush1.msra.mxu0 %v4506_v53  ;;  %1452 = vmatpush1.msra.mxu1 %v4509_v55 }
 0x467   :  { %1382 = vmatprep.subr.mxu0 %v4512_v56  ;;  %1453 = vmatprep.subr.mxu1 %v4515_v57  ;;  %v5335_v57 = vld [vmem:[#allocation54_spill] sm:$0xff] }
 0x468   :  { %1383 = vmatpush1.msra.mxu0 %v4518_v27  ;;  %1454 = vmatpush1.msra.mxu1 %v4521_v6  ;;  %v5334_v27 = vld [vmem:[#allocation56_spill] sm:$0xff] }
 0x469   :  { %1384 = vmatprep.subr.mxu0 %v4524_v0  ;;  %1455 = vmatprep.subr.mxu1 %v4527_v60 }
 0x46a   :  { %1385 = vmatpush1.msra.mxu0 %v4530_v12  ;;  %1456 = vmatpush1.msra.mxu1 %v4533_v13  ;;  %v5333_v12 = vld [vmem:[#allocation55_spill] sm:$0xff] }
 0x46b   :  { %1386 = vmatprep.subr.mxu0 %v4536_v14  ;;  %1457 = vmatprep.subr.mxu1 %v4539_v15  ;;  %v4554_v14 = vld [vmem:[#allocation8] sm:$0xff]  ;;  %v4558_v15 = vld [vmem:[#allocation8 + $0x10] sm:$0xff] }
 0x46c   :  { %1387 = vmatpush1.msra.mxu0 %v4542_v16  ;;  %1458 = vmatpush1.msra.mxu1 %v4545_v19  ;;  %5330 = vst [vmem:[#allocation37_spill] sm:$0xff] %v4554_v14  ;;  %5331 = vst [vmem:[#allocation38_spill] sm:$0xff] %v4558_v15  ;;  %v5332_v19 = vld [vmem:[#allocation53_spill] sm:$0xff] }
 0x46d   :  { %1388 = vmatprep.subr.mxu0 %v4548_v20  ;;  %1459 = vmatprep.subr.mxu1 %v4551_v21 }
 0x46e   :  { %1389 = vmatpush1.msra.mxu0 %v4554_v14  ;;  %1422 = vmatprep.mubr.f32.mxu0 %v5297_v30 }
 0x46f   :  { %1460 = vmatpush1.msra.mxu1 %v4558_v15  ;;  %1493 = vmatprep.mubr.f32.mxu1 %v5297_v30 }
 0x470   :  { %1533 = vmatprep.subr.mxu0 %v4278_v32  ;;  %1604 = vmatprep.subr.mxu1 %v4281_v33 }
 0x50f   :  { %v1249_v20 = vpop.f32.mrf.mxu0  ;;  %v1320_v14 = vpop.f32.mrf.mxu1 }
 0x510   :  { %v1325_v16 = vadd.f32 %v1249_v20, %v5332_v19  ;;  %v1327_v30 = vadd.f32 %v1320_v14, %v5335_v57  ;;  %v5342_v14 = vld [vmem:[#allocation27_spill] sm:$0xff] }
 0x511   :  { %v1251_v21 = vpop.f32.mrf.mxu0  ;;  %v1322_v6 = vpop.f32.mrf.mxu1 }
 0x512   :  { %v3117_v13 = vmul.f32 -1.442695, %v1325_v16  ;;  %v1326_v60 = vadd.f32 %v1251_v21, %v5333_v12  ;;  %v1328_v15 = vadd.f32 %v1322_v6, %v5334_v27  ;;  %v5341_v6 = vld [vmem:[#allocation26_spill] sm:$0xff] }
 0x514   :  { %3290 = vpow2.f32 %v3117_v13  ;;  %v3118_v0 = vmul.f32 -1.442695, %v1326_v60  ;;  %v3119_v56 = vmul.f32 -1.442695, %v1328_v15  ;;  %v5343_v15 = vld [vmem:[#allocation28_spill] sm:$0xff] }
 0x516   :  { %3292 = vpow2.f32 %v3118_v0 }
 0x517   :  { %3294 = vtanh.f32 %v1327_v30 }
 0x518   :  { %3296 = vpow2.f32 %v3119_v56  ;;  %v5340_v56 = vld [vmem:[#allocation25_spill] sm:$0xff] }
 0x521   :  { %v3291_v32 = vpop.eup %3290 }
 0x522   :  { %v1332_v55 = vadd.f32 1.0, %v3291_v32 }
 0x523   :  { %v3293_v33 = vpop.eup %3292 }
 0x524   :  { %3298 = vrcp.f32 %v1332_v55  ;;  %v1338_v19 = vadd.f32 1.0, %v3293_v33  ;;  %v3295_v16 = vpop.eup %3294  ;;  %v5337_v33 = vld [vmem:[#allocation44_spill] sm:$0xff] }
 0x525   :  { %v3297_v21 = vpop.eup %3296  ;;  %v5339_v55 = vld [vmem:[#allocation24_spill] sm:$0xff] }
 0x526   :  { %3300 = vrcp.f32 %v1338_v19  ;;  %v1345_v0 = vadd.f32 1.0, %v3297_v21  ;;  %v5344_v19 = vld [vmem:[#allocation29_spill] sm:$0xff]  ;;  %v5346_v21 = vld [vmem:[#allocation31_spill] sm:$0xff] }
 0x528   :  { %3302 = vrcp.f32 %v1345_v0  ;;  %v5350_v0 = vld [vmem:[#allocation35_spill] sm:$0xff] }
 0x531   :  { %v3299_v12 = vpop.eup %3298 }
 0x532   :  { %v1349_v13 = vmul.f32 %v3299_v12, %v3295_v16  ;;  %v5345_v16 = vld [vmem:[#allocation30_spill] sm:$0xff]  ;;  %v5347_v12 = vld [vmem:[#allocation32_spill] sm:$0xff] }
 0x533   :  { %v3301_v60 = vpop.eup %3300 }
 0x534   :  { %v1348_v20 = vmul.f32 %v3301_v60, %v4415_v17  ;;  %v5338_v17 = vld [vmem:[#allocation42_spill] sm:$0xff] }
 0x535   :  { %v3303_v32 = vpop.eup %3302  ;;  %v5349_v60 = vld [vmem:[#allocation34_spill] sm:$0xff] }
 0x536   :  { %v4569_v27 = vadd.f32 %v1349_v13, %v1348_v20  ;;  %v5348_v13 = vld [vmem:[#allocation33_spill] sm:$0xff]  ;;  %v5351_v20 = vld [vmem:[#allocation36_spill] sm:$0xff] }
 0x538   :  { %3304 = vtanh.f32 %v4569_v27 }
 0x545   :  { %v3305_v30 = vpop.eup %3304 }
 0x546   :  { %v4572_v57 = vmul.f32 %v3305_v30, %v3303_v32  ;;  %v5352_v32 = vld [vmem:[#allocation37_spill] sm:$0xff]  ;;  %v5353_v30 = vmov 0.0  }
 0x548   :  { %5336 = vst [vmem:[#allocation39_spill] sm:$0xff] %v4572_v57  ;;  %1423 = vmatmul.mubr.f32.vlgmr.msra.gmra.mxu0 %v4572_v57  ;;  %1494 = vmatmul.mubr.f32.vlgmr.msra.gmra.mxu1 %v4572_v57  ;;  %v5354_v57 = vld [vmem:[#allocation38_spill] sm:$0xff] }
 0x549   :  { %1534 = vmatpush1.msra.mxu0 %v4296_v36  ;;  %1605 = vmatpush1.msra.mxu1 %v4299_v63 }
 0x54a   :  { %1535 = vmatprep.subr.mxu0 %v4302_v45  ;;  %1606 = vmatprep.subr.mxu1 %v4305_v3 }
 0x54b   :  { %1536 = vmatpush1.msra.mxu0 %v4308_v1  ;;  %1607 = vmatpush1.msra.mxu1 %v4311_v62 }
 0x54c   :  { %1537 = vmatprep.subr.mxu0 %v4314_v61  ;;  %1608 = vmatprep.subr.mxu1 %v4317_v10 }
 0x54d   :  { %1538 = vmatpush1.msra.mxu0 %v4320_v9  ;;  %1609 = vmatpush1.msra.mxu1 %v4323_v4 }
 0x54e   :  { %1539 = vmatprep.subr.mxu0 %v4326_v2  ;;  %1610 = vmatprep.subr.mxu1 %v4329_v18 }
 0x54f   :  { %1540 = vmatpush1.msra.mxu0 %v4332_v54  ;;  %1611 = vmatpush1.msra.mxu1 %v4335_v34 }
 0x550   :  { %1541 = vmatprep.subr.mxu0 %v4338_v35  ;;  %1612 = vmatprep.subr.mxu1 %v4341_v37 }
 0x551   :  { %1542 = vmatpush1.msra.mxu0 %v5313_v22  ;;  %1613 = vmatpush1.msra.mxu1 %v5314_v23 }
 0x552   :  { %1543 = vmatprep.subr.mxu0 %v4350_v7  ;;  %1614 = vmatprep.subr.mxu1 %v4353_v58 }
 0x553   :  { %1544 = vmatpush1.msra.mxu0 %v4356_v59  ;;  %1615 = vmatpush1.msra.mxu1 %v4359_v5 }
 0x554   :  { %1545 = vmatprep.subr.mxu0 %v4362_v38  ;;  %1616 = vmatprep.subr.mxu1 %v4365_v11 }
 0x555   :  { %1546 = vmatpush1.msra.mxu0 %v4446_v24  ;;  %1617 = vmatpush1.msra.mxu1 %v4449_v25 }
 0x556   :  { %1547 = vmatprep.subr.mxu0 %v4452_v26  ;;  %1618 = vmatprep.subr.mxu1 %v4455_v28 }
 0x557   :  { %1548 = vmatpush1.msra.mxu0 %v4458_v29  ;;  %1619 = vmatpush1.msra.mxu1 %v4461_v31 }
 0x558   :  { %1549 = vmatprep.subr.mxu0 %v4464_v8  ;;  %1620 = vmatprep.subr.mxu1 %v4467_v39 }
 0x559   :  { %1550 = vmatpush1.msra.mxu0 %v4470_v40  ;;  %1621 = vmatpush1.msra.mxu1 %v4473_v41 }
 0x55a   :  { %1551 = vmatprep.subr.mxu0 %v4476_v42  ;;  %1622 = vmatprep.subr.mxu1 %v4479_v43 }
 0x55b   :  { %1552 = vmatpush1.msra.mxu0 %v4482_v44  ;;  %1623 = vmatpush1.msra.mxu1 %v4485_v46 }
 0x55c   :  { %1553 = vmatprep.subr.mxu0 %v4488_v47  ;;  %1624 = vmatprep.subr.mxu1 %v4491_v48 }
 0x55d   :  { %1554 = vmatpush1.msra.mxu0 %v4494_v49  ;;  %1625 = vmatpush1.msra.mxu1 %v4497_v50 }
 0x55e   :  { %1555 = vmatprep.subr.mxu0 %v4500_v51  ;;  %1626 = vmatprep.subr.mxu1 %v4503_v52 }
 0x55f   :  { %1556 = vmatpush1.msra.mxu0 %v4506_v53  ;;  %1627 = vmatpush1.msra.mxu1 %v5337_v33 }
 0x560   :  { %1557 = vmatprep.subr.mxu0 %v5338_v17  ;;  %1628 = vmatprep.subr.mxu1 %v5339_v55  ;;  %v5360_v55 = vld [vmem:[#allocation58_spill] sm:$0xff] }
 0x561   :  { %1558 = vmatpush1.msra.mxu0 %v5340_v56  ;;  %1629 = vmatpush1.msra.mxu1 %v5341_v6  ;;  %v5359_v56 = vld [vmem:[#allocation60_spill] sm:$0xff] }
 0x562   :  { %1559 = vmatprep.subr.mxu0 %v5342_v14  ;;  %1630 = vmatprep.subr.mxu1 %v5343_v15 }
 0x563   :  { %1560 = vmatpush1.msra.mxu0 %v5344_v19  ;;  %1631 = vmatpush1.msra.mxu1 %v5345_v16  ;;  %v5355_v16 = vld [vmem:[#allocation21_spill] sm:$0xff] }
 0x564   :  { %1561 = vmatprep.subr.mxu0 %v5346_v21  ;;  %1632 = vmatprep.subr.mxu1 %v5347_v12  ;;  %v5356_v21 = vld [vmem:[#allocation22_spill] sm:$0xff] }
 0x565   :  { %1562 = vmatpush1.msra.mxu0 %v5348_v13  ;;  %1633 = vmatpush1.msra.mxu1 %v5349_v60  ;;  %v5357_v13 = vld [vmem:[#allocation57_spill] sm:$0xff] }
 0x566   :  { %1563 = vmatprep.subr.mxu0 %v5350_v0  ;;  %1634 = vmatprep.subr.mxu1 %v5351_v20  ;;  %v5358_v0 = vld [vmem:[#allocation59_spill] sm:$0xff] }
 0x567   :  { %1564 = vmatpush1.msra.mxu0 %v5352_v32  ;;  %1597 = vmatprep.mubr.f32.mxu0 %v5353_v30 }
 0x568   :  { %1635 = vmatpush1.msra.mxu1 %v5354_v57  ;;  %1668 = vmatprep.mubr.f32.mxu1 %v5353_v30 }
 0x569   :  { %1708 = vmatprep.subr.mxu0 %v5355_v16  ;;  %1779 = vmatprep.subr.mxu1 %v5356_v21 }
 0x608   :  { %v1424_v12 = vpop.f32.mrf.mxu0  ;;  %v1495_v20 = vpop.f32.mrf.mxu1 }
 0x609   :  { %v1500_v19 = vadd.f32 %v1424_v12, %v5357_v13  ;;  %v1502_v30 = vadd.f32 %v1495_v20, %v5360_v55 }
 0x60a   :  { %v1426_v60 = vpop.f32.mrf.mxu0  ;;  %v1497_v6 = vpop.f32.mrf.mxu1 }
 0x60b   :  { %v3120_v15 = vmul.f32 -1.442695, %v1500_v19  ;;  %v1501_v14 = vadd.f32 %v1426_v60, %v5358_v0  ;;  %v1503_v57 = vadd.f32 %v1497_v6, %v5359_v56 }
 0x60d   :  { %3306 = vpow2.f32 %v3120_v15  ;;  %v3121_v32 = vmul.f32 -1.442695, %v1501_v14  ;;  %v3122_v17 = vmul.f32 -1.442695, %v1503_v57 }
 0x60f   :  { %3308 = vpow2.f32 %v3121_v32 }
 0x610   :  { %3310 = vtanh.f32 %v1502_v30 }
 0x611   :  { %3312 = vpow2.f32 %v3122_v17 }
 0x61a   :  { %v3307_v16 = vpop.eup %3306 }
 0x61b   :  { %v1507_v33 = vadd.f32 1.0, %v3307_v16  ;;  %v1917_v16 = vld [vmem:[#allocation10 + $0xf0] sm:$0xff] }
 0x61c   :  { %v3309_v21 = vpop.eup %3308 }
 0x61d   :  { %3314 = vrcp.f32 %v1507_v33  ;;  %v1513_v12 = vadd.f32 1.0, %v3309_v21  ;;  %v3311_v19 = vpop.eup %3310  ;;  %v4737_v21 = vld [vmem:[%s5093_s5 + $0x70] sm:$0xff] }
 0x61e   :  { %v3313_v13 = vpop.eup %3312 }
 0x61f   :  { %3316 = vrcp.f32 %v1513_v12  ;;  %v1520_v0 = vadd.f32 1.0, %v3313_v13  ;;  %v1916_v12 = vld [vmem:[#allocation10 + $0xe8] sm:$0xff]  ;;  %v1915_v13 = vld [vmem:[#allocation10 + $0xe0] sm:$0xff] }
 0x621   :  { %3318 = vrcp.f32 %v1520_v0  ;;  %v1913_v0 = vld [vmem:[#allocation10 + $0xd0] sm:$0xff] }
 0x62a   :  { %v3315_v15 = vpop.eup %3314 }
 0x62b   :  { %v1524_v60 = vmul.f32 %v3315_v15, %v3311_v19  ;;  %v4742_v19 = vld [vmem:[%s5093_s5 + $0x68] sm:$0xff]  ;;  %v4749_v15 = vld [vmem:[%s5093_s5 + $0x60] sm:$0xff] }
 0x62c   :  { %v3317_v14 = vpop.eup %3316 }
 0x62d   :  { %v1523_v32 = vmul.f32 %v3317_v14, %v4569_v27  ;;  %v4755_v14 = vld [vmem:[%s5093_s5 + $0x58] sm:$0xff] }
 0x62e   :  { %v3319_v57 = vpop.eup %3318 }
 0x62f   :  { %v4647_v56 = vadd.f32 %v1524_v60, %v1523_v32  ;;  %v1914_v60 = vld [vmem:[#allocation10 + $0xd8] sm:$0xff]  ;;  %v4761_v32 = vld [vmem:[%s5093_s5 + $0x50] sm:$0xff] }
 0x631   :  { %3320 = vtanh.f32 %v4647_v56 }
 0x63e   :  { %v3321_v55 = vpop.eup %3320 }
 0x63f   :  { %v4650_v6 = vmul.f32 %v3321_v55, %v3319_v57  ;;  %v4767_v57 = vld [vmem:[%s5093_s5 + $0x48] sm:$0xff]  ;;  %v1911_v55 = vld [vmem:[#allocation10 + $0xc0] sm:$0xff] }
 0x641   :  { %1598 = vmatmul.mubr.f32.vlgmr.msra.gmra.mxu0 %v4650_v6  ;;  %1669 = vmatmul.mubr.f32.vlgmr.msra.gmra.mxu1 %v4650_v6 }
 0x642   :  { %1709 = vmatpush1.msra.mxu0 %v4296_v36  ;;  %1780 = vmatpush1.msra.mxu1 %v4299_v63  ;;  %v5363_v36 = vld [vmem:[#allocation24_spill] sm:$0xff]  ;;  %v5364_v63 = vld [vmem:[#allocation25_spill] sm:$0xff] }
 0x643   :  { %1710 = vmatprep.subr.mxu0 %v4302_v45  ;;  %1781 = vmatprep.subr.mxu1 %v4305_v3  ;;  %v5365_v45 = vld [vmem:[#allocation26_spill] sm:$0xff]  ;;  %v5366_v3 = vld [vmem:[#allocation27_spill] sm:$0xff] }
 0x644   :  { %1711 = vmatpush1.msra.mxu0 %v4308_v1  ;;  %1782 = vmatpush1.msra.mxu1 %v4311_v62  ;;  %v5367_v1 = vld [vmem:[#allocation28_spill] sm:$0xff]  ;;  %v5368_v62 = vld [vmem:[#allocation29_spill] sm:$0xff] }
 0x645   :  { %1712 = vmatprep.subr.mxu0 %v4314_v61  ;;  %1783 = vmatprep.subr.mxu1 %v4317_v10  ;;  %v5369_v61 = vld [vmem:[#allocation30_spill] sm:$0xff]  ;;  %v5370_v10 = vld [vmem:[#allocation31_spill] sm:$0xff] }
 0x646   :  { %1713 = vmatpush1.msra.mxu0 %v4320_v9  ;;  %1784 = vmatpush1.msra.mxu1 %v4323_v4  ;;  %v5371_v9 = vld [vmem:[#allocation32_spill] sm:$0xff]  ;;  %v5372_v4 = vld [vmem:[#allocation33_spill] sm:$0xff] }
 0x647   :  { %1714 = vmatprep.subr.mxu0 %v4326_v2  ;;  %1785 = vmatprep.subr.mxu1 %v4329_v18  ;;  %v5373_v2 = vld [vmem:[#allocation34_spill] sm:$0xff]  ;;  %v5374_v18 = vld [vmem:[#allocation35_spill] sm:$0xff] }
 0x648   :  { %1715 = vmatpush1.msra.mxu0 %v4332_v54  ;;  %1786 = vmatpush1.msra.mxu1 %v4335_v34  ;;  %v5375_v54 = vld [vmem:[#allocation36_spill] sm:$0xff]  ;;  %v5376_v34 = vld [vmem:[#allocation37_spill] sm:$0xff] }
 0x649   :  { %1716 = vmatprep.subr.mxu0 %v4338_v35  ;;  %1787 = vmatprep.subr.mxu1 %v4341_v37  ;;  %v5377_v35 = vmov 0.0   ;;  %v5378_v37 = vld [vmem:[#allocation38_spill] sm:$0xff] }
 0x64a   :  { %1717 = vmatpush1.msra.mxu0 %v5313_v22  ;;  %1788 = vmatpush1.msra.mxu1 %v5314_v23 }
 0x64b   :  { %1718 = vmatprep.subr.mxu0 %v4350_v7  ;;  %1789 = vmatprep.subr.mxu1 %v4353_v58  ;;  %v5379_v58 = vld [vmem:[#allocation61_spill] sm:$0xff] }
 0x64c   :  { %1719 = vmatpush1.msra.mxu0 %v4356_v59  ;;  %1790 = vmatpush1.msra.mxu1 %v4359_v5  ;;  %v5361_v5 = vld [vmem:[#allocation44_spill] sm:$0xff]  ;;  %v5362_v59 = vld [vmem:[#allocation42_spill] sm:$0xff] }
 0x64d   :  { %1720 = vmatprep.subr.mxu0 %v4362_v38  ;;  %1791 = vmatprep.subr.mxu1 %v4365_v11  ;;  %v1918_v38 = vld [vmem:[#allocation10 + $0xf8] sm:$0xff] }
 0x64e   :  { %1721 = vmatpush1.msra.mxu0 %v4446_v24  ;;  %1792 = vmatpush1.msra.mxu1 %v4449_v25  ;;  %v4721_v11 = vld [vmem:[%s5093_s5 + $0x78] sm:$0xff]  ;;  %v5380_v25 = vld [vmem:[#allocation63_spill] sm:$0xff] }
 0x64f   :  { %1722 = vmatprep.subr.mxu0 %v4452_v26  ;;  %1793 = vmatprep.subr.mxu1 %v4455_v28 }
 0x650   :  { %1723 = vmatpush1.msra.mxu0 %v4458_v29  ;;  %1794 = vmatpush1.msra.mxu1 %v4461_v31 }
 0x651   :  { %1724 = vmatprep.subr.mxu0 %v4464_v8  ;;  %1795 = vmatprep.subr.mxu1 %v4467_v39  ;;  %v5381_v8 = vld [vmem:[#allocation64_spill] sm:$0xff] }
 0x652   :  { %1725 = vmatpush1.msra.mxu0 %v4470_v40  ;;  %1796 = vmatpush1.msra.mxu1 %v4473_v41  ;;  %v5382_v40 = vld [vmem:[#allocation62_spill] sm:$0xff] }
 0x653   :  { %1726 = vmatprep.subr.mxu0 %v4476_v42  ;;  %1797 = vmatprep.subr.mxu1 %v4479_v43 }
 0x654   :  { %1727 = vmatpush1.msra.mxu0 %v4482_v44  ;;  %1798 = vmatpush1.msra.mxu1 %v4485_v46 }
 0x655   :  { %1728 = vmatprep.subr.mxu0 %v4488_v47  ;;  %1799 = vmatprep.subr.mxu1 %v4491_v48 }
 0x656   :  { %1729 = vmatpush1.msra.mxu0 %v4494_v49  ;;  %1800 = vmatpush1.msra.mxu1 %v4497_v50 }
 0x657   :  { %1730 = vmatprep.subr.mxu0 %v4500_v51  ;;  %1801 = vmatprep.subr.mxu1 %v4503_v52 }
 0x658   :  { %1731 = vmatpush1.msra.mxu0 %v4506_v53  ;;  %1802 = vmatpush1.msra.mxu1 %v5361_v5  ;;  %v4773_v5 = vld [vmem:[%s5093_s5 + $0x40] sm:$0xff] }
 0x659   :  { %1732 = vmatprep.subr.mxu0 %v5362_v59  ;;  %1803 = vmatprep.subr.mxu1 %v5363_v36  ;;  %v1910_v59 = vld [vmem:[#allocation10 + $0xb8] sm:$0xff] }
 0x65a   :  { %1733 = vmatpush1.msra.mxu0 %v5364_v63  ;;  %1804 = vmatpush1.msra.mxu1 %v5365_v45  ;;  %v4779_v36 = vld [vmem:[%s5093_s5 + $0x38] sm:$0xff]  ;;  %v1909_v63 = vld [vmem:[#allocation10 + $0xb0] sm:$0xff] }
 0x65b   :  { %1734 = vmatprep.subr.mxu0 %v5366_v3  ;;  %1805 = vmatprep.subr.mxu1 %v5367_v1  ;;  %v4785_v45 = vld [vmem:[%s5093_s5 + $0x30] sm:$0xff]  ;;  %v1908_v3 = vld [vmem:[#allocation10 + $0xa8] sm:$0xff] }
 0x65c   :  { %1735 = vmatpush1.msra.mxu0 %v5368_v62  ;;  %1806 = vmatpush1.msra.mxu1 %v5369_v61  ;;  %v4791_v1 = vld [vmem:[%s5093_s5 + $0x28] sm:$0xff]  ;;  %v1907_v62 = vld [vmem:[#allocation10 + $0xa0] sm:$0xff] }
 0x65d   :  { %1736 = vmatprep.subr.mxu0 %v5370_v10  ;;  %1807 = vmatprep.subr.mxu1 %v5371_v9  ;;  %v4797_v61 = vld [vmem:[%s5093_s5 + $0x20] sm:$0xff]  ;;  %v1906_v10 = vld [vmem:[#allocation10 + $0x98] sm:$0xff] }
 0x65e   :  { %1737 = vmatpush1.msra.mxu0 %v5372_v4  ;;  %1808 = vmatpush1.msra.mxu1 %v5373_v2  ;;  %v4803_v9 = vld [vmem:[%s5093_s5 + $0x18] sm:$0xff]  ;;  %v1905_v4 = vld [vmem:[#allocation10 + $0x90] sm:$0xff] }
 0x65f   :  { %1738 = vmatprep.subr.mxu0 %v5374_v18  ;;  %1809 = vmatprep.subr.mxu1 %v5375_v54  ;;  %v4809_v2 = vld [vmem:[%s5093_s5 + $0x10] sm:$0xff]  ;;  %v1904_v18 = vld [vmem:[#allocation10 + $0x88] sm:$0xff]  ;;  %v1903_v54 = vld [vmem:[#allocation10 + $0x80] sm:$0xff] }
 0x660   :  { %1739 = vmatpush1.msra.mxu0 %v5376_v34  ;;  %1772 = vmatprep.mubr.f32.mxu0 %v5377_v35  ;;  %v4816_v34 = vld [vmem:[%s5093_s5 + $0x8] sm:$0xff] }
 0x661   :  { %1810 = vmatpush1.msra.mxu1 %v5378_v37  ;;  %1843 = vmatprep.mubr.f32.mxu1 %v5377_v35  ;;  %v1902_v37 = vld [vmem:[#allocation10 + $0x78] sm:$0xff] }
 0x662   :  { %1931 = vmatprep.subr.mxu0 %v1918_v38  ;;  %2098 = vmatprep.subr.mxu1 %v4721_v11  ;;  %v4822_v38 = vld [vmem:[%s5093_s5] sm:$0xff] }
 0x701   :  { %v1599_v7 = vpop.f32.mrf.mxu0  ;;  %v1670_v28 = vpop.f32.mrf.mxu1 }
 0x702   :  { %v1675_v22 = vadd.f32 %v1599_v7, %v5379_v58  ;;  %v1677_v41 = vadd.f32 %v1670_v28, %v5382_v40  ;;  %v1901_v7 = vld [vmem:[#allocation10 + $0x70] sm:$0xff]  ;;  %v1900_v58 = vld [vmem:[#allocation10 + $0x68] sm:$0xff]  ;;  %v1894_v28 = vld [vmem:[#allocation10 + $0x38] sm:$0xff] }
 0x703   :  { %v1601_v23 = vpop.f32.mrf.mxu0  ;;  %v1672_v31 = vpop.f32.mrf.mxu1  ;;  %v1889_v40 = vld [vmem:[#allocation10 + $0x10] sm:$0xff] }
 0x704   :  { %v3123_v24 = vmul.f32 -1.442695, %v1675_v22  ;;  %v1676_v26 = vadd.f32 %v1601_v23, %v5380_v25  ;;  %v1678_v39 = vadd.f32 %v1672_v31, %v5381_v8  ;;  %v1899_v22 = vld [vmem:[#allocation10 + $0x60] sm:$0xff]  ;;  %v1898_v23 = vld [vmem:[#allocation10 + $0x58] sm:$0xff]  ;;  %v1896_v25 = vld [vmem:[#allocation10 + $0x48] sm:$0xff] }
 0x705   :  { %v1892_v31 = vld [vmem:[#allocation10 + $0x28] sm:$0xff]  ;;  %v1891_v8 = vld [vmem:[#allocation10 + $0x20] sm:$0xff] }
 0x706   :  { %3322 = vpow2.f32 %v3123_v24  ;;  %v3124_v29 = vmul.f32 -1.442695, %v1676_v26  ;;  %v3125_v42 = vmul.f32 -1.442695, %v1678_v39  ;;  %v1897_v24 = vld [vmem:[#allocation10 + $0x50] sm:$0xff]  ;;  %v1895_v26 = vld [vmem:[#allocation10 + $0x40] sm:$0xff] }
 0x707   :  { %v1890_v39 = vld [vmem:[#allocation10 + $0x18] sm:$0xff] }
 0x708   :  { %3324 = vpow2.f32 %v3124_v29  ;;  %v1893_v29 = vld [vmem:[#allocation10 + $0x30] sm:$0xff] }
 0x709   :  { %3326 = vtanh.f32 %v1677_v41  ;;  %v1888_v41 = vld [vmem:[#allocation10 + $0x8] sm:$0xff] }
 0x70a   :  { %3328 = vpow2.f32 %v3125_v42  ;;  %v1887_v42 = vld [vmem:[#allocation10] sm:$0xff] }
 0x713   :  { %v3323_v43 = vpop.eup %3322 }
 0x714   :  { %v1682_v44 = vadd.f32 1.0, %v3323_v43  ;;  %v5383_v43 = vld [vmem:[#allocation69_spill] sm:$0xff] }
 0x715   :  { %v3325_v46 = vpop.eup %3324 }
 0x716   :  { %3330 = vrcp.f32 %v1682_v44  ;;  %v1688_v47 = vadd.f32 1.0, %v3325_v46  ;;  %v3327_v48 = vpop.eup %3326  ;;  %v5384_v44 = vld [vmem:[#allocation20_spill] sm:$0xff]  ;;  %v5385_v46 = vld [vmem:[#allocation23_spill] sm:$0xff] }
 0x717   :  { %v3329_v49 = vpop.eup %3328 }
 0x718   :  { %3332 = vrcp.f32 %v1688_v47  ;;  %v1695_v53 = vadd.f32 1.0, %v3329_v49  ;;  %v5386_v47 = vld [vmem:[#allocation43_spill] sm:$0xff] }
 0x71a   :  { %3334 = vrcp.f32 %v1695_v53 }
 0x723   :  { %v3331_v50 = vpop.eup %3330 }
 0x724   :  { %v1699_v51 = vmul.f32 %v3331_v50, %v3327_v48  ;;  %v5387_v48 = vld [vmem:[#allocation39_spill] sm:$0xff]  ;;  %v5388_v50 = vld [vmem:[#allocation65_spill] sm:$0xff] }
 0x725   :  { %v3333_v52 = vpop.eup %3332 }
 0x726   :  { %v1698_v27 = vmul.f32 %v3333_v52, %v4647_v56  ;;  %v1912_v56 = vld [vmem:[#allocation10 + $0xc8] sm:$0xff] }
 0x727   :  { %v3335_v17 = vpop.eup %3334 }
 0x728   :  { %v4729_v33 = vadd.f32 %v1699_v51, %v1698_v27  ;;  %v5389_v27 = vld [vmem:[#allocation67_spill] sm:$0xff] }
 0x72a   :  { %3336 = vtanh.f32 %v4729_v33 }
 0x737   :  { %v3337_v20 = vpop.eup %3336 }
 0x738   :  { %v4732_v30 = vmul.f32 %v3337_v20, %v3335_v17 }
 0x73a   :  { %1773 = vmatmul.mubr.f32.vlgmr.msra.gmra.mxu0 %v4732_v30  ;;  %1844 = vmatmul.mubr.f32.vlgmr.msra.gmra.mxu1 %v4732_v30 }
 0x73b   :  { %1932 = vmatpush1.msra.mxu0 %v1917_v16  ;;  %2099 = vmatpush1.msra.mxu1 %v4737_v21 }
 0x73c   :  { %1933 = vmatprep.subr.mxu0 %v1916_v12  ;;  %2100 = vmatprep.subr.mxu1 %v4742_v19  ;;  %v5390_v12 = vld [vmem:[#allocation68_spill] sm:$0xff] }
 0x73d   :  { %1934 = vmatpush1.msra.mxu0 %v1915_v13  ;;  %2101 = vmatpush1.msra.mxu1 %v4749_v15 }
 0x73e   :  { %1935 = vmatprep.subr.mxu0 %v1914_v60  ;;  %2102 = vmatprep.subr.mxu1 %v4755_v14  ;;  %v5391_v60 = vld [vmem:[#allocation66_spill] sm:$0xff] }
 0x73f   :  { %1936 = vmatpush1.msra.mxu0 %v1913_v0  ;;  %2103 = vmatpush1.msra.mxu1 %v4761_v32 }
 0x740   :  { %1937 = vmatprep.subr.mxu0 %v1912_v56  ;;  %2104 = vmatprep.subr.mxu1 %v4767_v57 }
 0x741   :  { %1938 = vmatpush1.msra.mxu0 %v1911_v55  ;;  %2105 = vmatpush1.msra.mxu1 %v4773_v5 }
 0x742   :  { %1939 = vmatprep.subr.mxu0 %v1910_v59  ;;  %2106 = vmatprep.subr.mxu1 %v4779_v36 }
 0x743   :  { %1940 = vmatpush1.msra.mxu0 %v1909_v63  ;;  %2107 = vmatpush1.msra.mxu1 %v4785_v45 }
 0x744   :  { %1941 = vmatprep.subr.mxu0 %v1908_v3  ;;  %2108 = vmatprep.subr.mxu1 %v4791_v1  ;;  %v1919_v3 = vld [vmem:[%s5094_s6] sm:$0x3]  ;;  %s3633_s6 = smov 64  }
 0x745   :  { %1942 = vmatpush1.msra.mxu0 %v1907_v62  ;;  %2109 = vmatpush1.msra.mxu1 %v4797_v61  ;;  %v5392_v62 = vld [vmem:[#allocation41_spill] sm:$0xff] }
 0x746   :  { %1943 = vmatprep.subr.mxu0 %v1906_v10  ;;  %2110 = vmatprep.subr.mxu1 %v4803_v9  ;;  %v5393_v10 = vsub.s32 0, %v5392_v62 }
 0x747   :  { %1944 = vmatpush1.msra.mxu0 %v1905_v4  ;;  %2111 = vmatpush1.msra.mxu1 %v4809_v2 }
 0x748   :  { %1945 = vmatprep.subr.mxu0 %v1904_v18  ;;  %1995 = vmatprep.mubr.f32.mxu0 %v5377_v35  ;;  %v4887_v4 = vrot.slane %v1919_v3, %v5393_v10 }
 0x749   :  { %1946 = vmatpush1.msra.mxu0 %v1903_v54  ;;  %2112 = vmatprep.subr.mxu1 %v4816_v34 }
 0x74a   :  { %1947 = vmatprep.subr.mxu0 %v1902_v37  ;;  %2113 = vmatpush1.msra.mxu1 %v4822_v38 }
 0x74b   :  { %1948 = vmatpush1.msra.mxu0 %v1901_v7  ;;  %2146 = vmatprep.mubr.f32.mxu1 %v5377_v35 }
 0x74c   :  { %1949 = vmatprep.subr.mxu0 %v1900_v58  ;;  %2147 = vmatmul.mubr.f32.vlgmr.msra.gmra.mxu1 %v5377_v35 }
 0x74d   :  { %1950 = vmatpush1.msra.mxu0 %v1899_v22  ;;  %2200 = vmatprep.subr.mxu1 %v4721_v11 }
 0x74e   :  { %1951 = vmatprep.subr.mxu0 %v1898_v23  ;;  %2201 = vmatpush1.msra.mxu1 %v4737_v21 }
 0x74f   :  { %1952 = vmatpush1.msra.mxu0 %v1897_v24  ;;  %2202 = vmatprep.subr.mxu1 %v4742_v19 }
 0x750   :  { %1953 = vmatprep.subr.mxu0 %v1896_v25  ;;  %2203 = vmatpush1.msra.mxu1 %v4749_v15 }
 0x751   :  { %1954 = vmatpush1.msra.mxu0 %v1895_v26  ;;  %2204 = vmatprep.subr.mxu1 %v4755_v14 }
 0x752   :  { %1955 = vmatprep.subr.mxu0 %v1894_v28  ;;  %2205 = vmatpush1.msra.mxu1 %v4761_v32 }
 0x753   :  { %1956 = vmatpush1.msra.mxu0 %v1893_v29  ;;  %2206 = vmatprep.subr.mxu1 %v4767_v57 }
 0x754   :  { %1957 = vmatprep.subr.mxu0 %v1892_v31  ;;  %2207 = vmatpush1.msra.mxu1 %v4773_v5 }
 0x755   :  { %1958 = vmatpush1.msra.mxu0 %v1891_v8  ;;  %2208 = vmatprep.subr.mxu1 %v4779_v36  ;;  %v5394_v8 = vsub.s32 1, %v5392_v62 }
 0x756   :  { %1959 = vmatprep.subr.mxu0 %v1890_v39  ;;  %2209 = vmatpush1.msra.mxu1 %v4785_v45 }
 0x757   :  { %1960 = vmatpush1.msra.mxu0 %v1889_v40  ;;  %2210 = vmatprep.subr.mxu1 %v4791_v1  ;;  %v4893_v39 = vrot.slane %v1919_v3, %v5394_v8 }
 0x758   :  { %1961 = vmatprep.subr.mxu0 %v1888_v41  ;;  %2211 = vmatpush1.msra.mxu1 %v4797_v61 }
 0x759   :  { %1962 = vmatpush1.msra.mxu0 %v1887_v42  ;;  %2212 = vmatprep.subr.mxu1 %v4803_v9 }
 0x75a   :  { %1996 = vmatmul.mubr.f32.vlgmr.msra.gmra.mxu0 %v5383_v43  ;;  %2213 = vmatpush1.msra.mxu1 %v4809_v2 }
 0x75b   :  { %2001 = vmatprep.mubr.f32.mxu0 %v5377_v35  ;;  %2214 = vmatprep.subr.mxu1 %v4816_v34 }
 0x75c   :  { %2215 = vmatpush1.msra.mxu1 %v4822_v38  ;;  %2248 = vmatprep.mubr.f32.mxu1 %v5377_v35 }
 0x75d   :  { %2302 = vmatprep.subr.mxu1 %v4721_v11  ;;  %2404 = vmatprep.subr.mxu0 %v4721_v11 }
 0x75e   :  { %2002 = vmatmul.mubr.f32.gmra.mxu0 %v5384_v44 }
 0x75f   :  { %2007 = vmatprep.mubr.f32.mxu0 %v5377_v35  ;;  %2405 = vmatpush1.msra.mxu0 %v4737_v21 }
 0x760   :  { %2406 = vmatprep.subr.mxu0 %v4742_v19 }
 0x761   :  { %2407 = vmatpush1.msra.mxu0 %v4749_v15 }
 0x762   :  { %2008 = vmatmul.mubr.f32.gmra.mxu0 %v5385_v46  ;;  %2408 = vmatprep.subr.mxu0 %v4755_v14 }
 0x763   :  { %2013 = vmatprep.mubr.f32.mxu0 %v5377_v35  ;;  %2409 = vmatpush1.msra.mxu0 %v4761_v32 }
 0x764   :  { %2410 = vmatprep.subr.mxu0 %v4767_v57 }
 0x765   :  { %2411 = vmatpush1.msra.mxu0 %v4773_v5 }
 0x766   :  { %2014 = vmatmul.mubr.f32.gmra.mxu0 %v5386_v47  ;;  %2412 = vmatprep.subr.mxu0 %v4779_v36 }
 0x767   :  { %2019 = vmatprep.mubr.f32.mxu0 %v5377_v35  ;;  %2413 = vmatpush1.msra.mxu0 %v4785_v45 }
 0x768   :  { %2414 = vmatprep.subr.mxu0 %v4791_v1 }
 0x769   :  { %2415 = vmatpush1.msra.mxu0 %v4797_v61 }
 0x76a   :  { %2020 = vmatmul.mubr.f32.gmra.mxu0 %v5387_v48  ;;  %2416 = vmatprep.subr.mxu0 %v4803_v9 }
 0x76b   :  { %2025 = vmatprep.mubr.f32.mxu0 %v5377_v35  ;;  %2417 = vmatpush1.msra.mxu0 %v4809_v2 }
 0x76c   :  { %2418 = vmatprep.subr.mxu0 %v4816_v34 }
 0x76d   :  { %2419 = vmatpush1.msra.mxu0 %v4822_v38 }
 0x76e   :  { %2026 = vmatmul.mubr.f32.gmra.mxu0 %v4650_v6  ;;  %2608 = vmatprep.subr.mxu0 %v4721_v11 }
 0x76f   :  { %2031 = vmatprep.mubr.f32.mxu0 %v5377_v35 }
 0x772   :  { %2032 = vmatmul.mubr.f32.gmra.mxu0 %v4732_v30 }
 0x773   :  { %2037 = vmatprep.mubr.f32.mxu0 %v5377_v35 }
 0x7fa   :  { %v1774_v49 = vpop.f32.mrf.mxu0  ;;  %v1845_v20 = vpop.f32.mrf.mxu1 }
 0x7fb   :  { %v1850_v51 = vadd.f32 %v1774_v49, %v5388_v50  ;;  %v1852_v0 = vadd.f32 %v1845_v20, %v5391_v60 }
 0x7fc   :  { %v1776_v52 = vpop.f32.mrf.mxu0  ;;  %v1847_v6 = vpop.f32.mrf.mxu1 }
 0x7fd   :  { %v3126_v53 = vmul.f32 -1.442695, %v1850_v51  ;;  %v1851_v17 = vadd.f32 %v1776_v52, %v5389_v27  ;;  %v1853_v13 = vadd.f32 %v1847_v6, %v5390_v12 }
 0x7ff   :  { %3338 = vpow2.f32 %v3126_v53  ;;  %v3127_v16 = vmul.f32 -1.442695, %v1851_v17  ;;  %v3128_v56 = vmul.f32 -1.442695, %v1853_v13 }
 0x801   :  { %3340 = vpow2.f32 %v3127_v16 }
 0x802   :  { %3342 = vtanh.f32 %v1852_v0 }
 0x803   :  { %3344 = vpow2.f32 %v3128_v56 }
 0x80c   :  { %v3339_v30 = vpop.eup %3338  ;;  %v2148_v22 = vpop.f32.mrf.mxu1 }
 0x80d   :  { %v1857_v55 = vadd.f32 1.0, %v3339_v30 }
 0x80e   :  { %v3341_v59 = vpop.eup %3340  ;;  %v2150_v42 = vpop.f32.mrf.mxu1 }
 0x80f   :  { %3346 = vrcp.f32 %v1857_v55  ;;  %v1863_v63 = vadd.f32 1.0, %v3341_v59  ;;  %v3343_v18 = vpop.eup %3342 }
 0x810   :  { %v3345_v37 = vpop.eup %3344 }
 0x811   :  { %3348 = vrcp.f32 %v1863_v63  ;;  %v1870_v28 = vadd.f32 1.0, %v3345_v37 }
 0x81a   :  { %v1997_v54 = vpop.f32.mrf.mxu0 }
 0x81b   :  { %v1998_v7 = vadd.f32 %v1997_v54, %v4887_v4 }
 0x81c   :  { %v3347_v58 = vpop.eup %3346  ;;  %v1999_v40 = vpop.f32.mrf.mxu0 }
 0x81d   :  { %v1874_v23 = vmul.f32 %v3347_v58, %v3343_v18  ;;  %v2153_v24 = vadd.f32 %v2148_v22, %v1998_v7  ;;  %v2000_v41 = vadd.f32 %v1999_v40, %v4893_v39 }
 0x81e   :  { %v3349_v25 = vpop.eup %3348  ;;  %v2003_v0 = vpop.f32.mrf.mxu0 }
 0x81f   :  { %v1873_v26 = vmul.f32 %v3349_v25, %v4729_v33  ;;  %v3129_v29 = vmul.f32 -1.442695, %v2153_v24  ;;  %v2154_v43 = vadd.f32 %v2150_v42, %v2000_v41  ;;  %v2004_v56 = vadd.f32 %v2003_v0, %v4887_v4 }
 0x820   :  { %v2005_v63 = vpop.f32.mrf.mxu0 }
 0x821   :  { %3350 = vpow2.f32 %v3129_v29  ;;  %v1875_v31 = vadd.f32 %v1874_v23, %v1873_v26  ;;  %v3130_v52 = vmul.f32 -1.442695, %v2154_v43  ;;  %v2006_v62 = vadd.f32 %v2005_v63, %v4893_v39 }
 0x822   :  { %3352 = vrcp.f32 %v1870_v28  ;;  %v2009_v41 = vpop.f32.mrf.mxu0 }
 0x823   :  { %3354 = vtanh.f32 %v1875_v31  ;;  %v2010_v42 = vadd.f32 %v2009_v41, %v4887_v4 }
 0x824   :  { %3356 = vtanh.f32 %v2154_v43 }
 0x82e   :  { %v3351_v44 = vpop.eup %3350 }
 0x82f   :  { %v2158_v46 = vadd.f32 1.0, %v3351_v44  ;;  %v3353_v47 = vpop.eup %3352 }
 0x830   :  { %v3355_v33 = vpop.eup %3354 }
 0x831   :  { %3358 = vrcp.f32 %v2158_v46  ;;  %v1877_v48 = vmul.f32 %v3355_v33, %v3353_v47  ;;  %v3357_v49 = vpop.eup %3356  ;;  %v2011_v47 = vpop.f32.mrf.mxu0 }
 0x832   :  { %3360 = vpow2.f32 %v3130_v52 }
 0x833   :  { %2038 = vmatmul.mubr.f32.gmra.mxu0 %v1877_v48  ;;  %v2012_v48 = vadd.f32 %v2011_v47, %v4893_v39 }
 0x834   :  { %2452 = vmatprep.mubr.f32.mxu0 %v5377_v35 }
 0x83e   :  { %v3359_v50 = vpop.eup %3358 }
 0x83f   :  { %v2169_v51 = vmul.f32 %v3359_v50, %v3357_v49  ;;  %v3361_v53 = vpop.eup %3360  ;;  %v2168_v17 = vmul.f32 0.0, %v3359_v50 }
 0x840   :  { %v2165_v27 = vadd.f32 1.0, %v3361_v53 }
 0x841   :  { %2171 = vrot.lane.b32.xlu0 %v2169_v51, %s3633_s6 }
 0x842   :  { %3362 = vrcp.f32 %v2165_v27 }
 0x84f   :  { %v3363_v6 = vpop.eup %3362 }
 0x8b3   :  { %v2172_v20 = vpop.permute.xlu0 %2171 }
 0x8b4   :  { %v2174_v16 = vadd.f32 %v2172_v20, %v2168_v17 }
 0x8b6   :  { %3364 = vtanh.f32 %v2174_v16 }
 0x8c3   :  { %v3365_v12 = vpop.eup %3364 }
 0x8c4   :  { %v2176_v13 = vmul.f32 %v3365_v12, %v3363_v6 }
 0x8c6   :  { %2180 = vrot.lane.b32.xlu0 %v2176_v13, %s3633_s6 }
 0x938   :  { %v2181_v60 = vpop.permute.xlu0 %2180 }
 0x939   :  { %3131 = vmatmul.mubr.msk.f32.vlgmr.msra.gmra.mxu1 %vm2078_vm1, %v2181_v60 }
 0x93a   :  { %2303 = vmatpush1.msra.mxu1 %v4737_v21  ;;  %2350 = vmatprep.mubr.f32.mxu1 %v5377_v35 }
 0x93b   :  { %2304 = vmatprep.subr.mxu1 %v4742_v19 }
 0x93c   :  { %2305 = vmatpush1.msra.mxu1 %v4749_v15 }
 0x93d   :  { %2306 = vmatprep.subr.mxu1 %v4755_v14 }
 0x93e   :  { %2307 = vmatpush1.msra.mxu1 %v4761_v32 }
 0x93f   :  { %2308 = vmatprep.subr.mxu1 %v4767_v57 }
 0x940   :  { %2309 = vmatpush1.msra.mxu1 %v4773_v5 }
 0x941   :  { %2310 = vmatprep.subr.mxu1 %v4779_v36 }
 0x942   :  { %2311 = vmatpush1.msra.mxu1 %v4785_v45 }
 0x943   :  { %2312 = vmatprep.subr.mxu1 %v4791_v1 }
 0x944   :  { %2313 = vmatpush1.msra.mxu1 %v4797_v61 }
 0x945   :  { %2314 = vmatprep.subr.mxu1 %v4803_v9 }
 0x946   :  { %2315 = vmatpush1.msra.mxu1 %v4809_v2 }
 0x947   :  { %2316 = vmatprep.subr.mxu1 %v4816_v34 }
 0x948   :  { %2317 = vmatpush1.msra.mxu1 %v4822_v38 }
 0x949   :  { %2506 = vmatprep.subr.mxu1 %v4721_v11 }
 0x9f9   :  { %v2250_v30 = vpop.f32.mrf.mxu1 }
 0x9fa   :  { %v2255_v55 = vadd.f32 %v2250_v30, %v2004_v56 }
 0x9fb   :  { %v2252_v3 = vpop.f32.mrf.mxu1 }
 0x9fc   :  { %v3132_v59 = vmul.f32 -1.442695, %v2255_v55  ;;  %v2256_v10 = vadd.f32 %v2252_v3, %v2006_v62  ;;  %v2015_v55 = vpop.f32.mrf.mxu0 }
 0x9fe   :  { %3366 = vpow2.f32 %v3132_v59  ;;  %v3133_v22 = vmul.f32 -1.442695, %v2256_v10  ;;  %v2017_v59 = vpop.f32.mrf.mxu0 }
 0x9ff   :  { %3368 = vtanh.f32 %v2256_v10 }
 0xa00   :  { %v2021_v63 = vpop.f32.mrf.mxu0 }
 0xa02   :  { %v2023_v3 = vpop.f32.mrf.mxu0 }
 0xa04   :  { %v4961_v62 = vpop.f32.mrf.mxu0 }
 0xa06   :  { %v4963_v10 = vpop.f32.mrf.mxu0 }
 0xa0b   :  { %v3367_v18 = vpop.eup %3366 }
 0xa0c   :  { %v2260_v54 = vadd.f32 1.0, %v3367_v18  ;;  %v3369_v37 = vpop.eup %3368  ;;  %v4965_v18 = vpop.f32.mrf.mxu0 }
 0xa0e   :  { %3370 = vrcp.f32 %v2260_v54  ;;  %v4967_v54 = vpop.f32.mrf.mxu0 }
 0xa0f   :  { %3372 = vpow2.f32 %v3133_v22 }
 0xa1b   :  { %v3371_v7 = vpop.eup %3370 }
 0xa1c   :  { %v2271_v58 = vmul.f32 %v3371_v7, %v3369_v37  ;;  %v3373_v23 = vpop.eup %3372  ;;  %v2270_v25 = vmul.f32 %v3371_v7, %v2174_v16  ;;  %v4969_v37 = vpop.f32.mrf.mxu0 }
 0xa1d   :  { %v2267_v24 = vadd.f32 1.0, %v3373_v23 }
 0xa1e   :  { %2273 = vrot.lane.b32.xlu1 %v2271_v58, %s3633_s6  ;;  %v4971_v7 = vpop.f32.mrf.mxu0  ;;  %v2016_v58 = vadd.f32 %v2015_v55, %v4887_v4 }
 0xa1f   :  { %3374 = vrcp.f32 %v2267_v24 }
 0xa2c   :  { %v3375_v29 = vpop.eup %3374 }
 0xa90   :  { %v2274_v26 = vpop.permute.xlu1 %2273 }
 0xa91   :  { %v2276_v28 = vadd.f32 %v2274_v26, %v2270_v25  ;;  %v2018_v25 = vadd.f32 %v2017_v59, %v4893_v39 }
 0xa93   :  { %3376 = vtanh.f32 %v2276_v28 }
 0xaa0   :  { %v3377_v31 = vpop.eup %3376 }
 0xaa1   :  { %v2278_v8 = vmul.f32 %v3377_v31, %v3375_v29 }
 0xaa3   :  { %2282 = vrot.lane.b32.xlu1 %v2278_v8, %s3633_s6 }
 0xb15   :  { %v2283_v40 = vpop.permute.xlu1 %2282 }
 0xb16   :  { %3134 = vmatmul.mubr.msk.f32.vlgmr.msra.gmra.mxu1 %vm2078_vm1, %v2283_v40 }
 0xb17   :  { %2507 = vmatpush1.msra.mxu1 %v4737_v21  ;;  %2554 = vmatprep.mubr.f32.mxu1 %v5377_v35 }
 0xb18   :  { %2508 = vmatprep.subr.mxu1 %v4742_v19 }
 0xb19   :  { %2509 = vmatpush1.msra.mxu1 %v4749_v15 }
 0xb1a   :  { %2510 = vmatprep.subr.mxu1 %v4755_v14 }
 0xb1b   :  { %2511 = vmatpush1.msra.mxu1 %v4761_v32 }
 0xb1c   :  { %2512 = vmatprep.subr.mxu1 %v4767_v57 }
 0xb1d   :  { %2513 = vmatpush1.msra.mxu1 %v4773_v5 }
 0xb1e   :  { %2514 = vmatprep.subr.mxu1 %v4779_v36 }
 0xb1f   :  { %2515 = vmatpush1.msra.mxu1 %v4785_v45 }
 0xb20   :  { %2516 = vmatprep.subr.mxu1 %v4791_v1 }
 0xb21   :  { %2517 = vmatpush1.msra.mxu1 %v4797_v61 }
 0xb22   :  { %2518 = vmatprep.subr.mxu1 %v4803_v9 }
 0xb23   :  { %2519 = vmatpush1.msra.mxu1 %v4809_v2 }
 0xb24   :  { %2520 = vmatprep.subr.mxu1 %v4816_v34 }
 0xb25   :  { %2521 = vmatpush1.msra.mxu1 %v4822_v38 }
 0xb26   :  { %2710 = vmatprep.subr.mxu1 %v4721_v11 }
 0xbd6   :  { %v2352_v43 = vpop.f32.mrf.mxu1 }
 0xbd7   :  { %v2357_v44 = vadd.f32 %v2352_v43, %v2010_v42 }
 0xbd8   :  { %v2354_v33 = vpop.f32.mrf.mxu1 }
 0xbd9   :  { %v3135_v46 = vmul.f32 -1.442695, %v2357_v44  ;;  %v2358_v49 = vadd.f32 %v2354_v33, %v2012_v48 }
 0xbdb   :  { %3378 = vpow2.f32 %v3135_v46  ;;  %v3136_v17 = vmul.f32 -1.442695, %v2358_v49 }
 0xbdc   :  { %3380 = vtanh.f32 %v2358_v49 }
 0xbe8   :  { %v3379_v50 = vpop.eup %3378 }
 0xbe9   :  { %v2362_v51 = vadd.f32 1.0, %v3379_v50  ;;  %v3381_v52 = vpop.eup %3380 }
 0xbeb   :  { %3382 = vrcp.f32 %v2362_v51  ;;  %v2022_v51 = vadd.f32 %v2021_v63, %v4887_v4 }
 0xbec   :  { %3384 = vpow2.f32 %v3136_v17 }
 0xbf8   :  { %v3383_v53 = vpop.eup %3382 }
 0xbf9   :  { %v2373_v27 = vmul.f32 %v3383_v53, %v3381_v52  ;;  %v3385_v20 = vpop.eup %3384  ;;  %v2372_v6 = vmul.f32 %v3383_v53, %v2276_v28 }
 0xbfa   :  { %v2369_v16 = vadd.f32 1.0, %v3385_v20  ;;  %v2024_v20 = vadd.f32 %v2023_v3, %v4893_v39 }
 0xbfb   :  { %2375 = vrot.lane.b32.xlu0 %v2373_v27, %s3633_s6 }
 0xbfc   :  { %3386 = vrcp.f32 %v2369_v16 }
 0xc09   :  { %v3387_v60 = vpop.eup %3386 }
 0xc6d   :  { %v2376_v12 = vpop.permute.xlu0 %2375 }
 0xc6e   :  { %v2378_v13 = vadd.f32 %v2376_v12, %v2372_v6 }
 0xc70   :  { %3388 = vtanh.f32 %v2378_v13 }
 0xc7d   :  { %v3389_v0 = vpop.eup %3388 }
 0xc7e   :  { %v2380_v56 = vmul.f32 %v3389_v0, %v3387_v60 }
 0xc80   :  { %2384 = vrot.lane.b32.xlu1 %v2380_v56, %s3633_s6 }
 0xcf2   :  { %v2385_v30 = vpop.permute.xlu1 %2384 }
 0xcf3   :  { %3137 = vmatmul.mubr.msk.f32.vlgmr.msra.gmra.mxu0 %vm2078_vm1, %v2385_v30 }
 0xcf4   :  { %2609 = vmatpush1.msra.mxu0 %v4737_v21  ;;  %2656 = vmatprep.mubr.f32.mxu0 %v5377_v35 }
 0xcf5   :  { %2610 = vmatprep.subr.mxu0 %v4742_v19 }
 0xcf6   :  { %2611 = vmatpush1.msra.mxu0 %v4749_v15 }
 0xcf7   :  { %2612 = vmatprep.subr.mxu0 %v4755_v14 }
 0xcf8   :  { %2613 = vmatpush1.msra.mxu0 %v4761_v32 }
 0xcf9   :  { %2614 = vmatprep.subr.mxu0 %v4767_v57 }
 0xcfa   :  { %2615 = vmatpush1.msra.mxu0 %v4773_v5 }
 0xcfb   :  { %2616 = vmatprep.subr.mxu0 %v4779_v36 }
 0xcfc   :  { %2617 = vmatpush1.msra.mxu0 %v4785_v45 }
 0xcfd   :  { %2618 = vmatprep.subr.mxu0 %v4791_v1 }
 0xcfe   :  { %2619 = vmatpush1.msra.mxu0 %v4797_v61 }
 0xcff   :  { %2620 = vmatprep.subr.mxu0 %v4803_v9 }
 0xd00   :  { %2621 = vmatpush1.msra.mxu0 %v4809_v2 }
 0xd01   :  { %2622 = vmatprep.subr.mxu0 %v4816_v34 }
 0xd02   :  { %2623 = vmatpush1.msra.mxu0 %v4822_v38 }
 0xd03   :  { %2812 = vmatprep.subr.mxu0 %v4721_v11 }
 0xdb3   :  { %v2454_v22 = vpop.f32.mrf.mxu0 }
 0xdb4   :  { %v2459_v11 = vadd.f32 %v2454_v22, %v2016_v58 }
 0xdb5   :  { %v2456_v24 = vpop.f32.mrf.mxu0 }
 0xdb6   :  { %v3138_v23 = vmul.f32 -1.442695, %v2459_v11  ;;  %v2460_v26 = vadd.f32 %v2456_v24, %v2018_v25 }
 0xdb8   :  { %3390 = vpow2.f32 %v3138_v23  ;;  %v3139_v41 = vmul.f32 -1.442695, %v2460_v26 }
 0xdb9   :  { %3392 = vtanh.f32 %v2460_v26 }
 0xdc5   :  { %v3391_v28 = vpop.eup %3390 }
 0xdc6   :  { %v2464_v29 = vadd.f32 1.0, %v3391_v28  ;;  %v3393_v31 = vpop.eup %3392 }
 0xdc8   :  { %3394 = vrcp.f32 %v2464_v29 }
 0xdc9   :  { %3396 = vpow2.f32 %v3139_v41 }
 0xdd5   :  { %v3395_v8 = vpop.eup %3394 }
 0xdd6   :  { %v2475_v40 = vmul.f32 %v3395_v8, %v3393_v31  ;;  %v3397_v42 = vpop.eup %3396  ;;  %v2474_v44 = vmul.f32 %v3395_v8, %v2378_v13  ;;  %v2034_v31 = vadd.f32 %v4965_v18, %v4887_v4 }
 0xdd7   :  { %v2471_v43 = vadd.f32 1.0, %v3397_v42 }
 0xdd8   :  { %2477 = vrot.lane.b32.xlu0 %v2475_v40, %s3633_s6 }
 0xdd9   :  { %3398 = vrcp.f32 %v2471_v43  ;;  %v2036_v43 = vadd.f32 %v4967_v54, %v4893_v39 }
 0xde6   :  { %v3399_v33 = vpop.eup %3398 }
 0xe4a   :  { %v2478_v46 = vpop.permute.xlu0 %2477 }
 0xe4b   :  { %v2480_v47 = vadd.f32 %v2478_v46, %v2474_v44 }
 0xe4d   :  { %3400 = vtanh.f32 %v2480_v47 }
 0xe5a   :  { %v3401_v48 = vpop.eup %3400 }
 0xe5b   :  { %v2482_v49 = vmul.f32 %v3401_v48, %v3399_v33 }
 0xe5d   :  { %2486 = vrot.lane.b32.xlu1 %v2482_v49, %s3633_s6 }
 0xecf   :  { %v2487_v50 = vpop.permute.xlu1 %2486 }
 0xed0   :  { %3140 = vmatmul.mubr.msk.f32.vlgmr.msra.gmra.mxu1 %vm2078_vm1, %v2487_v50 }
 0xed1   :  { %2711 = vmatpush1.msra.mxu1 %v4737_v21  ;;  %2758 = vmatprep.mubr.f32.mxu1 %v5377_v35 }
 0xed2   :  { %2712 = vmatprep.subr.mxu1 %v4742_v19 }
 0xed3   :  { %2713 = vmatpush1.msra.mxu1 %v4749_v15 }
 0xed4   :  { %2714 = vmatprep.subr.mxu1 %v4755_v14 }
 0xed5   :  { %2715 = vmatpush1.msra.mxu1 %v4761_v32 }
 0xed6   :  { %2716 = vmatprep.subr.mxu1 %v4767_v57 }
 0xed7   :  { %2717 = vmatpush1.msra.mxu1 %v4773_v5 }
 0xed8   :  { %2718 = vmatprep.subr.mxu1 %v4779_v36 }
 0xed9   :  { %2719 = vmatpush1.msra.mxu1 %v4785_v45 }
 0xeda   :  { %2720 = vmatprep.subr.mxu1 %v4791_v1 }
 0xedb   :  { %2721 = vmatpush1.msra.mxu1 %v4797_v61 }
 0xedc   :  { %2722 = vmatprep.subr.mxu1 %v4803_v9 }
 0xedd   :  { %2723 = vmatpush1.msra.mxu1 %v4809_v2 }
 0xede   :  { %2724 = vmatprep.subr.mxu1 %v4816_v34 }
 0xedf   :  { %2725 = vmatpush1.msra.mxu1 %v4822_v38 }
 0xee0   :  { %3174 = vmatprep.subr.mxu1 %v5377_v35 }
 0xf90   :  { %v2556_v52 = vpop.f32.mrf.mxu1 }
 0xf91   :  { %v2561_v53 = vadd.f32 %v2556_v52, %v2022_v51 }
 0xf92   :  { %v2558_v17 = vpop.f32.mrf.mxu1 }
 0xf93   :  { %v3141_v27 = vmul.f32 -1.442695, %v2561_v53  ;;  %v2562_v16 = vadd.f32 %v2558_v17, %v2024_v20 }
 0xf95   :  { %3402 = vpow2.f32 %v3141_v27  ;;  %v3142_v56 = vmul.f32 -1.442695, %v2562_v16 }
 0xf96   :  { %3404 = vtanh.f32 %v2562_v16 }
 0xfa2   :  { %v3403_v6 = vpop.eup %3402 }
 0xfa3   :  { %v2566_v12 = vadd.f32 1.0, %v3403_v6  ;;  %v3405_v13 = vpop.eup %3404  ;;  %v2040_v6 = vadd.f32 %v4969_v37, %v4887_v4  ;;  %v2896_v37 = vld [vmem:[#allocation11 + $0x28] sm:$0xff] }
 0xfa5   :  { %3406 = vrcp.f32 %v2566_v12 }
 0xfa6   :  { %3408 = vpow2.f32 %v3142_v56  ;;  %v2042_v56 = vadd.f32 %v4971_v7, %v4893_v39  ;;  %v2894_v7 = vld [vmem:[#allocation11 + $0x18] sm:$0xff] }
 0xfb2   :  { %v3407_v60 = vpop.eup %3406 }
 0xfb3   :  { %v2577_v0 = vmul.f32 %v3407_v60, %v3405_v13  ;;  %v3409_v30 = vpop.eup %3408  ;;  %v2576_v59 = vmul.f32 %v3407_v60, %v2480_v47 }
 0xfb4   :  { %v2573_v55 = vadd.f32 1.0, %v3409_v30 }
 0xfb5   :  { %2579 = vrot.lane.b32.xlu0 %v2577_v0, %s3633_s6 }
 0xfb6   :  { %3410 = vrcp.f32 %v2573_v55 }
 0xfc3   :  { %v3411_v3 = vpop.eup %3410 }
0x1027   :  { %v2580_v63 = vpop.permute.xlu0 %2579 }
0x1028   :  { %v2582_v58 = vadd.f32 %v2580_v63, %v2576_v59 }
0x102a   :  { %3412 = vtanh.f32 %v2582_v58 }
0x1037   :  { %v3413_v22 = vpop.eup %3412 }
0x1038   :  { %v2584_v11 = vmul.f32 %v3413_v22, %v3411_v3  ;;  %v2898_v22 = vld [vmem:[#allocation11 + $0x38] sm:$0xff] }
0x103a   :  { %2588 = vrot.lane.b32.xlu1 %v2584_v11, %s3633_s6  ;;  %v2893_v11 = vld [vmem:[#allocation11 + $0x10] sm:$0xff] }
0x10ac   :  { %v2589_v23 = vpop.permute.xlu1 %2588 }
0x10ad   :  { %3143 = vmatmul.mubr.msk.f32.vlgmr.msra.gmra.mxu0 %vm2078_vm1, %v2589_v23  ;;  %v2892_v23 = vld [vmem:[#allocation11 + $0x8] sm:$0xff] }
0x10ae   :  { %2813 = vmatpush1.msra.mxu0 %v4737_v21  ;;  %2860 = vmatprep.mubr.f32.mxu0 %v5377_v35  ;;  %v2028_v21 = vadd.f32 %v4961_v62, %v4887_v4  ;;  %v2897_v4 = vld [vmem:[#allocation11 + $0x30] sm:$0xff] }
0x10af   :  { %2814 = vmatprep.subr.mxu0 %v4742_v19 }
0x10b0   :  { %2815 = vmatpush1.msra.mxu0 %v4749_v15 }
0x10b1   :  { %2816 = vmatprep.subr.mxu0 %v4755_v14 }
0x10b2   :  { %2817 = vmatpush1.msra.mxu0 %v4761_v32 }
0x10b3   :  { %2818 = vmatprep.subr.mxu0 %v4767_v57  ;;  %v2030_v57 = vadd.f32 %v4963_v10, %v4893_v39  ;;  %v2895_v39 = vld [vmem:[#allocation11 + $0x20] sm:$0xff] }
0x10b4   :  { %2819 = vmatpush1.msra.mxu0 %v4773_v5 }
0x10b5   :  { %2820 = vmatprep.subr.mxu0 %v4779_v36 }
0x10b6   :  { %2821 = vmatpush1.msra.mxu0 %v4785_v45 }
0x10b7   :  { %2822 = vmatprep.subr.mxu0 %v4791_v1 }
0x10b8   :  { %2823 = vmatpush1.msra.mxu0 %v4797_v61 }
0x10b9   :  { %2824 = vmatprep.subr.mxu0 %v4803_v9 }
0x10ba   :  { %2825 = vmatpush1.msra.mxu0 %v4809_v2 }
0x10bb   :  { %2826 = vmatprep.subr.mxu0 %v4816_v34 }
0x10bc   :  { %2827 = vmatpush1.msra.mxu0 %v4822_v38 }
0x10bd   :  { %3193 = vmatprep.subr.mxu0 %v5377_v35 }
0x116d   :  { %v2658_v19 = vpop.f32.mrf.mxu0 }
0x116e   :  { %v2663_v15 = vadd.f32 %v2658_v19, %v2028_v21  ;;  %v2891_v21 = vld [vmem:[#allocation11] sm:$0xff] }
0x116f   :  { %v2660_v32 = vpop.f32.mrf.mxu0 }
0x1170   :  { %v3144_v14 = vmul.f32 -1.442695, %v2663_v15  ;;  %v2664_v5 = vadd.f32 %v2660_v32, %v2030_v57 }
0x1172   :  { %3414 = vpow2.f32 %v3144_v14  ;;  %v3145_v2 = vmul.f32 -1.442695, %v2664_v5 }
0x1173   :  { %3416 = vtanh.f32 %v2664_v5 }
0x117f   :  { %v3415_v36 = vpop.eup %3414 }
0x1180   :  { %v2668_v45 = vadd.f32 1.0, %v3415_v36  ;;  %v3417_v1 = vpop.eup %3416  ;;  %v2989_v36 = vld [vmem:[%s5097_s9 + $0x38] sm:$0xff] }
0x1182   :  { %3418 = vrcp.f32 %v2668_v45  ;;  %v2988_v45 = vld [vmem:[%s5097_s9 + $0x30] sm:$0xff] }
0x1183   :  { %3420 = vpow2.f32 %v3145_v2 }
0x118f   :  { %v3419_v61 = vpop.eup %3418 }
0x1190   :  { %v2679_v9 = vmul.f32 %v3419_v61, %v3417_v1  ;;  %v3421_v34 = vpop.eup %3420  ;;  %v2678_v62 = vmul.f32 %v3419_v61, %v2582_v58  ;;  %v2987_v1 = vld [vmem:[%s5097_s9 + $0x28] sm:$0xff]  ;;  %v2986_v61 = vld [vmem:[%s5097_s9 + $0x20] sm:$0xff] }
0x1191   :  { %v2675_v38 = vadd.f32 1.0, %v3421_v34 }
0x1192   :  { %2681 = vrot.lane.b32.xlu0 %v2679_v9, %s3633_s6  ;;  %v2985_v9 = vld [vmem:[%s5097_s9 + $0x18] sm:$0xff] }
0x1193   :  { %3422 = vrcp.f32 %v2675_v38 }
0x11a0   :  { %v3423_v10 = vpop.eup %3422 }
0x1204   :  { %v2682_v24 = vpop.permute.xlu0 %2681 }
0x1205   :  { %v2684_v25 = vadd.f32 %v2682_v24, %v2678_v62  ;;  %v2984_v24 = vld [vmem:[%s5097_s9 + $0x10] sm:$0xff] }
0x1207   :  { %3424 = vtanh.f32 %v2684_v25 }
0x1214   :  { %v3425_v26 = vpop.eup %3424 }
0x1215   :  { %v2686_v28 = vmul.f32 %v3425_v26, %v3423_v10  ;;  %v2982_v10 = vld [vmem:[%s5097_s9] sm:$0xff] }
0x1216   :  { %v3152_v26 = vld [vmem:[%s5096_s8] ss:$0 sm:$0xff] }
0x1217   :  { %2690 = vrot.lane.b32.xlu1 %v2686_v28, %s3633_s6 }
0x1289   :  { %v2691_v29 = vpop.permute.xlu1 %2690 }
0x128a   :  { %3146 = vmatmul.mubr.msk.f32.vlgmr.msra.gmra.mxu1 %vm2078_vm1, %v2691_v29 }
0x128b   :  { %3175 = vmatpush3.msra.mxu1 %v2898_v22  ;;  %3190 = vmatprep.mubr.msk.f32.mxu1 %vm3634_vm2, %v5377_v35 }
0x128c   :  { %3176 = vmatprep.subr.mxu1 %v5377_v35 }
0x128d   :  { %3177 = vmatpush3.msra.mxu1 %v2897_v4 }
0x128e   :  { %3178 = vmatprep.subr.mxu1 %v5377_v35 }
0x128f   :  { %3179 = vmatpush3.msra.mxu1 %v2896_v37 }
0x1290   :  { %3180 = vmatprep.subr.mxu1 %v5377_v35 }
0x1291   :  { %3181 = vmatpush3.msra.mxu1 %v2895_v39 }
0x1292   :  { %3182 = vmatprep.subr.mxu1 %v5377_v35 }
0x1293   :  { %3183 = vmatpush3.msra.mxu1 %v2894_v7 }
0x1294   :  { %3184 = vmatprep.subr.mxu1 %v5377_v35 }
0x1295   :  { %3185 = vmatpush3.msra.mxu1 %v2893_v11 }
0x1296   :  { %3186 = vmatprep.subr.mxu1 %v5377_v35 }
0x1297   :  { %3187 = vmatpush3.msra.mxu1 %v2892_v23 }
0x1298   :  { %3188 = vmatprep.subr.mxu1 %v5377_v35 }
0x1299   :  { %3189 = vmatpush3.msra.mxu1 %v2891_v21 }
0x134a   :  { %v2760_v8 = vpop.f32.mrf.mxu1 }
0x134b   :  { %v2765_v40 = vadd.f32 %v2760_v8, %v2034_v31 }
0x134c   :  { %v2762_v42 = vpop.f32.mrf.mxu1 }
0x134d   :  { %v3147_v41 = vmul.f32 -1.442695, %v2765_v40  ;;  %v2766_v44 = vadd.f32 %v2762_v42, %v2036_v43  ;;  %v3154_v40 = vld [vmem:[%s5098_s10] ss:$0 sm:$0xff] }
0x134f   :  { %3426 = vpow2.f32 %v3147_v41  ;;  %v3148_v50 = vmul.f32 -1.442695, %v2766_v44 }
0x1350   :  { %3428 = vtanh.f32 %v2766_v44 }
0x135c   :  { %v3427_v46 = vpop.eup %3426 }
0x135d   :  { %v2770_v47 = vadd.f32 1.0, %v3427_v46  ;;  %v3429_v33 = vpop.eup %3428 }
0x135f   :  { %3430 = vrcp.f32 %v2770_v47 }
0x1360   :  { %3432 = vpow2.f32 %v3148_v50 }
0x136c   :  { %v3431_v48 = vpop.eup %3430 }
0x136d   :  { %v2781_v49 = vmul.f32 %v3431_v48, %v3429_v33  ;;  %v3433_v18 = vpop.eup %3432  ;;  %v2780_v52 = vmul.f32 %v3431_v48, %v2684_v25  ;;  %v2983_v25 = vld [vmem:[%s5097_s9 + $0x8] sm:$0xff]  ;;  %s3594_s9 = scalar_lea.vmem %s3079_s19, 128 }
0x136e   :  { %v2777_v51 = vadd.f32 1.0, %v3433_v18  ;;  %p3595_p6 = scmp.ne.s32.totalorder %s3079_s19, %s3594_s9  ;;  %p3600_p8 = scmp.lt.s32.totalorder %s3594_s9, %s3594_s9 }
0x136f   :  { %2783 = vrot.lane.b32.xlu0 %v2781_v49, %s3633_s6 }
0x1370   :  { %3434 = vrcp.f32 %v2777_v51  ;;  %p3601_p9 = por %p3600_p8, %p3599_p7 }
0x1372   :  { %p3602_p10 = pnand %p3601_p9, %p3595_p6 }
0x137d   :  { %v3435_v54 = vpop.eup %3434 }
0x13e1   :  { %v2784_v53 = vpop.permute.xlu0 %2783 }
0x13e2   :  { %v2786_v27 = vadd.f32 %v2784_v53, %v2780_v52 }
0x13e4   :  { %3436 = vtanh.f32 %v2786_v27 }
0x13f1   :  { %v3437_v17 = vpop.eup %3436 }
0x13f2   :  { %v2788_v20 = vmul.f32 %v3437_v17, %v3435_v54 }
0x13f4   :  { %2792 = vrot.lane.b32.xlu1 %v2788_v20, %s3633_s6 }
0x1466   :  { %v2793_v16 = vpop.permute.xlu1 %2792 }
0x1467   :  { %3149 = vmatmul.mubr.msk.f32.vlgmr.msra.gmra.mxu0 %vm2078_vm1, %v2793_v16 }
0x1468   :  { %3209 = vmatprep.mubr.msk.f32.mxu0 %vm3634_vm2, %v5377_v35  ;;  %3194 = vmatpush3.msra.mxu0 %v2989_v36 }
0x1469   :  { %3195 = vmatprep.subr.mxu0 %v5377_v35 }
0x146a   :  { %3196 = vmatpush3.msra.mxu0 %v2988_v45 }
0x146b   :  { %3197 = vmatprep.subr.mxu0 %v5377_v35 }
0x146c   :  { %3198 = vmatpush3.msra.mxu0 %v2987_v1 }
0x146d   :  { %3199 = vmatprep.subr.mxu0 %v5377_v35 }
0x146e   :  { %3200 = vmatpush3.msra.mxu0 %v2986_v61 }
0x146f   :  { %3201 = vmatprep.subr.mxu0 %v5377_v35 }
0x1470   :  { %3202 = vmatpush3.msra.mxu0 %v2985_v9 }
0x1471   :  { %3203 = vmatprep.subr.mxu0 %v5377_v35 }
0x1472   :  { %3204 = vmatpush3.msra.mxu0 %v2984_v24 }
0x1473   :  { %3205 = vmatprep.subr.mxu0 %v5377_v35 }
0x1474   :  { %3206 = vmatpush3.msra.mxu0 %v2983_v25 }
0x1475   :  { %3207 = vmatprep.subr.mxu0 %v5377_v35 }
0x1476   :  { %3208 = vmatpush3.msra.mxu0 %v2982_v10 }
0x1527   :  { %v2862_v12 = vpop.f32.mrf.mxu0 }
0x1528   :  { %v2867_v13 = vadd.f32 %v2862_v12, %v2040_v6 }
0x1529   :  { %v2864_v0 = vpop.f32.mrf.mxu0 }
0x152a   :  { %v3150_v60 = vmul.f32 -1.442695, %v2867_v13  ;;  %v2868_v30 = vadd.f32 %v2864_v0, %v2042_v56 }
0x152c   :  { %3438 = vpow2.f32 %v3150_v60  ;;  %v3151_v19 = vmul.f32 -1.442695, %v2868_v30 }
0x152d   :  { %3440 = vtanh.f32 %v2868_v30 }
0x1539   :  { %v3439_v55 = vpop.eup %3438 }
0x153a   :  { %v2872_v59 = vadd.f32 1.0, %v3439_v55  ;;  %v3441_v63 = vpop.eup %3440 }
0x153c   :  { %3442 = vrcp.f32 %v2872_v59 }
0x153d   :  { %3444 = vpow2.f32 %v3151_v19 }
0x1549   :  { %v3443_v58 = vpop.eup %3442 }
0x154a   :  { %v2883_v3 = vmul.f32 %v3443_v58, %v3441_v63  ;;  %v3445_v15 = vpop.eup %3444  ;;  %v2882_v32 = vmul.f32 %v3443_v58, %v2786_v27 }
0x154b   :  { %v2879_v14 = vadd.f32 1.0, %v3445_v15 }
0x154c   :  { %2885 = vrot.lane.b32.xlu0 %v2883_v3, %s3633_s6 }
0x154d   :  { %3446 = vrcp.f32 %v2879_v14 }
0x155a   :  { %v3447_v2 = vpop.eup %3446 }
0x15be   :  { %v2886_v57 = vpop.permute.xlu0 %2885 }
0x15bf   :  { %v2888_v5 = vadd.f32 %v2886_v57, %v2882_v32 }
0x15c1   :  { %3448 = vtanh.f32 %v2888_v5 }
0x15ce   :  { %v3449_v34 = vpop.eup %3448 }
0x15cf   :  { %v2890_v38 = vmul.f32 %v3449_v34, %v3447_v2 }
0x15d1   :  { %2907 = vrot.lane.b32.xlu1 %v2890_v38, %s3633_s6 }
0x1643   :  { %v2908_v62 = vpop.permute.xlu1 %2907 }
0x1644   :  { %3191 = vmatmul.mubr.msk.f32.vlgmr.msra.gmra.mxu1 %vm2078_vm1, %v2908_v62 }
0x1704   :  { %v2977_v28 = vpop.f32.mrf.mxu1 }
0x1705   :  { %v2978_v29 = vadd.f32 %v3152_v26, %v2977_v28 }
0x1706   :  { %v3192_v31 = vpop.f32.mrf.mxu1 }
0x1707   :  { %v2981_v8 = vmax.f32 %v2978_v29, 0.0 }
0x1709   :  { %3210 = vmatmul.mubr.msk.f32.vlgmr.msra.gmra.mxu0 %vm2078_vm1, %v2981_v8 }
0x17c9   :  { %v3066_v41 = vpop.f32.mrf.mxu0 }
0x17ca   :  { %v3067_v35 = vadd.f32 %v3154_v40, %v3066_v41 }
0x17cb   :  { %v3211_v42 = vpop.f32.mrf.mxu0 }
0x17cc   :  { %3071 = vst.msk [vmem:[#allocation13] sm:$0xff] %vm3070_vm3, %v3067_v35 }
0x17cd   :  { %3605 = shalt.err (!%p3602_p10)
}
0x17ce   :  { %3081 = dma.vmem_to_hbm [thread:$0]  %s3079_s19, 128, %s5099_s11, [#allocation7]  }
0x17cf   :  { %3620 = dma.done.wait [#allocation7], 128  }
0x17d0   :  { %3621 = vsyncadd [#allocation7], 4294967168 }
0x17d1   :  { %3085 = vsyncpa [#allocation6], 1 }
0x17d2   :  { %3086 = vsyncpa [#allocation9], 1 }
0x17d3   :  { %3087 = vsyncpa [#allocation12], 1 }
0x17d4   :  { %3088 = vsyncpa [#allocation7], 1 }

</bundles_post_ra>
